<compile_context>
chip_gen: v7x
topology: tpu7x:2x2x1
jax: 0.10.0
libtpu: 0.0.40
codegen_flags: <defaults>
</compile_context>

<pallas_src>
import functools

import jax
import jax.numpy as jnp
import numpy as np
from jax import lax
from jax.experimental import pallas as pl
from jax.experimental.pallas import tpu as pltpu


def _round_up(x, m):
    return ((x + m - 1) // m) * m


def _nbytes(shape, dtype):
    return int(np.prod(shape)) * np.dtype(dtype).itemsize


# ---------------------------------------------------------------------------
# Fused Pallas kernel: all LSTM layers + final FC + sigmoid, chunked over time
# ---------------------------------------------------------------------------
def _make_fused_lstm_kernel(num_layers, true_seq, padded_seq, seq_chunk,
                            batch_tile, hidden_p):
    L, S, Sp, Tc, Bt, Hp = (num_layers, true_seq, padded_seq, seq_chunk,
                            batch_tile, hidden_p)
    mask_tail = Sp != S          # only then can a chunk contain padded steps

    def kernel(*refs):
        it = iter(refs)
        x_ref = next(it)                          # (Tc*Bt, E)  current time chunk
        h0_ref = next(it)                         # (L, Bt, Hp)
        c0_ref = next(it)                         # (L, Bt, Hp)
        layer_refs = [(next(it), next(it), next(it)) for _ in range(L)]
        wfc_ref = next(it)                        # (Hp, Op)
        bfc_ref = next(it)                        # (1, Op)
        out_ref = next(it)                        # (Bt, Op)
        hT_ref = next(it)                         # (L, Bt, Hp)
        cT_ref = next(it)                         # (L, Bt, Hp)
        h_sc = next(it)                           # (L, Bt, Hp)  carried over chunks
        c_sc = next(it)                           # (L, Bt, Hp)  carried over chunks
        seq_sc = next(it)                         # (Tc*Bt, Hp)  inter-layer chunk seq
        gx_sc = next(it)                          # (Tc*Bt, 4Hp) hoisted input proj

        t_chunk = pl.program_id(1)

        @pl.when(t_chunk == 0)
        def _init():
            h_sc[...] = h0_ref[...]
            c_sc[...] = c0_ref[...]

        for l in range(L):
            wih_ref, whh_ref, b_ref = layer_refs[l]
            cdt = whh_ref.dtype      # MXU input dtype; gate math stays f32

            # Hoisted input projection for all Tc timesteps of this chunk:
            # one big MXU matmul instead of Tc small ones.
            x_all = x_ref[...] if l == 0 else seq_sc[...]
            gx_sc[...] = (
                jnp.dot(x_all, wih_ref[...], preferred_element_type=jnp.float32)
                + b_ref[...]
            ).astype(gx_sc.dtype)

            write_seq = l < L - 1    # last layer's chunk sequence is unused

            def step(s, carry, whh_ref=whh_ref, write_seq=write_seq, cdt=cdt):
                h, c = carry
                rows = pl.ds(pl.multiple_of(s * Bt, Bt), Bt)
                # W_hh read through the ref (loop-invariant in VMEM); no traced
                # hoist -> no vreg-file blowup around the unrolled steps.
                gates = gx_sc[rows, :] + jnp.dot(
                    h.astype(cdt), whh_ref[...],
                    preferred_element_type=jnp.float32)
                # Gate layout [ i | f | o | g ], each a 128-lane-aligned block
                # -> two contiguous activation passes.
                sig = jax.nn.sigmoid(gates[:, :3 * Hp])
                g = jnp.tanh(gates[:, 3 * Hp:])
                i = sig[:, 0 * Hp:1 * Hp]
                f = sig[:, 1 * Hp:2 * Hp]
                o = sig[:, 2 * Hp:3 * Hp]
                c_new = f * c + i * g
                h_new = o * jnp.tanh(c_new)
                if mask_tail:
                    # Padded timesteps (S..Sp) must not advance the state.
                    valid = (t_chunk * Tc + s) < S
                    h_new = jnp.where(valid, h_new, h)
                    c_new = jnp.where(valid, c_new, c)
                if write_seq:
                    seq_sc[rows, :] = h_new.astype(seq_sc.dtype)
                return h_new, c_new

            hT, cT = lax.fori_loop(0, Tc, step, (h_sc[l], c_sc[l]),
                                   unroll=min(Tc, 8))
            h_sc[l] = hT
            c_sc[l] = cT

        # TODO(synk): drive the MXU explicitly (pltpu.matmul_push_rhs once per
        #   layer + matmul_acc_lhs/matmul_pop per step) so W_hh stays resident
        #   in the MXU staging registers when the LHS is only a few sublane
        #   groups tall.

        @pl.when(t_chunk == pl.num_programs(1) - 1)
        def _finalize():
            hT_ref[...] = h_sc[...]
            cT_ref[...] = c_sc[...]
            # out[:, -1, :] of the top layer == its final hidden state.
            h_top = h_sc[L - 1].astype(wfc_ref.dtype)
            out_ref[...] = jax.nn.sigmoid(
                jnp.dot(h_top, wfc_ref[...], preferred_element_type=jnp.float32)
                + bfc_ref[...])

    return kernel


# ---------------------------------------------------------------------------
# Wrapper
# ---------------------------------------------------------------------------
# Tiling heuristics (the demo shapes collapse to a single tile):
#   * batch tile sized toward the MXU row count (256 on v6e/v7x),
#   * time chunk sized so the per-chunk gx scratch stays small enough for the
#     v7x 64 MiB VMEM budget at realistic IMDB shapes (S~512, H~256).
_BATCH_TILE_TARGET = 256
_SEQ_CHUNK_TARGET = 16


def lstm_model_forward(params, x_tokens, hidden, cell, num_layers,
                       compute_dtype=jnp.float32):
    """Full forward pass, matching the PyTorch module.

    x_tokens: (B, S) int32 token ids
    hidden, cell: (num_layers, B, H) float32
    compute_dtype: dtype of weights / matmul activations fed to the MXU
                   (f32 or bf16).  Gate math and accumulation stay f32.
    Returns (out (B, O), (hidden (L,B,H), cell (L,B,H)))
    """
    B, S = x_tokens.shape
    H = hidden.shape[-1]
    E = params["embed"].shape[-1]
    O = params["w_fc"].shape[-1]
    cdt = np.dtype(compute_dtype)

    Hp = _round_up(H, 128)            # full 128-lane vreg per gate block
    Op = _round_up(O, 128)            # lane-dense FC output (sliced below)

    # Batch tiling ("parallel" grid axis -> shards over v7x's 2 TensorCores).
    Bp = _round_up(max(B, 8), 8)      # full sublane group
    Bt = min(Bp, _BATCH_TILE_TARGET)
    Bp = _round_up(Bp, Bt)
    nb = Bp // Bt

    # Time chunking ("arbitrary" grid axis): bounds VMEM and lets BlockSpec
    # pipelining prefetch the next x chunk behind the serial recurrence.
    Tc = min(S, _SEQ_CHUNK_TARGET)
    Sp = _round_up(S, Tc)
    nt = Sp // Tc

    # Embedding gather is a data-dependent lookup -> plain-JAX glue.
    # TODO(synk): scalar-prefetch the token ids (PrefetchScalarGridSpec) and
    #   gather embedding rows inside the kernel per time chunk to remove this
    #   HBM round trip of the embedded sequence.
    emb = jnp.take(params["embed"], x_tokens, axis=0)            # (B, S, E)
    x = jnp.transpose(emb, (1, 0, 2))                            # (S, B, E)
    x = jnp.pad(x, ((0, Sp - S), (0, Bp - B), (0, 0)))           # (Sp, Bp, E)
    x = x.reshape(nt, Tc, nb, Bt, E)
    x = jnp.transpose(x, (2, 0, 1, 3, 4)).reshape(nb, nt, Tc * Bt, E)
    x = x.astype(cdt)

    h0 = jnp.pad(hidden, ((0, 0), (0, Bp - B), (0, Hp - H)))
    c0 = jnp.pad(cell, ((0, 0), (0, Bp - B), (0, Hp - H)))

    def pack_gates(w, pad_rows_to=None):
        # PyTorch gate order [i, f, g, o] -> [i, f, o, g]; each gate block is
        # zero-padded from H to Hp lanes (zero padding keeps the padded lanes
        # of h and c exactly 0 through the whole recurrence).
        i, f, g, o = jnp.split(w, 4, axis=-1)
        pad = [(0, 0)] * (w.ndim - 1) + [(0, Hp - H)]
        w2 = jnp.concatenate([jnp.pad(blk, pad) for blk in (i, f, o, g)],
                             axis=-1)
        if pad_rows_to is not None and w2.shape[0] < pad_rows_to:
            w2 = jnp.pad(w2, ((0, pad_rows_to - w2.shape[0]), (0, 0)))
        return w2

    args = [x, h0, c0]
    in_specs = [
        pl.BlockSpec((None, None, Tc * Bt, E), lambda b, t: (b, t, 0, 0)),
        pl.BlockSpec((num_layers, Bt, Hp), lambda b, t: (0, b, 0)),
        pl.BlockSpec((num_layers, Bt, Hp), lambda b, t: (0, b, 0)),
    ]
    for l in range(num_layers):
        in_dim = E if l == 0 else Hp
        args.append(pack_gates(params[f"w_ih_{l}"],
                               pad_rows_to=None if l == 0 else Hp).astype(cdt))
        args.append(pack_gates(params[f"w_hh_{l}"], pad_rows_to=Hp).astype(cdt))
        args.append(pack_gates(params[f"b_{l}"]))                 # bias stays f32
        in_specs += [
            pl.BlockSpec((in_dim, 4 * Hp), lambda b, t: (0, 0)),
            pl.BlockSpec((Hp, 4 * Hp), lambda b, t: (0, 0)),
            pl.BlockSpec((1, 4 * Hp), lambda b, t: (0, 0)),
        ]
    args.append(jnp.pad(params["w_fc"], ((0, Hp - H), (0, Op - O))).astype(cdt))
    args.append(jnp.pad(params["b_fc"], ((0, 0), (0, Op - O))))
    in_specs += [
        pl.BlockSpec((Hp, Op), lambda b, t: (0, 0)),
        pl.BlockSpec((1, Op), lambda b, t: (0, 0)),
    ]

    out_shape = (
        jax.ShapeDtypeStruct((Bp, Op), jnp.float32),
        jax.ShapeDtypeStruct((num_layers, Bp, Hp), jnp.float32),
        jax.ShapeDtypeStruct((num_layers, Bp, Hp), jnp.float32),
    )
    out_specs = (
        pl.BlockSpec((Bt, Op), lambda b, t: (b, 0)),
        pl.BlockSpec((num_layers, Bt, Hp), lambda b, t: (0, b, 0)),
        pl.BlockSpec((num_layers, Bt, Hp), lambda b, t: (0, b, 0)),
    )
    scratch_shapes = [
        pltpu.VMEM((num_layers, Bt, Hp), jnp.float32),   # h carried over chunks
        pltpu.VMEM((num_layers, Bt, Hp), jnp.float32),   # c carried over chunks
        pltpu.VMEM((Tc * Bt, Hp), cdt),                  # inter-layer chunk seq
        pltpu.VMEM((Tc * Bt, 4 * Hp), cdt),              # hoisted input proj
    ]

    # Scoped-VMEM budget: double-buffered pipelined blocks + resident weights +
    # scratch, with headroom.  The defaults (16/32 MiB) are too small at
    # realistic IMDB shapes, so set it explicitly (clamped under v7x physical).
    vmem_bytes = (
        2 * _nbytes((Tc * Bt, E), cdt)                                   # x chunk
        + 2 * 2 * _nbytes((num_layers, Bt, Hp), jnp.float32)             # h0, c0
        + 2 * sum(_nbytes(a.shape, a.dtype) for a in args[3:])           # weights
        + 2 * _nbytes((Bt, Op), jnp.float32)                             # out
        + 2 * 2 * _nbytes((num_layers, Bt, Hp), jnp.float32)             # hT, cT
        + 2 * _nbytes((num_layers, Bt, Hp), jnp.float32)                 # h/c scratch
        + _nbytes((Tc * Bt, Hp), cdt) + _nbytes((Tc * Bt, 4 * Hp), cdt)  # seq/gx
    )
    vmem_limit = int(min(max(vmem_bytes + (4 << 20), 32 << 20), 100 << 20))

    flops = 0
    for l in range(num_layers):
        in_dim = E if l == 0 else Hp
        flops += 2 * Sp * Bp * in_dim * 4 * Hp          # hoisted input projection
        flops += 2 * Sp * Bp * Hp * 4 * Hp              # recurrent matmuls
    flops += 2 * Bp * Hp * Op                           # final FC
    transcendentals = num_layers * Sp * Bp * 5 * Hp + Bp * Op
    bytes_accessed = (sum(_nbytes(a.shape, a.dtype) for a in args)
                      + sum(_nbytes(s.shape, s.dtype) for s in out_shape))
    cost = pl.CostEstimate(flops=int(flops),
                           transcendentals=int(transcendentals),
                           bytes_accessed=int(bytes_accessed))

    kernel = _make_fused_lstm_kernel(num_layers, S, Sp, Tc, Bt, Hp)
    out_p, hT_p, cT_p = pl.pallas_call(
        kernel,
        out_shape=out_shape,
        grid_spec=pltpu.PrefetchScalarGridSpec(
            num_scalar_prefetch=0,
            grid=(nb, nt),
            in_specs=in_specs,
            out_specs=out_specs,
            scratch_shapes=scratch_shapes,
        ),
        compiler_params=pltpu.CompilerParams(
            dimension_semantics=("parallel", "arbitrary"),
            vmem_limit_bytes=vmem_limit,
        ),
        cost_estimate=cost,
    )(*args)

    # self.dropout(out) in the PyTorch module discards its result -> no-op.
    out = out_p[:B, :O]
    hT = hT_p[:, :B, :H]
    cT = cT_p[:, :B, :H]
    return out, (hT, cT)


# ---------------------------------------------------------------------------
# Pure-JAX reference (for correctness check)
# ---------------------------------------------------------------------------
def lstm_model_reference(params, x_tokens, hidden, cell, num_layers):
    emb = jnp.take(params["embed"], x_tokens, axis=0)        # (B, S, E)
    layer_in = emb                                           # batch-first
    S = x_tokens.shape[1]
    h_finals, c_finals = [], []
    for l in range(num_layers):
        H = hidden.shape[-1]
        h = hidden[l]
        c = cell[l]
        outs = []
        for t in range(S):
            gates = (layer_in[:, t, :] @ params[f"w_ih_{l}"]
                     + h @ params[f"w_hh_{l}"] + params[f"b_{l}"][0])
            i = jax.nn.sigmoid(gates[:, 0 * H:1 * H])
            f = jax.nn.sigmoid(gates[:, 1 * H:2 * H])
            g = jnp.tanh(gates[:, 2 * H:3 * H])
            o = jax.nn.sigmoid(gates[:, 3 * H:4 * H])
            c = f * c + i * g
            h = o * jnp.tanh(c)
            outs.append(h)
        layer_in = jnp.stack(outs, axis=1)
        h_finals.append(h)
        c_finals.append(c)
    h_last = layer_in[:, -1, :]
    out = jax.nn.sigmoid(h_last @ params["w_fc"] + params["b_fc"][0])
    return out, (jnp.stack(h_finals), jnp.stack(c_finals))


# ---------------------------------------------------------------------------
# Main
# ---------------------------------------------------------------------------
if __name__ == "__main__":
    # Small shapes consistent with the module's forward.
    batch = 2
    seq_len = 8
    embed_dim = 16
    hidden_size = 32
    num_layers = 2
    n_vocab = 100
    output_size = 1

    key = jax.random.PRNGKey(0)
    keys = jax.random.split(key, 3 + 3 * num_layers)

    scale = 1.0 / np.sqrt(hidden_size)
    params = {}
    params["embed"] = jax.random.normal(keys[0], (n_vocab, embed_dim), jnp.float32)
    for l in range(num_layers):
        in_dim = embed_dim if l == 0 else hidden_size
        # Stored pre-transposed: (in_dim, 4H) / (H, 4H) in PyTorch gate order
        # [i, f, g, o]; bias = b_ih + b_hh combined, shape (1, 4H).
        params[f"w_ih_{l}"] = jax.random.uniform(
            keys[1 + 3 * l], (in_dim, 4 * hidden_size), jnp.float32, -scale, scale)
        params[f"w_hh_{l}"] = jax.random.uniform(
            keys[2 + 3 * l], (hidden_size, 4 * hidden_size), jnp.float32, -scale, scale)
        params[f"b_{l}"] = jax.random.uniform(
            keys[3 + 3 * l], (1, 4 * hidden_size), jnp.float32, -scale, scale)
    params["w_fc"] = jax.random.uniform(
        keys[-2], (hidden_size, output_size), jnp.float32, -scale, scale)
    params["b_fc"] = jax.random.uniform(
        keys[-1], (1, output_size), jnp.float32, -scale, scale)

    # Inputs: token ids, zero initial hidden/cell (as init_hidden() would produce).
    x_tokens = jax.random.randint(jax.random.PRNGKey(42), (batch, seq_len), 0, n_vocab)
    hidden0 = jnp.zeros((num_layers, batch, hidden_size), jnp.float32)
    cell0 = jnp.zeros((num_layers, batch, hidden_size), jnp.float32)

    out_ref, (h_ref, c_ref) = lstm_model_reference(
        params, x_tokens, hidden0, cell0, num_layers)

    # f32 MXU path — tight tolerance.
    fwd = jax.jit(functools.partial(lstm_model_forward, num_layers=num_layers))
    out, (h_fin, c_fin) = fwd(params, x_tokens, hidden0, cell0)
    jax.block_until_ready((out, h_fin, c_fin))
    np.testing.assert_allclose(np.asarray(out), np.asarray(out_ref), rtol=1e-5, atol=1e-5)
    np.testing.assert_allclose(np.asarray(h_fin), np.asarray(h_ref), rtol=1e-5, atol=1e-5)
    np.testing.assert_allclose(np.asarray(c_fin), np.asarray(c_ref), rtol=1e-5, atol=1e-5)

    # bf16 MXU path (weights / matmul activations bf16, gate math & accum f32)
    # — loose tolerance per the bf16 storage.
    fwd_bf16 = jax.jit(functools.partial(lstm_model_forward, num_layers=num_layers,
                                         compute_dtype=jnp.bfloat16))
    out_b, (h_b, c_b) = fwd_bf16(params, x_tokens, hidden0, cell0)
    jax.block_until_ready((out_b, h_b, c_b))
    np.testing.assert_allclose(np.asarray(out_b), np.asarray(out_ref), rtol=5e-2, atol=5e-2)
    np.testing.assert_allclose(np.asarray(h_b), np.asarray(h_ref), rtol=5e-2, atol=5e-2)
    np.testing.assert_allclose(np.asarray(c_b), np.asarray(c_ref), rtol=5e-2, atol=5e-2)

    print("KERNEL_OK")
</pallas_src>

<mosaic_0001>
module attributes {stable_mosaic.version = 11 : i64} {
  func.func @kernel(%arg0: i32, %arg1: i32, %arg2: memref<1x1x64x16xf32, #tpu.memory_space<vmem>>, %arg3: memref<2x8x128xf32, #tpu.memory_space<vmem>>, %arg4: memref<2x8x128xf32, #tpu.memory_space<vmem>>, %arg5: memref<16x512xf32, #tpu.memory_space<vmem>>, %arg6: memref<128x512xf32, #tpu.memory_space<vmem>>, %arg7: memref<1x512xf32, #tpu.memory_space<vmem>>, %arg8: memref<128x512xf32, #tpu.memory_space<vmem>>, %arg9: memref<128x512xf32, #tpu.memory_space<vmem>>, %arg10: memref<1x512xf32, #tpu.memory_space<vmem>>, %arg11: memref<128x128xf32, #tpu.memory_space<vmem>>, %arg12: memref<1x128xf32, #tpu.memory_space<vmem>>, %arg13: memref<8x128xf32, #tpu.memory_space<vmem>>, %arg14: memref<2x8x128xf32, #tpu.memory_space<vmem>>, %arg15: memref<2x8x128xf32, #tpu.memory_space<vmem>>, %arg16: memref<2x8x128xf32, #tpu.memory_space<vmem>>, %arg17: memref<2x8x128xf32, #tpu.memory_space<vmem>>, %arg18: memref<64x128xf32, #tpu.memory_space<vmem>>, %arg19: memref<64x512xf32, #tpu.memory_space<vmem>>) attributes {dimension_semantics = [#tpu.dimension_semantics<parallel>, #tpu.dimension_semantics<arbitrary>], iteration_bounds = array<i64: 1, 1>, scalar_prefetch = 0 : i64, scratch_operands = 4 : i64, tpu.core_type = #tpu.core_type<tc>, window_params = [{transform_indices = @transform_0, window_bounds = array<i64: 1, 1, 64, 16>}, {transform_indices = @transform_1, window_bounds = array<i64: 2, 8, 128>}, {transform_indices = @transform_2, window_bounds = array<i64: 2, 8, 128>}, {pipeline_mode = #tpu.pipeline_mode<synchronous>, transform_indices = @transform_3, window_bounds = array<i64: 16, 512>}, {pipeline_mode = #tpu.pipeline_mode<synchronous>, transform_indices = @transform_4, window_bounds = array<i64: 128, 512>}, {pipeline_mode = #tpu.pipeline_mode<synchronous>, transform_indices = @transform_5, window_bounds = array<i64: 1, 512>}, {pipeline_mode = #tpu.pipeline_mode<synchronous>, transform_indices = @transform_6, window_bounds = array<i64: 128, 512>}, {pipeline_mode = #tpu.pipeline_mode<synchronous>, transform_indices = @transform_7, window_bounds = array<i64: 128, 512>}, {pipeline_mode = #tpu.pipeline_mode<synchronous>, transform_indices = @transform_8, window_bounds = array<i64: 1, 512>}, {pipeline_mode = #tpu.pipeline_mode<synchronous>, transform_indices = @transform_9, window_bounds = array<i64: 128, 128>}, {pipeline_mode = #tpu.pipeline_mode<synchronous>, transform_indices = @transform_10, window_bounds = array<i64: 1, 128>}, {transform_indices = @transform_11, window_bounds = array<i64: 8, 128>}, {transform_indices = @transform_12, window_bounds = array<i64: 2, 8, 128>}, {transform_indices = @transform_13, window_bounds = array<i64: 2, 8, 128>}]} {
    %c0_i32 = arith.constant 0 : i32
    %0 = arith.cmpi eq, %arg1, %c0_i32 : i32
    %1 = arith.extui %0 : i1 to i32
    %c0_i32_0 = arith.constant 0 : i32
    %2 = arith.cmpi ne, %1, %c0_i32_0 : i32
    scf.if %2 {
      %c0_158 = arith.constant 0 : index
      %c0_159 = arith.constant 0 : index
      %c0_160 = arith.constant 0 : index
      %425 = vector.load %arg3[%c0_158, %c0_159, %c0_160] : memref<2x8x128xf32, #tpu.memory_space<vmem>>, vector<2x8x128xf32>
      %c0_161 = arith.constant 0 : index
      %c0_162 = arith.constant 0 : index
      %c0_163 = arith.constant 0 : index
      %426 = vector.load %arg16[%c0_161, %c0_162, %c0_163] : memref<2x8x128xf32, #tpu.memory_space<vmem>>, vector<2x8x128xf32>
      tpu.vector_store %arg16[%c0_161, %c0_162, %c0_163], %425 {strides = array<i32>} : memref<2x8x128xf32, #tpu.memory_space<vmem>>, vector<2x8x128xf32>,
      %c0_164 = arith.constant 0 : index
      %c0_165 = arith.constant 0 : index
      %c0_166 = arith.constant 0 : index
      %427 = vector.load %arg4[%c0_164, %c0_165, %c0_166] : memref<2x8x128xf32, #tpu.memory_space<vmem>>, vector<2x8x128xf32>
      %c0_167 = arith.constant 0 : index
      %c0_168 = arith.constant 0 : index
      %c0_169 = arith.constant 0 : index
      %428 = vector.load %arg17[%c0_167, %c0_168, %c0_169] : memref<2x8x128xf32, #tpu.memory_space<vmem>>, vector<2x8x128xf32>
      tpu.vector_store %arg17[%c0_167, %c0_168, %c0_169], %427 {strides = array<i32>} : memref<2x8x128xf32, #tpu.memory_space<vmem>>, vector<2x8x128xf32>,
    } else {
    }
    %c0 = arith.constant 0 : index
    %c0_1 = arith.constant 0 : index
    %c0_2 = arith.constant 0 : index
    %c0_3 = arith.constant 0 : index
    %3 = vector.load %arg2[%c0, %c0_1, %c0_2, %c0_3] : memref<1x1x64x16xf32, #tpu.memory_space<vmem>>, vector<1x1x64x16xf32>
    %4 = vector.shape_cast %3 : vector<1x1x64x16xf32> to vector<64x16xf32>
    %c0_4 = arith.constant 0 : index
    %c0_5 = arith.constant 0 : index
    %5 = vector.load %arg5[%c0_4, %c0_5] : memref<16x512xf32, #tpu.memory_space<vmem>>, vector<16x512xf32>
    %cst = arith.constant dense<0.000000e+00> : vector<64x512xf32>
    %6 = tpu.matmul %4, %5, %cst {dimension_numbers = #tpu.dot_dimension_numbers<[1], [0], [0], [1], [0, 0, 1, 1], [], []>} : vector<64x16xf32>, vector<16x512xf32>, vector<64x512xf32> -> vector<64x512xf32>
    %c0_6 = arith.constant 0 : index
    %c0_7 = arith.constant 0 : index
    %7 = vector.load %arg7[%c0_6, %c0_7] : memref<1x512xf32, #tpu.memory_space<vmem>>, vector<1x512xf32>
    %8 = vector.broadcast %7 : vector<1x512xf32> to vector<64x512xf32>
    %9 = arith.addf %6, %8 : vector<64x512xf32>
    %c0_8 = arith.constant 0 : index
    %c0_9 = arith.constant 0 : index
    %10 = vector.load %arg19[%c0_8, %c0_9] : memref<64x512xf32, #tpu.memory_space<vmem>>, vector<64x512xf32>
    tpu.vector_store %arg19[%c0_8, %c0_9], %9 {strides = array<i32>} : memref<64x512xf32, #tpu.memory_space<vmem>>, vector<64x512xf32>,
    %c0_10 = arith.constant 0 : index
    %c0_11 = arith.constant 0 : index
    %c0_12 = arith.constant 0 : index
    %11 = vector.load %arg16[%c0_10, %c0_11, %c0_12] : memref<2x8x128xf32, #tpu.memory_space<vmem>>, vector<1x8x128xf32>
    %12 = vector.shape_cast %11 : vector<1x8x128xf32> to vector<8x128xf32>
    %c0_13 = arith.constant 0 : index
    %c0_14 = arith.constant 0 : index
    %c0_15 = arith.constant 0 : index
    %13 = vector.load %arg17[%c0_13, %c0_14, %c0_15] : memref<2x8x128xf32, #tpu.memory_space<vmem>>, vector<1x8x128xf32>
    %14 = vector.shape_cast %13 : vector<1x8x128xf32> to vector<8x128xf32>
    %c0_i32_16 = arith.constant 0 : i32
    %c8_i32 = arith.constant 8 : i32
    %15 = arith.muli %c0_i32_16, %c8_i32 : i32
    %16 = tpu.assume_multiple %15, 8 : i32
    %17 = arith.index_cast %16 : i32 to index
    %c0_17 = arith.constant 0 : index
    %18 = vector.load %arg19[%17, %c0_17] : memref<64x512xf32, #tpu.memory_space<vmem>>, vector<8x512xf32>
    %c0_18 = arith.constant 0 : index
    %c0_19 = arith.constant 0 : index
    %19 = vector.load %arg6[%c0_18, %c0_19] : memref<128x512xf32, #tpu.memory_space<vmem>>, vector<128x512xf32>
    %cst_20 = arith.constant dense<0.000000e+00> : vector<8x512xf32>
    %20 = tpu.matmul %12, %19, %cst_20 {dimension_numbers = #tpu.dot_dimension_numbers<[1], [0], [0], [1], [0, 0, 1, 1], [], []>} : vector<8x128xf32>, vector<128x512xf32>, vector<8x512xf32> -> vector<8x512xf32>
    %21 = arith.addf %18, %20 : vector<8x512xf32>
    %22 = vector.extract_strided_slice %21 {offsets = [0, 0], sizes = [8, 384], strides = [1, 1]} : vector<8x512xf32> to vector<8x384xf32>
    %23 = arith.negf %22 : vector<8x384xf32>
    %24 = math.exp %23 : vector<8x384xf32>
    %cst_21 = arith.constant 1.000000e+00 : f32
    %25 = vector.broadcast %cst_21 : f32 to vector<8x384xf32>
    %26 = arith.addf %25, %24 : vector<8x384xf32>
    %27 = arith.divf %25, %26 : vector<8x384xf32>
    %28 = vector.extract_strided_slice %21 {offsets = [0, 384], sizes = [8, 128], strides = [1, 1]} : vector<8x512xf32> to vector<8x128xf32>
    %29 = math.tanh %28 : vector<8x128xf32>
    %30 = vector.extract_strided_slice %27 {offsets = [0, 0], sizes = [8, 128], strides = [1, 1]} : vector<8x384xf32> to vector<8x128xf32>
    %31 = vector.extract_strided_slice %27 {offsets = [0, 128], sizes = [8, 128], strides = [1, 1]} : vector<8x384xf32> to vector<8x128xf32>
    %32 = vector.extract_strided_slice %27 {offsets = [0, 256], sizes = [8, 128], strides = [1, 1]} : vector<8x384xf32> to vector<8x128xf32>
    %33 = arith.mulf %31, %14 : vector<8x128xf32>
    %34 = arith.mulf %30, %29 : vector<8x128xf32>
    %35 = arith.addf %33, %34 : vector<8x128xf32>
    %36 = math.tanh %35 : vector<8x128xf32>
    %37 = arith.mulf %32, %36 : vector<8x128xf32>
    %38 = arith.index_cast %16 : i32 to index
    %c0_22 = arith.constant 0 : index
    %39 = vector.load %arg18[%38, %c0_22] : memref<64x128xf32, #tpu.memory_space<vmem>>, vector<8x128xf32>
    tpu.vector_store %arg18[%38, %c0_22], %37 {strides = array<i32>} : memref<64x128xf32, #tpu.memory_space<vmem>>, vector<8x128xf32>,
    %c1_i32 = arith.constant 1 : i32
    %c8_i32_23 = arith.constant 8 : i32
    %40 = arith.muli %c1_i32, %c8_i32_23 : i32
    %41 = tpu.assume_multiple %40, 8 : i32
    %42 = arith.index_cast %41 : i32 to index
    %c0_24 = arith.constant 0 : index
    %43 = vector.load %arg19[%42, %c0_24] : memref<64x512xf32, #tpu.memory_space<vmem>>, vector<8x512xf32>
    %c0_25 = arith.constant 0 : index
    %c0_26 = arith.constant 0 : index
    %44 = vector.load %arg6[%c0_25, %c0_26] : memref<128x512xf32, #tpu.memory_space<vmem>>, vector<128x512xf32>
    %cst_27 = arith.constant dense<0.000000e+00> : vector<8x512xf32>
    %45 = tpu.matmul %37, %44, %cst_27 {dimension_numbers = #tpu.dot_dimension_numbers<[1], [0], [0], [1], [0, 0, 1, 1], [], []>} : vector<8x128xf32>, vector<128x512xf32>, vector<8x512xf32> -> vector<8x512xf32>
    %46 = arith.addf %43, %45 : vector<8x512xf32>
    %47 = vector.extract_strided_slice %46 {offsets = [0, 0], sizes = [8, 384], strides = [1, 1]} : vector<8x512xf32> to vector<8x384xf32>
    %48 = arith.negf %47 : vector<8x384xf32>
    %49 = math.exp %48 : vector<8x384xf32>
    %cst_28 = arith.constant 1.000000e+00 : f32
    %50 = vector.broadcast %cst_28 : f32 to vector<8x384xf32>
    %51 = arith.addf %50, %49 : vector<8x384xf32>
    %52 = arith.divf %50, %51 : vector<8x384xf32>
    %53 = vector.extract_strided_slice %46 {offsets = [0, 384], sizes = [8, 128], strides = [1, 1]} : vector<8x512xf32> to vector<8x128xf32>
    %54 = math.tanh %53 : vector<8x128xf32>
    %55 = vector.extract_strided_slice %52 {offsets = [0, 0], sizes = [8, 128], strides = [1, 1]} : vector<8x384xf32> to vector<8x128xf32>
    %56 = vector.extract_strided_slice %52 {offsets = [0, 128], sizes = [8, 128], strides = [1, 1]} : vector<8x384xf32> to vector<8x128xf32>
    %57 = vector.extract_strided_slice %52 {offsets = [0, 256], sizes = [8, 128], strides = [1, 1]} : vector<8x384xf32> to vector<8x128xf32>
    %58 = arith.mulf %56, %35 : vector<8x128xf32>
    %59 = arith.mulf %55, %54 : vector<8x128xf32>
    %60 = arith.addf %58, %59 : vector<8x128xf32>
    %61 = math.tanh %60 : vector<8x128xf32>
    %62 = arith.mulf %57, %61 : vector<8x128xf32>
    %63 = arith.index_cast %41 : i32 to index
    %c0_29 = arith.constant 0 : index
    %64 = vector.load %arg18[%63, %c0_29] : memref<64x128xf32, #tpu.memory_space<vmem>>, vector<8x128xf32>
    tpu.vector_store %arg18[%63, %c0_29], %62 {strides = array<i32>} : memref<64x128xf32, #tpu.memory_space<vmem>>, vector<8x128xf32>,
    %c2_i32 = arith.constant 2 : i32
    %c8_i32_30 = arith.constant 8 : i32
    %65 = arith.muli %c2_i32, %c8_i32_30 : i32
    %66 = tpu.assume_multiple %65, 8 : i32
    %67 = arith.index_cast %66 : i32 to index
    %c0_31 = arith.constant 0 : index
    %68 = vector.load %arg19[%67, %c0_31] : memref<64x512xf32, #tpu.memory_space<vmem>>, vector<8x512xf32>
    %c0_32 = arith.constant 0 : index
    %c0_33 = arith.constant 0 : index
    %69 = vector.load %arg6[%c0_32, %c0_33] : memref<128x512xf32, #tpu.memory_space<vmem>>, vector<128x512xf32>
    %cst_34 = arith.constant dense<0.000000e+00> : vector<8x512xf32>
    %70 = tpu.matmul %62, %69, %cst_34 {dimension_numbers = #tpu.dot_dimension_numbers<[1], [0], [0], [1], [0, 0, 1, 1], [], []>} : vector<8x128xf32>, vector<128x512xf32>, vector<8x512xf32> -> vector<8x512xf32>
    %71 = arith.addf %68, %70 : vector<8x512xf32>
    %72 = vector.extract_strided_slice %71 {offsets = [0, 0], sizes = [8, 384], strides = [1, 1]} : vector<8x512xf32> to vector<8x384xf32>
    %73 = arith.negf %72 : vector<8x384xf32>
    %74 = math.exp %73 : vector<8x384xf32>
    %cst_35 = arith.constant 1.000000e+00 : f32
    %75 = vector.broadcast %cst_35 : f32 to vector<8x384xf32>
    %76 = arith.addf %75, %74 : vector<8x384xf32>
    %77 = arith.divf %75, %76 : vector<8x384xf32>
    %78 = vector.extract_strided_slice %71 {offsets = [0, 384], sizes = [8, 128], strides = [1, 1]} : vector<8x512xf32> to vector<8x128xf32>
    %79 = math.tanh %78 : vector<8x128xf32>
    %80 = vector.extract_strided_slice %77 {offsets = [0, 0], sizes = [8, 128], strides = [1, 1]} : vector<8x384xf32> to vector<8x128xf32>
    %81 = vector.extract_strided_slice %77 {offsets = [0, 128], sizes = [8, 128], strides = [1, 1]} : vector<8x384xf32> to vector<8x128xf32>
    %82 = vector.extract_strided_slice %77 {offsets = [0, 256], sizes = [8, 128], strides = [1, 1]} : vector<8x384xf32> to vector<8x128xf32>
    %83 = arith.mulf %81, %60 : vector<8x128xf32>
    %84 = arith.mulf %80, %79 : vector<8x128xf32>
    %85 = arith.addf %83, %84 : vector<8x128xf32>
    %86 = math.tanh %85 : vector<8x128xf32>
    %87 = arith.mulf %82, %86 : vector<8x128xf32>
    %88 = arith.index_cast %66 : i32 to index
    %c0_36 = arith.constant 0 : index
    %89 = vector.load %arg18[%88, %c0_36] : memref<64x128xf32, #tpu.memory_space<vmem>>, vector<8x128xf32>
    tpu.vector_store %arg18[%88, %c0_36], %87 {strides = array<i32>} : memref<64x128xf32, #tpu.memory_space<vmem>>, vector<8x128xf32>,
    %c3_i32 = arith.constant 3 : i32
    %c8_i32_37 = arith.constant 8 : i32
    %90 = arith.muli %c3_i32, %c8_i32_37 : i32
    %91 = tpu.assume_multiple %90, 8 : i32
    %92 = arith.index_cast %91 : i32 to index
    %c0_38 = arith.constant 0 : index
    %93 = vector.load %arg19[%92, %c0_38] : memref<64x512xf32, #tpu.memory_space<vmem>>, vector<8x512xf32>
    %c0_39 = arith.constant 0 : index
    %c0_40 = arith.constant 0 : index
    %94 = vector.load %arg6[%c0_39, %c0_40] : memref<128x512xf32, #tpu.memory_space<vmem>>, vector<128x512xf32>
    %cst_41 = arith.constant dense<0.000000e+00> : vector<8x512xf32>
    %95 = tpu.matmul %87, %94, %cst_41 {dimension_numbers = #tpu.dot_dimension_numbers<[1], [0], [0], [1], [0, 0, 1, 1], [], []>} : vector<8x128xf32>, vector<128x512xf32>, vector<8x512xf32> -> vector<8x512xf32>
    %96 = arith.addf %93, %95 : vector<8x512xf32>
    %97 = vector.extract_strided_slice %96 {offsets = [0, 0], sizes = [8, 384], strides = [1, 1]} : vector<8x512xf32> to vector<8x384xf32>
    %98 = arith.negf %97 : vector<8x384xf32>
    %99 = math.exp %98 : vector<8x384xf32>
    %cst_42 = arith.constant 1.000000e+00 : f32
    %100 = vector.broadcast %cst_42 : f32 to vector<8x384xf32>
    %101 = arith.addf %100, %99 : vector<8x384xf32>
    %102 = arith.divf %100, %101 : vector<8x384xf32>
    %103 = vector.extract_strided_slice %96 {offsets = [0, 384], sizes = [8, 128], strides = [1, 1]} : vector<8x512xf32> to vector<8x128xf32>
    %104 = math.tanh %103 : vector<8x128xf32>
    %105 = vector.extract_strided_slice %102 {offsets = [0, 0], sizes = [8, 128], strides = [1, 1]} : vector<8x384xf32> to vector<8x128xf32>
    %106 = vector.extract_strided_slice %102 {offsets = [0, 128], sizes = [8, 128], strides = [1, 1]} : vector<8x384xf32> to vector<8x128xf32>
    %107 = vector.extract_strided_slice %102 {offsets = [0, 256], sizes = [8, 128], strides = [1, 1]} : vector<8x384xf32> to vector<8x128xf32>
    %108 = arith.mulf %106, %85 : vector<8x128xf32>
    %109 = arith.mulf %105, %104 : vector<8x128xf32>
    %110 = arith.addf %108, %109 : vector<8x128xf32>
    %111 = math.tanh %110 : vector<8x128xf32>
    %112 = arith.mulf %107, %111 : vector<8x128xf32>
    %113 = arith.index_cast %91 : i32 to index
    %c0_43 = arith.constant 0 : index
    %114 = vector.load %arg18[%113, %c0_43] : memref<64x128xf32, #tpu.memory_space<vmem>>, vector<8x128xf32>
    tpu.vector_store %arg18[%113, %c0_43], %112 {strides = array<i32>} : memref<64x128xf32, #tpu.memory_space<vmem>>, vector<8x128xf32>,
    %c4_i32 = arith.constant 4 : i32
    %c8_i32_44 = arith.constant 8 : i32
    %115 = arith.muli %c4_i32, %c8_i32_44 : i32
    %116 = tpu.assume_multiple %115, 8 : i32
    %117 = arith.index_cast %116 : i32 to index
    %c0_45 = arith.constant 0 : index
    %118 = vector.load %arg19[%117, %c0_45] : memref<64x512xf32, #tpu.memory_space<vmem>>, vector<8x512xf32>
    %c0_46 = arith.constant 0 : index
    %c0_47 = arith.constant 0 : index
    %119 = vector.load %arg6[%c0_46, %c0_47] : memref<128x512xf32, #tpu.memory_space<vmem>>, vector<128x512xf32>
    %cst_48 = arith.constant dense<0.000000e+00> : vector<8x512xf32>
    %120 = tpu.matmul %112, %119, %cst_48 {dimension_numbers = #tpu.dot_dimension_numbers<[1], [0], [0], [1], [0, 0, 1, 1], [], []>} : vector<8x128xf32>, vector<128x512xf32>, vector<8x512xf32> -> vector<8x512xf32>
    %121 = arith.addf %118, %120 : vector<8x512xf32>
    %122 = vector.extract_strided_slice %121 {offsets = [0, 0], sizes = [8, 384], strides = [1, 1]} : vector<8x512xf32> to vector<8x384xf32>
    %123 = arith.negf %122 : vector<8x384xf32>
    %124 = math.exp %123 : vector<8x384xf32>
    %cst_49 = arith.constant 1.000000e+00 : f32
    %125 = vector.broadcast %cst_49 : f32 to vector<8x384xf32>
    %126 = arith.addf %125, %124 : vector<8x384xf32>
    %127 = arith.divf %125, %126 : vector<8x384xf32>
    %128 = vector.extract_strided_slice %121 {offsets = [0, 384], sizes = [8, 128], strides = [1, 1]} : vector<8x512xf32> to vector<8x128xf32>
    %129 = math.tanh %128 : vector<8x128xf32>
    %130 = vector.extract_strided_slice %127 {offsets = [0, 0], sizes = [8, 128], strides = [1, 1]} : vector<8x384xf32> to vector<8x128xf32>
    %131 = vector.extract_strided_slice %127 {offsets = [0, 128], sizes = [8, 128], strides = [1, 1]} : vector<8x384xf32> to vector<8x128xf32>
    %132 = vector.extract_strided_slice %127 {offsets = [0, 256], sizes = [8, 128], strides = [1, 1]} : vector<8x384xf32> to vector<8x128xf32>
    %133 = arith.mulf %131, %110 : vector<8x128xf32>
    %134 = arith.mulf %130, %129 : vector<8x128xf32>
    %135 = arith.addf %133, %134 : vector<8x128xf32>
    %136 = math.tanh %135 : vector<8x128xf32>
    %137 = arith.mulf %132, %136 : vector<8x128xf32>
    %138 = arith.index_cast %116 : i32 to index
    %c0_50 = arith.constant 0 : index
    %139 = vector.load %arg18[%138, %c0_50] : memref<64x128xf32, #tpu.memory_space<vmem>>, vector<8x128xf32>
    tpu.vector_store %arg18[%138, %c0_50], %137 {strides = array<i32>} : memref<64x128xf32, #tpu.memory_space<vmem>>, vector<8x128xf32>,
    %c5_i32 = arith.constant 5 : i32
    %c8_i32_51 = arith.constant 8 : i32
    %140 = arith.muli %c5_i32, %c8_i32_51 : i32
    %141 = tpu.assume_multiple %140, 8 : i32
    %142 = arith.index_cast %141 : i32 to index
    %c0_52 = arith.constant 0 : index
    %143 = vector.load %arg19[%142, %c0_52] : memref<64x512xf32, #tpu.memory_space<vmem>>, vector<8x512xf32>
    %c0_53 = arith.constant 0 : index
    %c0_54 = arith.constant 0 : index
    %144 = vector.load %arg6[%c0_53, %c0_54] : memref<128x512xf32, #tpu.memory_space<vmem>>, vector<128x512xf32>
    %cst_55 = arith.constant dense<0.000000e+00> : vector<8x512xf32>
    %145 = tpu.matmul %137, %144, %cst_55 {dimension_numbers = #tpu.dot_dimension_numbers<[1], [0], [0], [1], [0, 0, 1, 1], [], []>} : vector<8x128xf32>, vector<128x512xf32>, vector<8x512xf32> -> vector<8x512xf32>
    %146 = arith.addf %143, %145 : vector<8x512xf32>
    %147 = vector.extract_strided_slice %146 {offsets = [0, 0], sizes = [8, 384], strides = [1, 1]} : vector<8x512xf32> to vector<8x384xf32>
    %148 = arith.negf %147 : vector<8x384xf32>
    %149 = math.exp %148 : vector<8x384xf32>
    %cst_56 = arith.constant 1.000000e+00 : f32
    %150 = vector.broadcast %cst_56 : f32 to vector<8x384xf32>
    %151 = arith.addf %150, %149 : vector<8x384xf32>
    %152 = arith.divf %150, %151 : vector<8x384xf32>
    %153 = vector.extract_strided_slice %146 {offsets = [0, 384], sizes = [8, 128], strides = [1, 1]} : vector<8x512xf32> to vector<8x128xf32>
    %154 = math.tanh %153 : vector<8x128xf32>
    %155 = vector.extract_strided_slice %152 {offsets = [0, 0], sizes = [8, 128], strides = [1, 1]} : vector<8x384xf32> to vector<8x128xf32>
    %156 = vector.extract_strided_slice %152 {offsets = [0, 128], sizes = [8, 128], strides = [1, 1]} : vector<8x384xf32> to vector<8x128xf32>
    %157 = vector.extract_strided_slice %152 {offsets = [0, 256], sizes = [8, 128], strides = [1, 1]} : vector<8x384xf32> to vector<8x128xf32>
    %158 = arith.mulf %156, %135 : vector<8x128xf32>
    %159 = arith.mulf %155, %154 : vector<8x128xf32>
    %160 = arith.addf %158, %159 : vector<8x128xf32>
    %161 = math.tanh %160 : vector<8x128xf32>
    %162 = arith.mulf %157, %161 : vector<8x128xf32>
    %163 = arith.index_cast %141 : i32 to index
    %c0_57 = arith.constant 0 : index
    %164 = vector.load %arg18[%163, %c0_57] : memref<64x128xf32, #tpu.memory_space<vmem>>, vector<8x128xf32>
    tpu.vector_store %arg18[%163, %c0_57], %162 {strides = array<i32>} : memref<64x128xf32, #tpu.memory_space<vmem>>, vector<8x128xf32>,
    %c6_i32 = arith.constant 6 : i32
    %c8_i32_58 = arith.constant 8 : i32
    %165 = arith.muli %c6_i32, %c8_i32_58 : i32
    %166 = tpu.assume_multiple %165, 8 : i32
    %167 = arith.index_cast %166 : i32 to index
    %c0_59 = arith.constant 0 : index
    %168 = vector.load %arg19[%167, %c0_59] : memref<64x512xf32, #tpu.memory_space<vmem>>, vector<8x512xf32>
    %c0_60 = arith.constant 0 : index
    %c0_61 = arith.constant 0 : index
    %169 = vector.load %arg6[%c0_60, %c0_61] : memref<128x512xf32, #tpu.memory_space<vmem>>, vector<128x512xf32>
    %cst_62 = arith.constant dense<0.000000e+00> : vector<8x512xf32>
    %170 = tpu.matmul %162, %169, %cst_62 {dimension_numbers = #tpu.dot_dimension_numbers<[1], [0], [0], [1], [0, 0, 1, 1], [], []>} : vector<8x128xf32>, vector<128x512xf32>, vector<8x512xf32> -> vector<8x512xf32>
    %171 = arith.addf %168, %170 : vector<8x512xf32>
    %172 = vector.extract_strided_slice %171 {offsets = [0, 0], sizes = [8, 384], strides = [1, 1]} : vector<8x512xf32> to vector<8x384xf32>
    %173 = arith.negf %172 : vector<8x384xf32>
    %174 = math.exp %173 : vector<8x384xf32>
    %cst_63 = arith.constant 1.000000e+00 : f32
    %175 = vector.broadcast %cst_63 : f32 to vector<8x384xf32>
    %176 = arith.addf %175, %174 : vector<8x384xf32>
    %177 = arith.divf %175, %176 : vector<8x384xf32>
    %178 = vector.extract_strided_slice %171 {offsets = [0, 384], sizes = [8, 128], strides = [1, 1]} : vector<8x512xf32> to vector<8x128xf32>
    %179 = math.tanh %178 : vector<8x128xf32>
    %180 = vector.extract_strided_slice %177 {offsets = [0, 0], sizes = [8, 128], strides = [1, 1]} : vector<8x384xf32> to vector<8x128xf32>
    %181 = vector.extract_strided_slice %177 {offsets = [0, 128], sizes = [8, 128], strides = [1, 1]} : vector<8x384xf32> to vector<8x128xf32>
    %182 = vector.extract_strided_slice %177 {offsets = [0, 256], sizes = [8, 128], strides = [1, 1]} : vector<8x384xf32> to vector<8x128xf32>
    %183 = arith.mulf %181, %160 : vector<8x128xf32>
    %184 = arith.mulf %180, %179 : vector<8x128xf32>
    %185 = arith.addf %183, %184 : vector<8x128xf32>
    %186 = math.tanh %185 : vector<8x128xf32>
    %187 = arith.mulf %182, %186 : vector<8x128xf32>
    %188 = arith.index_cast %166 : i32 to index
    %c0_64 = arith.constant 0 : index
    %189 = vector.load %arg18[%188, %c0_64] : memref<64x128xf32, #tpu.memory_space<vmem>>, vector<8x128xf32>
    tpu.vector_store %arg18[%188, %c0_64], %187 {strides = array<i32>} : memref<64x128xf32, #tpu.memory_space<vmem>>, vector<8x128xf32>,
    %c7_i32 = arith.constant 7 : i32
    %c8_i32_65 = arith.constant 8 : i32
    %190 = arith.muli %c7_i32, %c8_i32_65 : i32
    %191 = tpu.assume_multiple %190, 8 : i32
    %192 = arith.index_cast %191 : i32 to index
    %c0_66 = arith.constant 0 : index
    %193 = vector.load %arg19[%192, %c0_66] : memref<64x512xf32, #tpu.memory_space<vmem>>, vector<8x512xf32>
    %c0_67 = arith.constant 0 : index
    %c0_68 = arith.constant 0 : index
    %194 = vector.load %arg6[%c0_67, %c0_68] : memref<128x512xf32, #tpu.memory_space<vmem>>, vector<128x512xf32>
    %cst_69 = arith.constant dense<0.000000e+00> : vector<8x512xf32>
    %195 = tpu.matmul %187, %194, %cst_69 {dimension_numbers = #tpu.dot_dimension_numbers<[1], [0], [0], [1], [0, 0, 1, 1], [], []>} : vector<8x128xf32>, vector<128x512xf32>, vector<8x512xf32> -> vector<8x512xf32>
    %196 = arith.addf %193, %195 : vector<8x512xf32>
    %197 = vector.extract_strided_slice %196 {offsets = [0, 0], sizes = [8, 384], strides = [1, 1]} : vector<8x512xf32> to vector<8x384xf32>
    %198 = arith.negf %197 : vector<8x384xf32>
    %199 = math.exp %198 : vector<8x384xf32>
    %cst_70 = arith.constant 1.000000e+00 : f32
    %200 = vector.broadcast %cst_70 : f32 to vector<8x384xf32>
    %201 = arith.addf %200, %199 : vector<8x384xf32>
    %202 = arith.divf %200, %201 : vector<8x384xf32>
    %203 = vector.extract_strided_slice %196 {offsets = [0, 384], sizes = [8, 128], strides = [1, 1]} : vector<8x512xf32> to vector<8x128xf32>
    %204 = math.tanh %203 : vector<8x128xf32>
    %205 = vector.extract_strided_slice %202 {offsets = [0, 0], sizes = [8, 128], strides = [1, 1]} : vector<8x384xf32> to vector<8x128xf32>
    %206 = vector.extract_strided_slice %202 {offsets = [0, 128], sizes = [8, 128], strides = [1, 1]} : vector<8x384xf32> to vector<8x128xf32>
    %207 = vector.extract_strided_slice %202 {offsets = [0, 256], sizes = [8, 128], strides = [1, 1]} : vector<8x384xf32> to vector<8x128xf32>
    %208 = arith.mulf %206, %185 : vector<8x128xf32>
    %209 = arith.mulf %205, %204 : vector<8x128xf32>
    %210 = arith.addf %208, %209 : vector<8x128xf32>
    %211 = math.tanh %210 : vector<8x128xf32>
    %212 = arith.mulf %207, %211 : vector<8x128xf32>
    %213 = arith.index_cast %191 : i32 to index
    %c0_71 = arith.constant 0 : index
    %214 = vector.load %arg18[%213, %c0_71] : memref<64x128xf32, #tpu.memory_space<vmem>>, vector<8x128xf32>
    tpu.vector_store %arg18[%213, %c0_71], %212 {strides = array<i32>} : memref<64x128xf32, #tpu.memory_space<vmem>>, vector<8x128xf32>,
    %c8_i32_72 = arith.constant 8 : i32
    %c0_73 = arith.constant 0 : index
    %c0_74 = arith.constant 0 : index
    %c0_75 = arith.constant 0 : index
    %215 = vector.load %arg16[%c0_73, %c0_74, %c0_75] : memref<2x8x128xf32, #tpu.memory_space<vmem>>, vector<1x8x128xf32>
    %216 = vector.shape_cast %215 : vector<1x8x128xf32> to vector<8x128xf32>
    %217 = vector.shape_cast %212 : vector<8x128xf32> to vector<1x8x128xf32>
    tpu.vector_store %arg16[%c0_73, %c0_74, %c0_75], %217 {strides = array<i32>} : memref<2x8x128xf32, #tpu.memory_space<vmem>>, vector<1x8x128xf32>,
    %c0_76 = arith.constant 0 : index
    %c0_77 = arith.constant 0 : index
    %c0_78 = arith.constant 0 : index
    %218 = vector.load %arg17[%c0_76, %c0_77, %c0_78] : memref<2x8x128xf32, #tpu.memory_space<vmem>>, vector<1x8x128xf32>
    %219 = vector.shape_cast %218 : vector<1x8x128xf32> to vector<8x128xf32>
    %220 = vector.shape_cast %210 : vector<8x128xf32> to vector<1x8x128xf32>
    tpu.vector_store %arg17[%c0_76, %c0_77, %c0_78], %220 {strides = array<i32>} : memref<2x8x128xf32, #tpu.memory_space<vmem>>, vector<1x8x128xf32>,
    %c0_79 = arith.constant 0 : index
    %c0_80 = arith.constant 0 : index
    %221 = vector.load %arg18[%c0_79, %c0_80] : memref<64x128xf32, #tpu.memory_space<vmem>>, vector<64x128xf32>
    %c0_81 = arith.constant 0 : index
    %c0_82 = arith.constant 0 : index
    %222 = vector.load %arg8[%c0_81, %c0_82] : memref<128x512xf32, #tpu.memory_space<vmem>>, vector<128x512xf32>
    %cst_83 = arith.constant dense<0.000000e+00> : vector<64x512xf32>
    %223 = tpu.matmul %221, %222, %cst_83 {dimension_numbers = #tpu.dot_dimension_numbers<[1], [0], [0], [1], [0, 0, 1, 1], [], []>} : vector<64x128xf32>, vector<128x512xf32>, vector<64x512xf32> -> vector<64x512xf32>
    %c0_84 = arith.constant 0 : index
    %c0_85 = arith.constant 0 : index
    %224 = vector.load %arg10[%c0_84, %c0_85] : memref<1x512xf32, #tpu.memory_space<vmem>>, vector<1x512xf32>
    %225 = vector.broadcast %224 : vector<1x512xf32> to vector<64x512xf32>
    %226 = arith.addf %223, %225 : vector<64x512xf32>
    %c0_86 = arith.constant 0 : index
    %c0_87 = arith.constant 0 : index
    %227 = vector.load %arg19[%c0_86, %c0_87] : memref<64x512xf32, #tpu.memory_space<vmem>>, vector<64x512xf32>
    tpu.vector_store %arg19[%c0_86, %c0_87], %226 {strides = array<i32>} : memref<64x512xf32, #tpu.memory_space<vmem>>, vector<64x512xf32>,
    %c1 = arith.constant 1 : index
    %c0_88 = arith.constant 0 : index
    %c0_89 = arith.constant 0 : index
    %228 = vector.load %arg16[%c1, %c0_88, %c0_89] : memref<2x8x128xf32, #tpu.memory_space<vmem>>, vector<1x8x128xf32>
    %229 = vector.shape_cast %228 : vector<1x8x128xf32> to vector<8x128xf32>
    %c1_90 = arith.constant 1 : index
    %c0_91 = arith.constant 0 : index
    %c0_92 = arith.constant 0 : index
    %230 = vector.load %arg17[%c1_90, %c0_91, %c0_92] : memref<2x8x128xf32, #tpu.memory_space<vmem>>, vector<1x8x128xf32>
    %231 = vector.shape_cast %230 : vector<1x8x128xf32> to vector<8x128xf32>
    %c0_i32_93 = arith.constant 0 : i32
    %c8_i32_94 = arith.constant 8 : i32
    %232 = arith.muli %c0_i32_93, %c8_i32_94 : i32
    %233 = tpu.assume_multiple %232, 8 : i32
    %234 = arith.index_cast %233 : i32 to index
    %c0_95 = arith.constant 0 : index
    %235 = vector.load %arg19[%234, %c0_95] : memref<64x512xf32, #tpu.memory_space<vmem>>, vector<8x512xf32>
    %c0_96 = arith.constant 0 : index
    %c0_97 = arith.constant 0 : index
    %236 = vector.load %arg9[%c0_96, %c0_97] : memref<128x512xf32, #tpu.memory_space<vmem>>, vector<128x512xf32>
    %cst_98 = arith.constant dense<0.000000e+00> : vector<8x512xf32>
    %237 = tpu.matmul %229, %236, %cst_98 {dimension_numbers = #tpu.dot_dimension_numbers<[1], [0], [0], [1], [0, 0, 1, 1], [], []>} : vector<8x128xf32>, vector<128x512xf32>, vector<8x512xf32> -> vector<8x512xf32>
    %238 = arith.addf %235, %237 : vector<8x512xf32>
    %239 = vector.extract_strided_slice %238 {offsets = [0, 0], sizes = [8, 384], strides = [1, 1]} : vector<8x512xf32> to vector<8x384xf32>
    %240 = arith.negf %239 : vector<8x384xf32>
    %241 = math.exp %240 : vector<8x384xf32>
    %cst_99 = arith.constant 1.000000e+00 : f32
    %242 = vector.broadcast %cst_99 : f32 to vector<8x384xf32>
    %243 = arith.addf %242, %241 : vector<8x384xf32>
    %244 = arith.divf %242, %243 : vector<8x384xf32>
    %245 = vector.extract_strided_slice %238 {offsets = [0, 384], sizes = [8, 128], strides = [1, 1]} : vector<8x512xf32> to vector<8x128xf32>
    %246 = math.tanh %245 : vector<8x128xf32>
    %247 = vector.extract_strided_slice %244 {offsets = [0, 0], sizes = [8, 128], strides = [1, 1]} : vector<8x384xf32> to vector<8x128xf32>
    %248 = vector.extract_strided_slice %244 {offsets = [0, 128], sizes = [8, 128], strides = [1, 1]} : vector<8x384xf32> to vector<8x128xf32>
    %249 = vector.extract_strided_slice %244 {offsets = [0, 256], sizes = [8, 128], strides = [1, 1]} : vector<8x384xf32> to vector<8x128xf32>
    %250 = arith.mulf %248, %231 : vector<8x128xf32>
    %251 = arith.mulf %247, %246 : vector<8x128xf32>
    %252 = arith.addf %250, %251 : vector<8x128xf32>
    %253 = math.tanh %252 : vector<8x128xf32>
    %254 = arith.mulf %249, %253 : vector<8x128xf32>
    %c1_i32_100 = arith.constant 1 : i32
    %c8_i32_101 = arith.constant 8 : i32
    %255 = arith.muli %c1_i32_100, %c8_i32_101 : i32
    %256 = tpu.assume_multiple %255, 8 : i32
    %257 = arith.index_cast %256 : i32 to index
    %c0_102 = arith.constant 0 : index
    %258 = vector.load %arg19[%257, %c0_102] : memref<64x512xf32, #tpu.memory_space<vmem>>, vector<8x512xf32>
    %c0_103 = arith.constant 0 : index
    %c0_104 = arith.constant 0 : index
    %259 = vector.load %arg9[%c0_103, %c0_104] : memref<128x512xf32, #tpu.memory_space<vmem>>, vector<128x512xf32>
    %cst_105 = arith.constant dense<0.000000e+00> : vector<8x512xf32>
    %260 = tpu.matmul %254, %259, %cst_105 {dimension_numbers = #tpu.dot_dimension_numbers<[1], [0], [0], [1], [0, 0, 1, 1], [], []>} : vector<8x128xf32>, vector<128x512xf32>, vector<8x512xf32> -> vector<8x512xf32>
    %261 = arith.addf %258, %260 : vector<8x512xf32>
    %262 = vector.extract_strided_slice %261 {offsets = [0, 0], sizes = [8, 384], strides = [1, 1]} : vector<8x512xf32> to vector<8x384xf32>
    %263 = arith.negf %262 : vector<8x384xf32>
    %264 = math.exp %263 : vector<8x384xf32>
    %cst_106 = arith.constant 1.000000e+00 : f32
    %265 = vector.broadcast %cst_106 : f32 to vector<8x384xf32>
    %266 = arith.addf %265, %264 : vector<8x384xf32>
    %267 = arith.divf %265, %266 : vector<8x384xf32>
    %268 = vector.extract_strided_slice %261 {offsets = [0, 384], sizes = [8, 128], strides = [1, 1]} : vector<8x512xf32> to vector<8x128xf32>
    %269 = math.tanh %268 : vector<8x128xf32>
    %270 = vector.extract_strided_slice %267 {offsets = [0, 0], sizes = [8, 128], strides = [1, 1]} : vector<8x384xf32> to vector<8x128xf32>
    %271 = vector.extract_strided_slice %267 {offsets = [0, 128], sizes = [8, 128], strides = [1, 1]} : vector<8x384xf32> to vector<8x128xf32>
    %272 = vector.extract_strided_slice %267 {offsets = [0, 256], sizes = [8, 128], strides = [1, 1]} : vector<8x384xf32> to vector<8x128xf32>
    %273 = arith.mulf %271, %252 : vector<8x128xf32>
    %274 = arith.mulf %270, %269 : vector<8x128xf32>
    %275 = arith.addf %273, %274 : vector<8x128xf32>
    %276 = math.tanh %275 : vector<8x128xf32>
    %277 = arith.mulf %272, %276 : vector<8x128xf32>
    %c2_i32_107 = arith.constant 2 : i32
    %c8_i32_108 = arith.constant 8 : i32
    %278 = arith.muli %c2_i32_107, %c8_i32_108 : i32
    %279 = tpu.assume_multiple %278, 8 : i32
    %280 = arith.index_cast %279 : i32 to index
    %c0_109 = arith.constant 0 : index
    %281 = vector.load %arg19[%280, %c0_109] : memref<64x512xf32, #tpu.memory_space<vmem>>, vector<8x512xf32>
    %c0_110 = arith.constant 0 : index
    %c0_111 = arith.constant 0 : index
    %282 = vector.load %arg9[%c0_110, %c0_111] : memref<128x512xf32, #tpu.memory_space<vmem>>, vector<128x512xf32>
    %cst_112 = arith.constant dense<0.000000e+00> : vector<8x512xf32>
    %283 = tpu.matmul %277, %282, %cst_112 {dimension_numbers = #tpu.dot_dimension_numbers<[1], [0], [0], [1], [0, 0, 1, 1], [], []>} : vector<8x128xf32>, vector<128x512xf32>, vector<8x512xf32> -> vector<8x512xf32>
    %284 = arith.addf %281, %283 : vector<8x512xf32>
    %285 = vector.extract_strided_slice %284 {offsets = [0, 0], sizes = [8, 384], strides = [1, 1]} : vector<8x512xf32> to vector<8x384xf32>
    %286 = arith.negf %285 : vector<8x384xf32>
    %287 = math.exp %286 : vector<8x384xf32>
    %cst_113 = arith.constant 1.000000e+00 : f32
    %288 = vector.broadcast %cst_113 : f32 to vector<8x384xf32>
    %289 = arith.addf %288, %287 : vector<8x384xf32>
    %290 = arith.divf %288, %289 : vector<8x384xf32>
    %291 = vector.extract_strided_slice %284 {offsets = [0, 384], sizes = [8, 128], strides = [1, 1]} : vector<8x512xf32> to vector<8x128xf32>
    %292 = math.tanh %291 : vector<8x128xf32>
    %293 = vector.extract_strided_slice %290 {offsets = [0, 0], sizes = [8, 128], strides = [1, 1]} : vector<8x384xf32> to vector<8x128xf32>
    %294 = vector.extract_strided_slice %290 {offsets = [0, 128], sizes = [8, 128], strides = [1, 1]} : vector<8x384xf32> to vector<8x128xf32>
    %295 = vector.extract_strided_slice %290 {offsets = [0, 256], sizes = [8, 128], strides = [1, 1]} : vector<8x384xf32> to vector<8x128xf32>
    %296 = arith.mulf %294, %275 : vector<8x128xf32>
    %297 = arith.mulf %293, %292 : vector<8x128xf32>
    %298 = arith.addf %296, %297 : vector<8x128xf32>
    %299 = math.tanh %298 : vector<8x128xf32>
    %300 = arith.mulf %295, %299 : vector<8x128xf32>
    %c3_i32_114 = arith.constant 3 : i32
    %c8_i32_115 = arith.constant 8 : i32
    %301 = arith.muli %c3_i32_114, %c8_i32_115 : i32
    %302 = tpu.assume_multiple %301, 8 : i32
    %303 = arith.index_cast %302 : i32 to index
    %c0_116 = arith.constant 0 : index
    %304 = vector.load %arg19[%303, %c0_116] : memref<64x512xf32, #tpu.memory_space<vmem>>, vector<8x512xf32>
    %c0_117 = arith.constant 0 : index
    %c0_118 = arith.constant 0 : index
    %305 = vector.load %arg9[%c0_117, %c0_118] : memref<128x512xf32, #tpu.memory_space<vmem>>, vector<128x512xf32>
    %cst_119 = arith.constant dense<0.000000e+00> : vector<8x512xf32>
    %306 = tpu.matmul %300, %305, %cst_119 {dimension_numbers = #tpu.dot_dimension_numbers<[1], [0], [0], [1], [0, 0, 1, 1], [], []>} : vector<8x128xf32>, vector<128x512xf32>, vector<8x512xf32> -> vector<8x512xf32>
    %307 = arith.addf %304, %306 : vector<8x512xf32>
    %308 = vector.extract_strided_slice %307 {offsets = [0, 0], sizes = [8, 384], strides = [1, 1]} : vector<8x512xf32> to vector<8x384xf32>
    %309 = arith.negf %308 : vector<8x384xf32>
    %310 = math.exp %309 : vector<8x384xf32>
    %cst_120 = arith.constant 1.000000e+00 : f32
    %311 = vector.broadcast %cst_120 : f32 to vector<8x384xf32>
    %312 = arith.addf %311, %310 : vector<8x384xf32>
    %313 = arith.divf %311, %312 : vector<8x384xf32>
    %314 = vector.extract_strided_slice %307 {offsets = [0, 384], sizes = [8, 128], strides = [1, 1]} : vector<8x512xf32> to vector<8x128xf32>
    %315 = math.tanh %314 : vector<8x128xf32>
    %316 = vector.extract_strided_slice %313 {offsets = [0, 0], sizes = [8, 128], strides = [1, 1]} : vector<8x384xf32> to vector<8x128xf32>
    %317 = vector.extract_strided_slice %313 {offsets = [0, 128], sizes = [8, 128], strides = [1, 1]} : vector<8x384xf32> to vector<8x128xf32>
    %318 = vector.extract_strided_slice %313 {offsets = [0, 256], sizes = [8, 128], strides = [1, 1]} : vector<8x384xf32> to vector<8x128xf32>
    %319 = arith.mulf %317, %298 : vector<8x128xf32>
    %320 = arith.mulf %316, %315 : vector<8x128xf32>
    %321 = arith.addf %319, %320 : vector<8x128xf32>
    %322 = math.tanh %321 : vector<8x128xf32>
    %323 = arith.mulf %318, %322 : vector<8x128xf32>
    %c4_i32_121 = arith.constant 4 : i32
    %c8_i32_122 = arith.constant 8 : i32
    %324 = arith.muli %c4_i32_121, %c8_i32_122 : i32
    %325 = tpu.assume_multiple %324, 8 : i32
    %326 = arith.index_cast %325 : i32 to index
    %c0_123 = arith.constant 0 : index
    %327 = vector.load %arg19[%326, %c0_123] : memref<64x512xf32, #tpu.memory_space<vmem>>, vector<8x512xf32>
    %c0_124 = arith.constant 0 : index
    %c0_125 = arith.constant 0 : index
    %328 = vector.load %arg9[%c0_124, %c0_125] : memref<128x512xf32, #tpu.memory_space<vmem>>, vector<128x512xf32>
    %cst_126 = arith.constant dense<0.000000e+00> : vector<8x512xf32>
    %329 = tpu.matmul %323, %328, %cst_126 {dimension_numbers = #tpu.dot_dimension_numbers<[1], [0], [0], [1], [0, 0, 1, 1], [], []>} : vector<8x128xf32>, vector<128x512xf32>, vector<8x512xf32> -> vector<8x512xf32>
    %330 = arith.addf %327, %329 : vector<8x512xf32>
    %331 = vector.extract_strided_slice %330 {offsets = [0, 0], sizes = [8, 384], strides = [1, 1]} : vector<8x512xf32> to vector<8x384xf32>
    %332 = arith.negf %331 : vector<8x384xf32>
    %333 = math.exp %332 : vector<8x384xf32>
    %cst_127 = arith.constant 1.000000e+00 : f32
    %334 = vector.broadcast %cst_127 : f32 to vector<8x384xf32>
    %335 = arith.addf %334, %333 : vector<8x384xf32>
    %336 = arith.divf %334, %335 : vector<8x384xf32>
    %337 = vector.extract_strided_slice %330 {offsets = [0, 384], sizes = [8, 128], strides = [1, 1]} : vector<8x512xf32> to vector<8x128xf32>
    %338 = math.tanh %337 : vector<8x128xf32>
    %339 = vector.extract_strided_slice %336 {offsets = [0, 0], sizes = [8, 128], strides = [1, 1]} : vector<8x384xf32> to vector<8x128xf32>
    %340 = vector.extract_strided_slice %336 {offsets = [0, 128], sizes = [8, 128], strides = [1, 1]} : vector<8x384xf32> to vector<8x128xf32>
    %341 = vector.extract_strided_slice %336 {offsets = [0, 256], sizes = [8, 128], strides = [1, 1]} : vector<8x384xf32> to vector<8x128xf32>
    %342 = arith.mulf %340, %321 : vector<8x128xf32>
    %343 = arith.mulf %339, %338 : vector<8x128xf32>
    %344 = arith.addf %342, %343 : vector<8x128xf32>
    %345 = math.tanh %344 : vector<8x128xf32>
    %346 = arith.mulf %341, %345 : vector<8x128xf32>
    %c5_i32_128 = arith.constant 5 : i32
    %c8_i32_129 = arith.constant 8 : i32
    %347 = arith.muli %c5_i32_128, %c8_i32_129 : i32
    %348 = tpu.assume_multiple %347, 8 : i32
    %349 = arith.index_cast %348 : i32 to index
    %c0_130 = arith.constant 0 : index
    %350 = vector.load %arg19[%349, %c0_130] : memref<64x512xf32, #tpu.memory_space<vmem>>, vector<8x512xf32>
    %c0_131 = arith.constant 0 : index
    %c0_132 = arith.constant 0 : index
    %351 = vector.load %arg9[%c0_131, %c0_132] : memref<128x512xf32, #tpu.memory_space<vmem>>, vector<128x512xf32>
    %cst_133 = arith.constant dense<0.000000e+00> : vector<8x512xf32>
    %352 = tpu.matmul %346, %351, %cst_133 {dimension_numbers = #tpu.dot_dimension_numbers<[1], [0], [0], [1], [0, 0, 1, 1], [], []>} : vector<8x128xf32>, vector<128x512xf32>, vector<8x512xf32> -> vector<8x512xf32>
    %353 = arith.addf %350, %352 : vector<8x512xf32>
    %354 = vector.extract_strided_slice %353 {offsets = [0, 0], sizes = [8, 384], strides = [1, 1]} : vector<8x512xf32> to vector<8x384xf32>
    %355 = arith.negf %354 : vector<8x384xf32>
    %356 = math.exp %355 : vector<8x384xf32>
    %cst_134 = arith.constant 1.000000e+00 : f32
    %357 = vector.broadcast %cst_134 : f32 to vector<8x384xf32>
    %358 = arith.addf %357, %356 : vector<8x384xf32>
    %359 = arith.divf %357, %358 : vector<8x384xf32>
    %360 = vector.extract_strided_slice %353 {offsets = [0, 384], sizes = [8, 128], strides = [1, 1]} : vector<8x512xf32> to vector<8x128xf32>
    %361 = math.tanh %360 : vector<8x128xf32>
    %362 = vector.extract_strided_slice %359 {offsets = [0, 0], sizes = [8, 128], strides = [1, 1]} : vector<8x384xf32> to vector<8x128xf32>
    %363 = vector.extract_strided_slice %359 {offsets = [0, 128], sizes = [8, 128], strides = [1, 1]} : vector<8x384xf32> to vector<8x128xf32>
    %364 = vector.extract_strided_slice %359 {offsets = [0, 256], sizes = [8, 128], strides = [1, 1]} : vector<8x384xf32> to vector<8x128xf32>
    %365 = arith.mulf %363, %344 : vector<8x128xf32>
    %366 = arith.mulf %362, %361 : vector<8x128xf32>
    %367 = arith.addf %365, %366 : vector<8x128xf32>
    %368 = math.tanh %367 : vector<8x128xf32>
    %369 = arith.mulf %364, %368 : vector<8x128xf32>
    %c6_i32_135 = arith.constant 6 : i32
    %c8_i32_136 = arith.constant 8 : i32
    %370 = arith.muli %c6_i32_135, %c8_i32_136 : i32
    %371 = tpu.assume_multiple %370, 8 : i32
    %372 = arith.index_cast %371 : i32 to index
    %c0_137 = arith.constant 0 : index
    %373 = vector.load %arg19[%372, %c0_137] : memref<64x512xf32, #tpu.memory_space<vmem>>, vector<8x512xf32>
    %c0_138 = arith.constant 0 : index
    %c0_139 = arith.constant 0 : index
    %374 = vector.load %arg9[%c0_138, %c0_139] : memref<128x512xf32, #tpu.memory_space<vmem>>, vector<128x512xf32>
    %cst_140 = arith.constant dense<0.000000e+00> : vector<8x512xf32>
    %375 = tpu.matmul %369, %374, %cst_140 {dimension_numbers = #tpu.dot_dimension_numbers<[1], [0], [0], [1], [0, 0, 1, 1], [], []>} : vector<8x128xf32>, vector<128x512xf32>, vector<8x512xf32> -> vector<8x512xf32>
    %376 = arith.addf %373, %375 : vector<8x512xf32>
    %377 = vector.extract_strided_slice %376 {offsets = [0, 0], sizes = [8, 384], strides = [1, 1]} : vector<8x512xf32> to vector<8x384xf32>
    %378 = arith.negf %377 : vector<8x384xf32>
    %379 = math.exp %378 : vector<8x384xf32>
    %cst_141 = arith.constant 1.000000e+00 : f32
    %380 = vector.broadcast %cst_141 : f32 to vector<8x384xf32>
    %381 = arith.addf %380, %379 : vector<8x384xf32>
    %382 = arith.divf %380, %381 : vector<8x384xf32>
    %383 = vector.extract_strided_slice %376 {offsets = [0, 384], sizes = [8, 128], strides = [1, 1]} : vector<8x512xf32> to vector<8x128xf32>
    %384 = math.tanh %383 : vector<8x128xf32>
    %385 = vector.extract_strided_slice %382 {offsets = [0, 0], sizes = [8, 128], strides = [1, 1]} : vector<8x384xf32> to vector<8x128xf32>
    %386 = vector.extract_strided_slice %382 {offsets = [0, 128], sizes = [8, 128], strides = [1, 1]} : vector<8x384xf32> to vector<8x128xf32>
    %387 = vector.extract_strided_slice %382 {offsets = [0, 256], sizes = [8, 128], strides = [1, 1]} : vector<8x384xf32> to vector<8x128xf32>
    %388 = arith.mulf %386, %367 : vector<8x128xf32>
    %389 = arith.mulf %385, %384 : vector<8x128xf32>
    %390 = arith.addf %388, %389 : vector<8x128xf32>
    %391 = math.tanh %390 : vector<8x128xf32>
    %392 = arith.mulf %387, %391 : vector<8x128xf32>
    %c7_i32_142 = arith.constant 7 : i32
    %c8_i32_143 = arith.constant 8 : i32
    %393 = arith.muli %c7_i32_142, %c8_i32_143 : i32
    %394 = tpu.assume_multiple %393, 8 : i32
    %395 = arith.index_cast %394 : i32 to index
    %c0_144 = arith.constant 0 : index
    %396 = vector.load %arg19[%395, %c0_144] : memref<64x512xf32, #tpu.memory_space<vmem>>, vector<8x512xf32>
    %c0_145 = arith.constant 0 : index
    %c0_146 = arith.constant 0 : index
    %397 = vector.load %arg9[%c0_145, %c0_146] : memref<128x512xf32, #tpu.memory_space<vmem>>, vector<128x512xf32>
    %cst_147 = arith.constant dense<0.000000e+00> : vector<8x512xf32>
    %398 = tpu.matmul %392, %397, %cst_147 {dimension_numbers = #tpu.dot_dimension_numbers<[1], [0], [0], [1], [0, 0, 1, 1], [], []>} : vector<8x128xf32>, vector<128x512xf32>, vector<8x512xf32> -> vector<8x512xf32>
    %399 = arith.addf %396, %398 : vector<8x512xf32>
    %400 = vector.extract_strided_slice %399 {offsets = [0, 0], sizes = [8, 384], strides = [1, 1]} : vector<8x512xf32> to vector<8x384xf32>
    %401 = arith.negf %400 : vector<8x384xf32>
    %402 = math.exp %401 : vector<8x384xf32>
    %cst_148 = arith.constant 1.000000e+00 : f32
    %403 = vector.broadcast %cst_148 : f32 to vector<8x384xf32>
    %404 = arith.addf %403, %402 : vector<8x384xf32>
    %405 = arith.divf %403, %404 : vector<8x384xf32>
    %406 = vector.extract_strided_slice %399 {offsets = [0, 384], sizes = [8, 128], strides = [1, 1]} : vector<8x512xf32> to vector<8x128xf32>
    %407 = math.tanh %406 : vector<8x128xf32>
    %408 = vector.extract_strided_slice %405 {offsets = [0, 0], sizes = [8, 128], strides = [1, 1]} : vector<8x384xf32> to vector<8x128xf32>
    %409 = vector.extract_strided_slice %405 {offsets = [0, 128], sizes = [8, 128], strides = [1, 1]} : vector<8x384xf32> to vector<8x128xf32>
    %410 = vector.extract_strided_slice %405 {offsets = [0, 256], sizes = [8, 128], strides = [1, 1]} : vector<8x384xf32> to vector<8x128xf32>
    %411 = arith.mulf %409, %390 : vector<8x128xf32>
    %412 = arith.mulf %408, %407 : vector<8x128xf32>
    %413 = arith.addf %411, %412 : vector<8x128xf32>
    %414 = math.tanh %413 : vector<8x128xf32>
    %415 = arith.mulf %410, %414 : vector<8x128xf32>
    %c8_i32_149 = arith.constant 8 : i32
    %c1_150 = arith.constant 1 : index
    %c0_151 = arith.constant 0 : index
    %c0_152 = arith.constant 0 : index
    %416 = vector.load %arg16[%c1_150, %c0_151, %c0_152] : memref<2x8x128xf32, #tpu.memory_space<vmem>>, vector<1x8x128xf32>
    %417 = vector.shape_cast %416 : vector<1x8x128xf32> to vector<8x128xf32>
    %418 = vector.shape_cast %415 : vector<8x128xf32> to vector<1x8x128xf32>
    tpu.vector_store %arg16[%c1_150, %c0_151, %c0_152], %418 {strides = array<i32>} : memref<2x8x128xf32, #tpu.memory_space<vmem>>, vector<1x8x128xf32>,
    %c1_153 = arith.constant 1 : index
    %c0_154 = arith.constant 0 : index
    %c0_155 = arith.constant 0 : index
    %419 = vector.load %arg17[%c1_153, %c0_154, %c0_155] : memref<2x8x128xf32, #tpu.memory_space<vmem>>, vector<1x8x128xf32>
    %420 = vector.shape_cast %419 : vector<1x8x128xf32> to vector<8x128xf32>
    %421 = vector.shape_cast %413 : vector<8x128xf32> to vector<1x8x128xf32>
    tpu.vector_store %arg17[%c1_153, %c0_154, %c0_155], %421 {strides = array<i32>} : memref<2x8x128xf32, #tpu.memory_space<vmem>>, vector<1x8x128xf32>,
    %c0_i32_156 = arith.constant 0 : i32
    %422 = arith.cmpi eq, %arg1, %c0_i32_156 : i32
    %423 = arith.extui %422 : i1 to i32
    %c0_i32_157 = arith.constant 0 : i32
    %424 = arith.cmpi ne, %423, %c0_i32_157 : i32
    scf.if %424 {
      %c0_158 = arith.constant 0 : index
      %c0_159 = arith.constant 0 : index
      %c0_160 = arith.constant 0 : index
      %425 = vector.load %arg16[%c0_158, %c0_159, %c0_160] : memref<2x8x128xf32, #tpu.memory_space<vmem>>, vector<2x8x128xf32>
      %c0_161 = arith.constant 0 : index
      %c0_162 = arith.constant 0 : index
      %c0_163 = arith.constant 0 : index
      %426 = vector.load %arg14[%c0_161, %c0_162, %c0_163] : memref<2x8x128xf32, #tpu.memory_space<vmem>>, vector<2x8x128xf32>
      tpu.vector_store %arg14[%c0_161, %c0_162, %c0_163], %425 {strides = array<i32>} : memref<2x8x128xf32, #tpu.memory_space<vmem>>, vector<2x8x128xf32>,
      %c0_164 = arith.constant 0 : index
      %c0_165 = arith.constant 0 : index
      %c0_166 = arith.constant 0 : index
      %427 = vector.load %arg17[%c0_164, %c0_165, %c0_166] : memref<2x8x128xf32, #tpu.memory_space<vmem>>, vector<2x8x128xf32>
      %c0_167 = arith.constant 0 : index
      %c0_168 = arith.constant 0 : index
      %c0_169 = arith.constant 0 : index
      %428 = vector.load %arg15[%c0_167, %c0_168, %c0_169] : memref<2x8x128xf32, #tpu.memory_space<vmem>>, vector<2x8x128xf32>
      tpu.vector_store %arg15[%c0_167, %c0_168, %c0_169], %427 {strides = array<i32>} : memref<2x8x128xf32, #tpu.memory_space<vmem>>, vector<2x8x128xf32>,
      %c1_170 = arith.constant 1 : index
      %c0_171 = arith.constant 0 : index
      %c0_172 = arith.constant 0 : index
      %429 = vector.load %arg16[%c1_170, %c0_171, %c0_172] : memref<2x8x128xf32, #tpu.memory_space<vmem>>, vector<1x8x128xf32>
      %430 = vector.shape_cast %429 : vector<1x8x128xf32> to vector<8x128xf32>
      %c0_173 = arith.constant 0 : index
      %c0_174 = arith.constant 0 : index
      %431 = vector.load %arg11[%c0_173, %c0_174] : memref<128x128xf32, #tpu.memory_space<vmem>>, vector<128x128xf32>
      %cst_175 = arith.constant dense<0.000000e+00> : vector<8x128xf32>
      %432 = tpu.matmul %430, %431, %cst_175 {dimension_numbers = #tpu.dot_dimension_numbers<[1], [0], [0], [1], [0, 0, 1, 1], [], []>} : vector<8x128xf32>, vector<128x128xf32>, vector<8x128xf32> -> vector<8x128xf32>
      %c0_176 = arith.constant 0 : index
      %c0_177 = arith.constant 0 : index
      %433 = vector.load %arg12[%c0_176, %c0_177] : memref<1x128xf32, #tpu.memory_space<vmem>>, vector<1x128xf32>
      %434 = vector.broadcast %433 : vector<1x128xf32> to vector<8x128xf32>
      %435 = arith.addf %432, %434 : vector<8x128xf32>
      %436 = arith.negf %435 : vector<8x128xf32>
      %437 = math.exp %436 : vector<8x128xf32>
      %cst_178 = arith.constant 1.000000e+00 : f32
      %438 = vector.broadcast %cst_178 : f32 to vector<8x128xf32>
      %439 = arith.addf %438, %437 : vector<8x128xf32>
      %440 = arith.divf %438, %439 : vector<8x128xf32>
      %c0_179 = arith.constant 0 : index
      %c0_180 = arith.constant 0 : index
      %441 = vector.load %arg13[%c0_179, %c0_180] : memref<8x128xf32, #tpu.memory_space<vmem>>, vector<8x128xf32>
      tpu.vector_store %arg13[%c0_179, %c0_180], %440 {strides = array<i32>} : memref<8x128xf32, #tpu.memory_space<vmem>>, vector<8x128xf32>,
    } else {
    }
    return
  }
  func.func @transform_0(%arg0: i32, %arg1: i32) -> (i32, i32, i32, i32) {
    %c0_i32 = arith.constant 0 : i32
    %c0_i32_0 = arith.constant 0 : i32
    %c0_i32_1 = arith.constant 0 : i32
    return %arg0, %arg1, %c0_i32, %c0_i32_0 : i32, i32, i32, i32
  }
  func.func @transform_1(%arg0: i32, %arg1: i32) -> (i32, i32, i32) {
    %c0_i32 = arith.constant 0 : i32
    %c0_i32_0 = arith.constant 0 : i32
    %c0_i32_1 = arith.constant 0 : i32
    return %c0_i32, %arg0, %c0_i32_0 : i32, i32, i32
  }
  func.func @transform_2(%arg0: i32, %arg1: i32) -> (i32, i32, i32) {
    %c0_i32 = arith.constant 0 : i32
    %c0_i32_0 = arith.constant 0 : i32
    %c0_i32_1 = arith.constant 0 : i32
    return %c0_i32, %arg0, %c0_i32_0 : i32, i32, i32
  }
  func.func @transform_3(%arg0: i32, %arg1: i32) -> (i32, i32) {
    %c0_i32 = arith.constant 0 : i32
    %c0_i32_0 = arith.constant 0 : i32
    %c0_i32_1 = arith.constant 0 : i32
    return %c0_i32, %c0_i32_0 : i32, i32
  }
  func.func @transform_4(%arg0: i32, %arg1: i32) -> (i32, i32) {
    %c0_i32 = arith.constant 0 : i32
    %c0_i32_0 = arith.constant 0 : i32
    %c0_i32_1 = arith.constant 0 : i32
    return %c0_i32, %c0_i32_0 : i32, i32
  }
  func.func @transform_5(%arg0: i32, %arg1: i32) -> (i32, i32) {
    %c0_i32 = arith.constant 0 : i32
    %c0_i32_0 = arith.constant 0 : i32
    %c0_i32_1 = arith.constant 0 : i32
    return %c0_i32, %c0_i32_0 : i32, i32
  }
  func.func @transform_6(%arg0: i32, %arg1: i32) -> (i32, i32) {
    %c0_i32 = arith.constant 0 : i32
    %c0_i32_0 = arith.constant 0 : i32
    %c0_i32_1 = arith.constant 0 : i32
    return %c0_i32, %c0_i32_0 : i32, i32
  }
  func.func @transform_7(%arg0: i32, %arg1: i32) -> (i32, i32) {
    %c0_i32 = arith.constant 0 : i32
    %c0_i32_0 = arith.constant 0 : i32
    %c0_i32_1 = arith.constant 0 : i32
    return %c0_i32, %c0_i32_0 : i32, i32
  }
  func.func @transform_8(%arg0: i32, %arg1: i32) -> (i32, i32) {
    %c0_i32 = arith.constant 0 : i32
    %c0_i32_0 = arith.constant 0 : i32
    %c0_i32_1 = arith.constant 0 : i32
    return %c0_i32, %c0_i32_0 : i32, i32
  }
  func.func @transform_9(%arg0: i32, %arg1: i32) -> (i32, i32) {
    %c0_i32 = arith.constant 0 : i32
    %c0_i32_0 = arith.constant 0 : i32
    %c0_i32_1 = arith.constant 0 : i32
    return %c0_i32, %c0_i32_0 : i32, i32
  }
  func.func @transform_10(%arg0: i32, %arg1: i32) -> (i32, i32) {
    %c0_i32 = arith.constant 0 : i32
    %c0_i32_0 = arith.constant 0 : i32
    %c0_i32_1 = arith.constant 0 : i32
    return %c0_i32, %c0_i32_0 : i32, i32
  }
  func.func @transform_11(%arg0: i32, %arg1: i32) -> (i32, i32) {
    %c0_i32 = arith.constant 0 : i32
    %c0_i32_0 = arith.constant 0 : i32
    return %arg0, %c0_i32 : i32, i32
  }
  func.func @transform_12(%arg0: i32, %arg1: i32) -> (i32, i32, i32) {
    %c0_i32 = arith.constant 0 : i32
    %c0_i32_0 = arith.constant 0 : i32
    %c0_i32_1 = arith.constant 0 : i32
    return %c0_i32, %arg0, %c0_i32_0 : i32, i32, i32
  }
  func.func @transform_13(%arg0: i32, %arg1: i32) -> (i32, i32, i32) {
    %c0_i32 = arith.constant 0 : i32
    %c0_i32_0 = arith.constant 0 : i32
    %c0_i32_1 = arith.constant 0 : i32
    return %c0_i32, %arg0, %c0_i32_0 : i32, i32, i32
  }
}

</mosaic_0001>

<bundles_post_ra>
// kernel: lstm_model_forward.1
= control target key start
LH: loop header
LB: loop body
LE: loop exit
PB: predicated region body
PF: predicated region fallthrough
CT: control target
= control target key end

     0   :  { %v5895_v3 = vmov 0.0   ;;  %vm91_vm0 = vcmask 130048   ;;  %vm5897_vm1 = vmmov 0   ;;  %s7913_s3 = inlined_call_operand.vmem [shape: f32[16,512], index: 3, kind: input, shape index: {}]   ;;  %s7914_s0 = inlined_call_operand.vmem [shape: f32[1,1,64,16], index: 0, kind: input, shape index: {}]   ;;  %s7915_s4 = inlined_call_operand.vmem [shape: f32[128,512], index: 4, kind: input, shape index: {}]   ;;  %s7916_s1 = inlined_call_operand.vmem [shape: f32[2,8,128], index: 1, kind: input, shape index: {}]   ;;  %s7917_s5 = inlined_call_operand.vmem [shape: f32[1,512], index: 5, kind: input, shape index: {}]   ;;  %s7918_s2 = inlined_call_operand.vmem [shape: f32[2,8,128], index: 2, kind: input, shape index: {}]   ;;  %s7919_s6 = inlined_call_operand.vmem [shape: f32[128,512], index: 6, kind: input, shape index: {}]   ;;  %s7920_s7 = inlined_call_operand.vmem [shape: f32[128,512], index: 7, kind: input, shape index: {}]   ;;  %s7921_s13 = inlined_call_operand.vmem [shape: f32[2,8,128], index: 13, kind: output, shape index: {2}]   ;;  %s7922_s12 = inlined_call_operand.vmem [shape: f32[2,8,128], index: 12, kind: output, shape index: {1}]   ;;  %s7923_s8 = inlined_call_operand.vmem [shape: f32[1,512], index: 8, kind: input, shape index: {}]   ;;  %s7924_s9 = inlined_call_operand.vmem [shape: f32[128,128], index: 9, kind: input, shape index: {}]   ;;  %s7925_s10 = inlined_call_operand.vmem [shape: f32[1,128], index: 10, kind: input, shape index: {}]   ;;  %s7926_s11 = inlined_call_operand.vmem [shape: f32[8,128], index: 11, kind: output, shape index: {0}]  }
   0x1   :  { %v62_v0 = vld [vmem:[%s7913_s3 + $0x8] sm:$0xff]  ;;  %v64_v2 = vld [vmem:[%s7913_s3 + $0x18] sm:$0xff]  ;;  %180 = vmatprep.mubr.f32.mxu0 %v5895_v3  ;;  %293 = vmatprep.mubr.f32.mxu1 %v5895_v3  ;;  %v61_v6 = vld [vmem:[%s7913_s3] sm:$0xff] }
   0x2   :  { %v66_v1 = vld [vmem:[%s7913_s3 + $0x28] sm:$0xff]  ;;  %v68_v5 = vld [vmem:[%s7913_s3 + $0x38] sm:$0xff]  ;;  %v65_v7 = vld [vmem:[%s7913_s3 + $0x20] sm:$0xff] }
   0x3   :  { %v4384_v4 = vpack.c.bf16 %v66_v1, %v62_v0  ;;  %v4388_v8 = vpack.c.bf16 %v68_v5, %v64_v2  ;;  %v4386_v9 = vpack.c.bf16 %v65_v7, %v61_v6  ;;  %v63_v10 = vld [vmem:[%s7913_s3 + $0x10] sm:$0xff]  ;;  %v53_v12 = vld [vmem:[%s7914_s0] sm:$0xff]  ;;  %v384_v14 = vld [vmem:[%s7915_s4 + $0x8] sm:$0xff] }
   0x4   :  { %v67_v11 = vld [vmem:[%s7913_s3 + $0x30] sm:$0xff]  ;;  %v388_v15 = vld [vmem:[%s7915_s4 + $0x28] sm:$0xff]  ;;  %v386_v16 = vld [vmem:[%s7915_s4 + $0x18] sm:$0xff] }
   0x5   :  { %4385 = vmatprep.subr.bf16.mxu0 %v4384_v4  ;;  %v4390_v13 = vpack.c.bf16 %v67_v11, %v63_v10  ;;  %4389 = vmatprep.subr.bf16.mxu1 %v4388_v8  ;;  %v6006_v17 = vpack.c.bf16 %v388_v15, %v384_v14  ;;  %v390_v18 = vld [vmem:[%s7915_s4 + $0x38] sm:$0xff]  ;;  %v383_v19 = vld [vmem:[%s7915_s4] sm:$0xff]  ;;  %v385_v23 = vld [vmem:[%s7915_s4 + $0x10] sm:$0xff] }
   0x6   :  { %4387 = vmatpush1.bf16.msra.mxu0 %v4386_v9  ;;  %v387_v20 = vld [vmem:[%s7915_s4 + $0x20] sm:$0xff]  ;;  %v6017_v21 = vpack.c.bf16 %v390_v18, %v386_v16  ;;  %v389_v24 = vld [vmem:[%s7915_s4 + $0x30] sm:$0xff]  ;;  %v392_v26 = vld [vmem:[%s7915_s4 + $0x48] sm:$0xff] }
   0x7   :  { %4391 = vmatpush1.bf16.msra.mxu1 %v4390_v13  ;;  %v6019_v22 = vpack.c.bf16 %v387_v20, %v383_v19  ;;  %4393 = vmatprep.subr.bf16.mxu0 %v6006_v17  ;;  %v6028_v25 = vpack.c.bf16 %v389_v24, %v385_v23  ;;  %v396_v27 = vld [vmem:[%s7915_s4 + $0x68] sm:$0xff]  ;;  %v394_v28 = vld [vmem:[%s7915_s4 + $0x58] sm:$0xff]  ;;  %v391_v31 = vld [vmem:[%s7915_s4 + $0x40] sm:$0xff] }
   0x8   :  { %4425 = vmatprep.subr.bf16.mxu1 %v6017_v21  ;;  %v6041_v29 = vpack.c.bf16 %v396_v27, %v392_v26  ;;  %v398_v30 = vld [vmem:[%s7915_s4 + $0x78] sm:$0xff]  ;;  %v395_v32 = vld [vmem:[%s7915_s4 + $0x60] sm:$0xff]  ;;  %v54_v33 = vld [vmem:[%s7914_s0 + $0x8] sm:$0xff] }
   0x9   :  { %4266 = vmatmul.mubr.msk.f32.vlgmr.msra.gmra.mrb[0].mxu0 %vm91_vm0, %v53_v12  ;;  %v6057_v34 = vpack.c.bf16 %v398_v30, %v394_v28  ;;  %v6059_v35 = vpack.c.bf16 %v395_v32, %v391_v31  ;;  %v393_v36 = vld [vmem:[%s7915_s4 + $0x50] sm:$0xff]  ;;  %v400_v39 = vld [vmem:[%s7915_s4 + $0x88] sm:$0xff]  ;;  %v402_v41 = vld [vmem:[%s7915_s4 + $0x98] sm:$0xff] }
   0xa   :  { %4274 = vmatmul.mubr.msk.f32.vlgmr.msra.gmra.mrb[0].mxu1 %vm91_vm0, %v53_v12  ;;  %4395 = vmatpush1.bf16.msra.mxu0 %v6019_v22  ;;  %v397_v37 = vld [vmem:[%s7915_s4 + $0x70] sm:$0xff]  ;;  %v404_v40 = vld [vmem:[%s7915_s4 + $0xa8] sm:$0xff]  ;;  %v406_v43 = vld [vmem:[%s7915_s4 + $0xb8] sm:$0xff] }
   0xb   :  { %4427 = vmatpush1.bf16.msra.mxu1 %v6028_v25  ;;  %186 = vmatprep.mubr.f32.mxu0 %v5895_v3  ;;  %v6069_v38 = vpack.c.bf16 %v397_v37, %v393_v36  ;;  %v6082_v42 = vpack.c.bf16 %v404_v40, %v400_v39  ;;  %v399_v44 = vld [vmem:[%s7915_s4 + $0x80] sm:$0xff]  ;;  %v55_v46 = vld [vmem:[%s7914_s0 + $0x10] sm:$0xff]  ;;  %v6098_v47 = vpack.c.bf16 %v406_v43, %v402_v41  ;;  %v408_v51 = vld [vmem:[%s7915_s4 + $0xc8] sm:$0xff] }
   0xc   :  { %299 = vmatprep.mubr.f32.mxu1 %v5895_v3  ;;  %4397 = vmatprep.subr.bf16.mxu0 %v6041_v29  ;;  %v403_v45 = vld [vmem:[%s7915_s4 + $0xa0] sm:$0xff]  ;;  %v401_v48 = vld [vmem:[%s7915_s4 + $0x90] sm:$0xff]  ;;  %v412_v52 = vld [vmem:[%s7915_s4 + $0xe8] sm:$0xff] }
   0xd   :  { %4267 = vmatmul.mubr.msk.f32.gmra.mrb[2].mxu0 %vm91_vm0, %v54_v33  ;;  %4429 = vmatprep.subr.bf16.mxu1 %v6057_v34  ;;  %v405_v49 = vld [vmem:[%s7915_s4 + $0xb0] sm:$0xff]  ;;  %v6108_v50 = vpack.c.bf16 %v403_v45, %v399_v44  ;;  %v410_v53 = vld [vmem:[%s7915_s4 + $0xd8] sm:$0xff]  ;;  %v407_v56 = vld [vmem:[%s7915_s4 + $0xc0] sm:$0xff]  ;;  %v6134_v58 = vpack.c.bf16 %v412_v52, %v408_v51 }
   0xe   :  { %4275 = vmatmul.mubr.msk.f32.gmra.mrb[2].mxu1 %vm91_vm0, %v54_v33  ;;  %4399 = vmatpush1.bf16.msra.mxu0 %v6059_v35  ;;  %v6121_v54 = vpack.c.bf16 %v405_v49, %v401_v48  ;;  %v414_v55 = vld [vmem:[%s7915_s4 + $0xf8] sm:$0xff]  ;;  %v411_v57 = vld [vmem:[%s7915_s4 + $0xe0] sm:$0xff]  ;;  %v409_v59 = vld [vmem:[%s7915_s4 + $0xd0] sm:$0xff] }
   0xf   :  { %4431 = vmatpush1.bf16.msra.mxu1 %v6069_v38  ;;  %192 = vmatprep.mubr.f32.mxu0 %v5895_v3  ;;  %v413_v60 = vld [vmem:[%s7915_s4 + $0xf0] sm:$0xff]  ;;  %v6144_v61 = vpack.c.bf16 %v414_v55, %v410_v53  ;;  %v416_v62 = vld [vmem:[%s7915_s4 + $0x108] sm:$0xff]  ;;  %v56_v0 = vld [vmem:[%s7914_s0 + $0x18] sm:$0xff]  ;;  %v6157_v1 = vpack.c.bf16 %v411_v57, %v407_v56 }
  0x10   :  { %305 = vmatprep.mubr.f32.mxu1 %v5895_v3  ;;  %4401 = vmatprep.subr.bf16.mxu0 %v6082_v42  ;;  %v420_v63 = vld [vmem:[%s7915_s4 + $0x128] sm:$0xff]  ;;  %v418_v2 = vld [vmem:[%s7915_s4 + $0x118] sm:$0xff]  ;;  %v6167_v5 = vpack.c.bf16 %v413_v60, %v409_v59  ;;  %v415_v6 = vld [vmem:[%s7915_s4 + $0x100] sm:$0xff] }
  0x11   :  { %4268 = vmatmul.mubr.msk.f32.gmra.mrb[4].mxu0 %vm91_vm0, %v55_v46  ;;  %4433 = vmatprep.subr.bf16.mxu1 %v6098_v47  ;;  %v422_v4 = vld [vmem:[%s7915_s4 + $0x138] sm:$0xff]  ;;  %v419_v7 = vld [vmem:[%s7915_s4 + $0x120] sm:$0xff]  ;;  %v6177_v8 = vpack.c.bf16 %v420_v63, %v416_v62  ;;  %v417_v9 = vld [vmem:[%s7915_s4 + $0x110] sm:$0xff] }
  0x12   :  { %4276 = vmatmul.mubr.msk.f32.gmra.mrb[4].mxu1 %vm91_vm0, %v55_v46  ;;  %4403 = vmatpush1.bf16.msra.mxu0 %v6108_v50  ;;  %v421_v10 = vld [vmem:[%s7915_s4 + $0x130] sm:$0xff]  ;;  %v6187_v11 = vpack.c.bf16 %v422_v4, %v418_v2  ;;  %v424_v12 = vld [vmem:[%s7915_s4 + $0x148] sm:$0xff]  ;;  %v57_v14 = vld [vmem:[%s7914_s0 + $0x20] sm:$0xff]  ;;  %v6200_v15 = vpack.c.bf16 %v419_v7, %v415_v6 }
  0x13   :  { %4435 = vmatpush1.bf16.msra.mxu1 %v6121_v54  ;;  %198 = vmatprep.mubr.f32.mxu0 %v5895_v3  ;;  %v428_v13 = vld [vmem:[%s7915_s4 + $0x168] sm:$0xff]  ;;  %v426_v16 = vld [vmem:[%s7915_s4 + $0x158] sm:$0xff]  ;;  %v6210_v19 = vpack.c.bf16 %v421_v10, %v417_v9  ;;  %v423_v20 = vld [vmem:[%s7915_s4 + $0x140] sm:$0xff]  ;;  %v71_v9 = vlaneseq }
  0x14   :  { %311 = vmatprep.mubr.f32.mxu1 %v5895_v3  ;;  %4405 = vmatprep.subr.bf16.mxu0 %v6134_v58  ;;  %v430_v18 = vld [vmem:[%s7915_s4 + $0x178] sm:$0xff]  ;;  %v427_v23 = vld [vmem:[%s7915_s4 + $0x160] sm:$0xff]  ;;  %v6220_v24 = vpack.c.bf16 %v428_v13, %v424_v12  ;;  %v425_v26 = vld [vmem:[%s7915_s4 + $0x150] sm:$0xff] }
  0x15   :  { %4269 = vmatmul.mubr.msk.f32.gmra.mrb[6].mxu0 %vm91_vm0, %v56_v0  ;;  %4437 = vmatprep.subr.bf16.mxu1 %v6144_v61  ;;  %v429_v27 = vld [vmem:[%s7915_s4 + $0x170] sm:$0xff]  ;;  %v6230_v28 = vpack.c.bf16 %v430_v18, %v426_v16  ;;  %v432_v30 = vld [vmem:[%s7915_s4 + $0x188] sm:$0xff]  ;;  %v6243_v33 = vpack.c.bf16 %v427_v23, %v423_v20  ;;  %v434_v36 = vld [vmem:[%s7915_s4 + $0x198] sm:$0xff]  ;;  %v6377_v10 = vshrl.u32 %v71_v9, 7 }
  0x16   :  { %4277 = vmatmul.mubr.msk.f32.gmra.mrb[6].mxu1 %vm91_vm0, %v56_v0  ;;  %4407 = vmatpush1.bf16.msra.mxu0 %v6157_v1  ;;  %v436_v31 = vld [vmem:[%s7915_s4 + $0x1a8] sm:$0xff]  ;;  %v438_v37 = vld [vmem:[%s7915_s4 + $0x1b8] sm:$0xff]  ;;  %v6253_v39 = vpack.c.bf16 %v429_v27, %v425_v26  ;;  %v431_v40 = vld [vmem:[%s7915_s4 + $0x180] sm:$0xff] }
  0x17   :  { %4439 = vmatpush1.bf16.msra.mxu1 %v6167_v5  ;;  %204 = vmatprep.mubr.f32.mxu0 %v5895_v3  ;;  %v58_v32 = vld [vmem:[%s7914_s0 + $0x28] sm:$0xff]  ;;  %v435_v41 = vld [vmem:[%s7915_s4 + $0x1a0] sm:$0xff]  ;;  %v6263_v43 = vpack.c.bf16 %v436_v31, %v432_v30  ;;  %v433_v44 = vld [vmem:[%s7915_s4 + $0x190] sm:$0xff]  ;;  %v6273_v46 = vpack.c.bf16 %v438_v37, %v434_v36  ;;  %v73_v12 = vsub.s32 0, %v6377_v10  ;;  %v81_v18 = vsub.s32 2, %v6377_v10 }
  0x18   :  { %317 = vmatprep.mubr.f32.mxu1 %v5895_v3  ;;  %4409 = vmatprep.subr.bf16.mxu0 %v6177_v8  ;;  %v437_v45 = vld [vmem:[%s7915_s4 + $0x1b0] sm:$0xff]  ;;  %v440_v48 = vld [vmem:[%s7915_s4 + $0x1c8] sm:$0xff]  ;;  %v6286_v52 = vpack.c.bf16 %v435_v41, %v431_v40  ;;  %v442_v53 = vld [vmem:[%s7915_s4 + $0x1d8] sm:$0xff]  ;;  %v85_v37 = vsub.s32 3, %v6377_v10 }
  0x19   :  { %4270 = vmatmul.mubr.msk.f32.gmra.mrb[8].mxu0 %vm91_vm0, %v57_v14  ;;  %4441 = vmatprep.subr.bf16.mxu1 %v6187_v11  ;;  %v444_v49 = vld [vmem:[%s7915_s4 + $0x1e8] sm:$0xff]  ;;  %v59_v51 = vld [vmem:[%s7914_s0 + $0x30] sm:$0xff]  ;;  %v446_v55 = vld [vmem:[%s7915_s4 + $0x1f8] sm:$0xff]  ;;  %v6296_v56 = vpack.c.bf16 %v437_v45, %v433_v44 }
  0x1a   :  { %4278 = vmatmul.mubr.msk.f32.gmra.mrb[8].mxu1 %vm91_vm0, %v57_v14  ;;  %4411 = vmatpush1.bf16.msra.mxu0 %v6200_v15  ;;  %v439_v57 = vld [vmem:[%s7915_s4 + $0x1c0] sm:$0xff]  ;;  %v6306_v60 = vpack.c.bf16 %v444_v49, %v440_v48  ;;  %v441_v62 = vld [vmem:[%s7915_s4 + $0x1d0] sm:$0xff]  ;;  %v6316_v0 = vpack.c.bf16 %v446_v55, %v442_v53  ;;  %v60_v2 = vld [vmem:[%s7914_s0 + $0x38] sm:$0xff]  ;;  %v77_v14 = vsub.s32 1, %v6377_v10 }
  0x1b   :  { %4443 = vmatpush1.bf16.msra.mxu1 %v6210_v19  ;;  %210 = vmatprep.mubr.f32.mxu0 %v5895_v3  ;;  %v443_v59 = vld [vmem:[%s7915_s4 + $0x1e0] sm:$0xff]  ;;  %v445_v63 = vld [vmem:[%s7915_s4 + $0x1f0] sm:$0xff]  ;;  %v50_v10 = vld [vmem:[%s7918_s2 + $0x8] sm:$0xff] }
  0x1c   :  { %323 = vmatprep.mubr.f32.mxu1 %v5895_v3  ;;  %4413 = vmatprep.subr.bf16.mxu0 %v6220_v24  ;;  %v6323_v4 = vpack.c.bf16 %v443_v59, %v439_v57  ;;  %v6327_v6 = vpack.c.bf16 %v445_v63, %v441_v62  ;;  %v45_v7 = vld [vmem:[%s7916_s1] sm:$0xff] }
  0x1d   :  { %4271 = vmatmul.mubr.msk.f32.gmra.mrb[10].mxu0 %vm91_vm0, %v58_v32  ;;  %4445 = vmatprep.subr.bf16.mxu1 %v6230_v28  ;;  %v69_v13 = vld [vmem:[%s7917_s5] sm:$0xf] }
  0x1e   :  { %4279 = vmatmul.mubr.msk.f32.gmra.mrb[10].mxu1 %vm91_vm0, %v58_v32  ;;  %4415 = vmatpush1.bf16.msra.mxu0 %v6243_v33  ;;  %v6386_v16 = vrot.slane %v69_v13, %v73_v12  ;;  %v6397_v32 = vrot.slane %v69_v13, %v81_v18  ;;  %v6403_v41 = vrot.slane %v69_v13, %v85_v37  ;;  %v49_v62 = vld [vmem:[%s7918_s2] sm:$0xff] }
  0x1f   :  { %4447 = vmatpush1.bf16.msra.mxu1 %v6253_v39  ;;  %216 = vmatprep.mubr.f32.mxu0 %v5895_v3 }
  0x20   :  { %329 = vmatprep.mubr.f32.mxu1 %v5895_v3  ;;  %4417 = vmatprep.subr.bf16.mxu0 %v6263_v43 }
  0x21   :  { %4272 = vmatmul.mubr.msk.f32.gmra.mrb[12].mxu0 %vm91_vm0, %v59_v51  ;;  %4449 = vmatprep.subr.bf16.mxu1 %v6273_v46 }
  0x22   :  { %4280 = vmatmul.mubr.msk.f32.gmra.mrb[12].mxu1 %vm91_vm0, %v59_v51  ;;  %4419 = vmatpush1.bf16.msra.mxu0 %v6286_v52 }
  0x23   :  { %4451 = vmatpush1.bf16.msra.mxu1 %v6296_v56  ;;  %222 = vmatprep.mubr.f32.mxu0 %v5895_v3 }
  0x24   :  { %335 = vmatprep.mubr.f32.mxu1 %v5895_v3  ;;  %4421 = vmatprep.subr.bf16.mxu0 %v6306_v60 }
  0x25   :  { %4273 = vmatmul.mubr.msk.f32.gmra.mrb[14].mxu0 %vm91_vm0, %v60_v2  ;;  %4453 = vmatprep.subr.bf16.mxu1 %v6316_v0 }
  0x26   :  { %4281 = vmatmul.mubr.msk.f32.gmra.mrb[14].mxu1 %vm91_vm0, %v60_v2  ;;  %4423 = vmatpush1.bf16.msra.mxu0 %v6323_v4 }
  0x27   :  { %4455 = vmatpush1.bf16.msra.mxu1 %v6327_v6  ;;  %511 = vmatprep.mubr.f32.mxu0 %v5895_v3 }
  0x28   :  { %582 = vmatprep.mubr.f32.mxu1 %v5895_v3  ;;  %4457 = vmatprep.subr.bf16.mxu0 %v6006_v17 }
  0x29   :  { %512 = vmatmul.mubr.f32.vlgmr.msra.gmra.mrb[0].mxu0 %v45_v7  ;;  %4489 = vmatprep.subr.bf16.mxu1 %v6017_v21 }
  0x2a   :  { %583 = vmatmul.mubr.f32.vlgmr.msra.gmra.mrb[0].mxu1 %v45_v7  ;;  %4459 = vmatpush1.bf16.msra.mxu0 %v6019_v22 }
  0x2b   :  { %4491 = vmatpush1.bf16.msra.mxu1 %v6028_v25  ;;  %4461 = vmatprep.subr.bf16.mxu0 %v6041_v29 }
  0x2c   :  { %4493 = vmatprep.subr.bf16.mxu1 %v6057_v34  ;;  %753 = vmatprep.mubr.f32.mxu0 %v5895_v3 }
  0x2d   :  { %824 = vmatprep.mubr.f32.mxu1 %v5895_v3 }
  0x2e   :  { %4463 = vmatpush1.bf16.msra.mxu0 %v6059_v35 }
  0x2f   :  { %4495 = vmatpush1.bf16.msra.mxu1 %v6069_v38  ;;  %4465 = vmatprep.subr.bf16.mxu0 %v6082_v42 }
  0x30   :  { %4497 = vmatprep.subr.bf16.mxu1 %v6098_v47 }
  0x32   :  { %4467 = vmatpush1.bf16.msra.mxu0 %v6108_v50 }
  0x33   :  { %4499 = vmatpush1.bf16.msra.mxu1 %v6121_v54  ;;  %4469 = vmatprep.subr.bf16.mxu0 %v6134_v58 }
  0x34   :  { %4501 = vmatprep.subr.bf16.mxu1 %v6144_v61 }
  0x36   :  { %4471 = vmatpush1.bf16.msra.mxu0 %v6157_v1 }
  0x37   :  { %4503 = vmatpush1.bf16.msra.mxu1 %v6167_v5  ;;  %4473 = vmatprep.subr.bf16.mxu0 %v6177_v8 }
  0x38   :  { %4505 = vmatprep.subr.bf16.mxu1 %v6187_v11 }
  0x3a   :  { %4475 = vmatpush1.bf16.msra.mxu0 %v6200_v15 }
  0x3b   :  { %4507 = vmatpush1.bf16.msra.mxu1 %v6210_v19  ;;  %4477 = vmatprep.subr.bf16.mxu0 %v6220_v24 }
  0x3c   :  { %4509 = vmatprep.subr.bf16.mxu1 %v6230_v28 }
  0x3e   :  { %4479 = vmatpush1.bf16.msra.mxu0 %v6243_v33 }
  0x3f   :  { %4511 = vmatpush1.bf16.msra.mxu1 %v6253_v39  ;;  %4481 = vmatprep.subr.bf16.mxu0 %v6263_v43 }
  0x40   :  { %4513 = vmatprep.subr.bf16.mxu1 %v6273_v46 }
  0x42   :  { %4483 = vmatpush1.bf16.msra.mxu0 %v6286_v52 }
  0x43   :  { %4515 = vmatpush1.bf16.msra.mxu1 %v6296_v56  ;;  %4485 = vmatprep.subr.bf16.mxu0 %v6306_v60 }
  0x44   :  { %4517 = vmatprep.subr.bf16.mxu1 %v6316_v0 }
  0x46   :  { %4487 = vmatpush1.bf16.msra.mxu0 %v6323_v4 }
  0x47   :  { %4519 = vmatpush1.bf16.msra.mxu1 %v6327_v6  ;;  %4521 = vmatprep.subr.bf16.mxu0 %v6006_v17  ;;  %v6390_v17 = vrot.slane %v69_v13, %v77_v14 }
  0x48   :  { %4553 = vmatprep.subr.bf16.mxu1 %v6017_v21 }
  0xfc   :  { %v513_v21 = vpop.f32.mrb[0].mxu0 }
  0xfd   :  { %v5504_v20 = vadd.f32 %v513_v21, %v6386_v16  ;;  %v584_v23 = vpop.f32.mrb[0].mxu1  ;;  %v515_v26 = vpop.f32.mrb[1].mxu0 }
  0xfe   :  { %v5505_v27 = vadd.f32 %v515_v26, %v6390_v17  ;;  %v586_v30 = vpop.f32.mrb[1].mxu1  ;;  %v5520_v40 = vadd.f32 %v584_v23, %v6397_v32 }
  0xff   :  { %v4282_v31 = vmul.f32 -1.442695, %v5504_v20  ;;  %v5521_v45 = vadd.f32 %v586_v30, %v6403_v41 }
 0x100   :  { %v4283_v36 = vmul.f32 -1.442695, %v5505_v27  ;;  %v4284_v44 = vmul.f32 -1.442695, %v5520_v40 }
 0x101   :  { %5635 = vpow2.f32 %v4282_v31 }
 0x102   :  { %5637 = vpow2.f32 %v4283_v36 }
 0x103   :  { %5639 = vpow2.f32 %v4284_v44 }
 0x104   :  { %5641 = vtanh.f32 %v5521_v45 }
 0x10b   :  { %v5636_v48 = vpop.eup %5635 }
 0x10c   :  { %v602_v49 = vadd.f32 1.0, %v5636_v48  ;;  %v5638_v51 = vpop.eup %5637 }
 0x10d   :  { %v603_v53 = vadd.f32 1.0, %v5638_v51  ;;  %v5640_v55 = vpop.eup %5639 }
 0x10e   :  { %5643 = vrcp.f32 %v602_v49  ;;  %v5642_v57 = vpop.eup %5641  ;;  %v604_v7 = vadd.f32 1.0, %v5640_v55 }
 0x10f   :  { %5645 = vrcp.f32 %v603_v53 }
 0x110   :  { %5647 = vrcp.f32 %v604_v7  ;;  %v1114_v7 = vld [vmem:[%s7915_s4 + $0x18] sm:$0xff] }
 0x118   :  { %v5644_v59 = vpop.eup %5643 }
 0x119   :  { %v613_v63 = vmul.f32 %v5644_v59, %v5642_v57  ;;  %v5646_v2 = vpop.eup %5645 }
 0x11a   :  { %v612_v9 = vmul.f32 %v5646_v2, %v49_v62  ;;  %v5648_v21 = vpop.eup %5647  ;;  %v1116_v2 = vld [vmem:[%s7915_s4 + $0x28] sm:$0xff] }
 0x11c   :  { %v6409_v13 = vadd.f32 %v613_v63, %v612_v9  ;;  %v1112_v63 = vld [vmem:[%s7915_s4 + $0x8] sm:$0xff] }
 0x11d   :  { %v6471_v9 = vpack.c.bf16 %v1116_v2, %v1112_v63 }
 0x11e   :  { %5649 = vtanh.f32 %v6409_v13 }
 0x128   :  { %v5650_v20 = vpop.eup %5649 }
 0x129   :  { %v6412_v23 = vmul.f32 %v5650_v20, %v5648_v21  ;;  %v1111_v21 = vld [vmem:[%s7915_s4] sm:$0xff] }
 0x12a   :  { %v1115_v20 = vld [vmem:[%s7915_s4 + $0x20] sm:$0xff] }
 0x12b   :  { %754 = vmatmul.mubr.f32.vlgmr.msra.gmra.mrb[2].mxu0 %v6412_v23  ;;  %825 = vmatmul.mubr.f32.vlgmr.msra.gmra.mrb[2].mxu1 %v6412_v23 }
 0x12c   :  { %4523 = vmatpush1.bf16.msra.mxu0 %v6019_v22  ;;  %4555 = vmatpush1.bf16.msra.mxu1 %v6028_v25 }
 0x12d   :  { %4525 = vmatprep.subr.bf16.mxu0 %v6041_v29  ;;  %4557 = vmatprep.subr.bf16.mxu1 %v6057_v34 }
 0x12e   :  { %996 = vmatprep.mubr.f32.mxu0 %v5895_v3  ;;  %1067 = vmatprep.mubr.f32.mxu1 %v5895_v3 }
 0x130   :  { %4527 = vmatpush1.bf16.msra.mxu0 %v6059_v35  ;;  %4559 = vmatpush1.bf16.msra.mxu1 %v6069_v38 }
 0x131   :  { %4529 = vmatprep.subr.bf16.mxu0 %v6082_v42  ;;  %4561 = vmatprep.subr.bf16.mxu1 %v6098_v47 }
 0x134   :  { %4531 = vmatpush1.bf16.msra.mxu0 %v6108_v50  ;;  %4563 = vmatpush1.bf16.msra.mxu1 %v6121_v54 }
 0x135   :  { %4533 = vmatprep.subr.bf16.mxu0 %v6134_v58  ;;  %4565 = vmatprep.subr.bf16.mxu1 %v6144_v61 }
 0x138   :  { %4535 = vmatpush1.bf16.msra.mxu0 %v6157_v1  ;;  %4567 = vmatpush1.bf16.msra.mxu1 %v6167_v5 }
 0x139   :  { %4537 = vmatprep.subr.bf16.mxu0 %v6177_v8  ;;  %4569 = vmatprep.subr.bf16.mxu1 %v6187_v11 }
 0x13c   :  { %4539 = vmatpush1.bf16.msra.mxu0 %v6200_v15  ;;  %4571 = vmatpush1.bf16.msra.mxu1 %v6210_v19 }
 0x13d   :  { %4541 = vmatprep.subr.bf16.mxu0 %v6220_v24  ;;  %4573 = vmatprep.subr.bf16.mxu1 %v6230_v28 }
 0x140   :  { %4543 = vmatpush1.bf16.msra.mxu0 %v6243_v33  ;;  %4575 = vmatpush1.bf16.msra.mxu1 %v6253_v39 }
 0x141   :  { %4545 = vmatprep.subr.bf16.mxu0 %v6263_v43  ;;  %4577 = vmatprep.subr.bf16.mxu1 %v6273_v46 }
 0x144   :  { %4547 = vmatpush1.bf16.msra.mxu0 %v6286_v52  ;;  %4579 = vmatpush1.bf16.msra.mxu1 %v6296_v56 }
 0x145   :  { %4549 = vmatprep.subr.bf16.mxu0 %v6306_v60  ;;  %4581 = vmatprep.subr.bf16.mxu1 %v6316_v0 }
 0x148   :  { %4551 = vmatpush1.bf16.msra.mxu0 %v6323_v4  ;;  %4583 = vmatpush1.bf16.msra.mxu1 %v6327_v6 }
 0x149   :  { %4585 = vmatprep.subr.bf16.mxu0 %v6471_v9 }
 0x1fe   :  { %v755_v22 = vpop.f32.mrb[2].mxu0  ;;  %v826_v25 = vpop.f32.mrb[2].mxu1 }
 0x1ff   :  { %v5506_v29 = vadd.f32 %v755_v22, %v6386_v16  ;;  %v757_v34 = vpop.f32.mrb[3].mxu0  ;;  %v828_v35 = vpop.f32.mrb[3].mxu1  ;;  %v5522_v50 = vadd.f32 %v826_v25, %v6397_v32  ;;  %v6484_v25 = vpack.c.bf16 %v1115_v20, %v1111_v21 }
 0x200   :  { %v5507_v38 = vadd.f32 %v757_v34, %v6390_v17  ;;  %v5523_v54 = vadd.f32 %v828_v35, %v6403_v41  ;;  %v1117_v34 = vld [vmem:[%s7915_s4 + $0x30] sm:$0xff] }
 0x201   :  { %v4285_v42 = vmul.f32 -1.442695, %v5506_v29  ;;  %v4287_v26 = vmul.f32 -1.442695, %v5522_v50  ;;  %v1113_v29 = vld [vmem:[%s7915_s4 + $0x10] sm:$0xff] }
 0x202   :  { %v4286_v47 = vmul.f32 -1.442695, %v5507_v38  ;;  %v6493_v35 = vpack.c.bf16 %v1117_v34, %v1113_v29  ;;  %v1120_v38 = vld [vmem:[%s7915_s4 + $0x48] sm:$0xff] }
 0x203   :  { %5651 = vpow2.f32 %v4285_v42  ;;  %v1124_v42 = vld [vmem:[%s7915_s4 + $0x68] sm:$0xff] }
 0x204   :  { %5653 = vpow2.f32 %v4286_v47  ;;  %v1122_v47 = vld [vmem:[%s7915_s4 + $0x58] sm:$0xff]  ;;  %v6507_v50 = vpack.c.bf16 %v1124_v42, %v1120_v38 }
 0x205   :  { %5655 = vtanh.f32 %v5523_v54  ;;  %v1126_v54 = vld [vmem:[%s7915_s4 + $0x78] sm:$0xff] }
 0x206   :  { %5657 = vpow2.f32 %v4287_v26  ;;  %v1119_v26 = vld [vmem:[%s7915_s4 + $0x40] sm:$0xff] }
 0x20d   :  { %v5652_v27 = vpop.eup %5651 }
 0x20e   :  { %v844_v30 = vadd.f32 1.0, %v5652_v27  ;;  %v5654_v31 = vpop.eup %5653  ;;  %v1123_v27 = vld [vmem:[%s7915_s4 + $0x60] sm:$0xff] }
 0x20f   :  { %v845_v36 = vadd.f32 1.0, %v5654_v31  ;;  %v5656_v40 = vpop.eup %5655  ;;  %v6520_v31 = vpack.c.bf16 %v1123_v27, %v1119_v26  ;;  %v1381_v26 = vld [vmem:[%s7915_s4 + $0xd8] sm:$0xff] }
 0x210   :  { %5659 = vrcp.f32 %v844_v30  ;;  %v5658_v44 = vpop.eup %5657  ;;  %v6518_v30 = vpack.c.bf16 %v1126_v54, %v1122_v47  ;;  %v1383_v54 = vld [vmem:[%s7915_s4 + $0xe8] sm:$0xff] }
 0x211   :  { %5661 = vrcp.f32 %v845_v36  ;;  %v846_v51 = vadd.f32 1.0, %v5658_v44  ;;  %v1121_v36 = vld [vmem:[%s7915_s4 + $0x50] sm:$0xff] }
 0x213   :  { %5663 = vrcp.f32 %v846_v51 }
 0x21a   :  { %v5660_v45 = vpop.eup %5659 }
 0x21b   :  { %v855_v48 = vmul.f32 %v5660_v45, %v5656_v40  ;;  %v5662_v49 = vpop.eup %5661  ;;  %v1125_v40 = vld [vmem:[%s7915_s4 + $0x70] sm:$0xff]  ;;  %v1128_v45 = vld [vmem:[%s7915_s4 + $0x88] sm:$0xff] }
 0x21c   :  { %v854_v53 = vmul.f32 %v5662_v49, %v6409_v13  ;;  %v1118_v13 = vld [vmem:[%s7915_s4 + $0x38] sm:$0xff]  ;;  %v6529_v44 = vpack.c.bf16 %v1125_v40, %v1121_v36  ;;  %v1378_v40 = vld [vmem:[%s7915_s4 + $0xc0] sm:$0xff] }
 0x21d   :  { %v5664_v57 = vpop.eup %5663  ;;  %v6482_v22 = vpack.c.bf16 %v1118_v13, %v1114_v7  ;;  %v1130_v49 = vld [vmem:[%s7915_s4 + $0x98] sm:$0xff]  ;;  %v1129_v7 = vld [vmem:[%s7915_s4 + $0x90] sm:$0xff] }
 0x21e   :  { %v6453_v55 = vadd.f32 %v855_v48, %v854_v53  ;;  %v1132_v48 = vld [vmem:[%s7915_s4 + $0xa8] sm:$0xff]  ;;  %v1134_v53 = vld [vmem:[%s7915_s4 + $0xb8] sm:$0xff]  ;;  %v1133_v13 = vld [vmem:[%s7915_s4 + $0xb0] sm:$0xff] }
 0x21f   :  { %4617 = vmatprep.subr.bf16.mxu1 %v6482_v22  ;;  %v6543_v51 = vpack.c.bf16 %v1132_v48, %v1128_v45  ;;  %v6554_v63 = vpack.c.bf16 %v1134_v53, %v1130_v49  ;;  %v6565_v21 = vpack.c.bf16 %v1133_v13, %v1129_v7  ;;  %v1385_v36 = vld [vmem:[%s7915_s4 + $0xf8] sm:$0xff]  ;;  %v1382_v45 = vld [vmem:[%s7915_s4 + $0xe0] sm:$0xff]  ;;  %v1380_v53 = vld [vmem:[%s7915_s4 + $0xd0] sm:$0xff] }
 0x220   :  { %5665 = vtanh.f32 %v6453_v55  ;;  %v6636_v48 = vpack.c.bf16 %v1385_v36, %v1381_v26  ;;  %v6638_v49 = vpack.c.bf16 %v1382_v45, %v1378_v40  ;;  %v1387_v7 = vld [vmem:[%s7915_s4 + $0x108] sm:$0xff]  ;;  %v1402_v40 = vld [vmem:[%s7915_s4 + $0x180] sm:$0xff] }
 0x221   :  { %v1391_v13 = vld [vmem:[%s7915_s4 + $0x128] sm:$0xff]  ;;  %v1406_v45 = vld [vmem:[%s7915_s4 + $0x1a0] sm:$0xff] }
 0x22a   :  { %v5666_v59 = vpop.eup %5665 }
 0x22b   :  { %v6456_v62 = vmul.f32 %v5666_v59, %v5664_v57  ;;  %v1127_v57 = vld [vmem:[%s7915_s4 + $0x80] sm:$0xff] }
 0x22c   :  { %v1131_v59 = vld [vmem:[%s7915_s4 + $0xa0] sm:$0xff] }
 0x22d   :  { %997 = vmatmul.mubr.f32.vlgmr.msra.gmra.mrb[4].mxu0 %v6456_v62  ;;  %1068 = vmatmul.mubr.f32.vlgmr.msra.gmra.mrb[4].mxu1 %v6456_v62  ;;  %v6556_v2 = vpack.c.bf16 %v1131_v59, %v1127_v57  ;;  %v1384_v57 = vld [vmem:[%s7915_s4 + $0xf0] sm:$0xff] }
 0x22e   :  { %1239 = vmatprep.mubr.f32.mxu0 %v5895_v3  ;;  %1310 = vmatprep.mubr.f32.mxu1 %v5895_v3  ;;  %v6647_v59 = vpack.c.bf16 %v1384_v57, %v1380_v53  ;;  %v1404_v53 = vld [vmem:[%s7915_s4 + $0x190] sm:$0xff]  ;;  %v6749_v57 = vpack.c.bf16 %v1406_v45, %v1402_v40 }
 0x22f   :  { %4587 = vmatpush1.bf16.msra.mxu0 %v6484_v25  ;;  %4619 = vmatpush1.bf16.msra.mxu1 %v6493_v35 }
 0x230   :  { %4589 = vmatprep.subr.bf16.mxu0 %v6507_v50  ;;  %4621 = vmatprep.subr.bf16.mxu1 %v6518_v30 }
 0x233   :  { %4591 = vmatpush1.bf16.msra.mxu0 %v6520_v31  ;;  %4623 = vmatpush1.bf16.msra.mxu1 %v6529_v44 }
 0x234   :  { %4593 = vmatprep.subr.bf16.mxu0 %v6543_v51  ;;  %4625 = vmatprep.subr.bf16.mxu1 %v6554_v63 }
 0x237   :  { %4595 = vmatpush1.bf16.msra.mxu0 %v6556_v2  ;;  %4627 = vmatpush1.bf16.msra.mxu1 %v6565_v21 }
 0x238   :  { %4597 = vmatprep.subr.bf16.mxu0 %v6134_v58  ;;  %4629 = vmatprep.subr.bf16.mxu1 %v6144_v61 }
 0x23b   :  { %4599 = vmatpush1.bf16.msra.mxu0 %v6157_v1  ;;  %4631 = vmatpush1.bf16.msra.mxu1 %v6167_v5 }
 0x23c   :  { %4601 = vmatprep.subr.bf16.mxu0 %v6177_v8  ;;  %4633 = vmatprep.subr.bf16.mxu1 %v6187_v11 }
 0x23f   :  { %4603 = vmatpush1.bf16.msra.mxu0 %v6200_v15  ;;  %4635 = vmatpush1.bf16.msra.mxu1 %v6210_v19 }
 0x240   :  { %4605 = vmatprep.subr.bf16.mxu0 %v6220_v24  ;;  %4637 = vmatprep.subr.bf16.mxu1 %v6230_v28 }
 0x243   :  { %4607 = vmatpush1.bf16.msra.mxu0 %v6243_v33  ;;  %4639 = vmatpush1.bf16.msra.mxu1 %v6253_v39 }
 0x244   :  { %4609 = vmatprep.subr.bf16.mxu0 %v6263_v43  ;;  %4641 = vmatprep.subr.bf16.mxu1 %v6273_v46 }
 0x247   :  { %4611 = vmatpush1.bf16.msra.mxu0 %v6286_v52  ;;  %4643 = vmatpush1.bf16.msra.mxu1 %v6296_v56 }
 0x248   :  { %4613 = vmatprep.subr.bf16.mxu0 %v6306_v60  ;;  %4645 = vmatprep.subr.bf16.mxu1 %v6316_v0 }
 0x24b   :  { %4615 = vmatpush1.bf16.msra.mxu0 %v6323_v4  ;;  %4647 = vmatpush1.bf16.msra.mxu1 %v6327_v6 }
 0x24c   :  { %4649 = vmatprep.subr.bf16.mxu0 %v6471_v9  ;;  %4681 = vmatprep.subr.bf16.mxu1 %v6482_v22 }
 0x300   :  { %v998_v58 = vpop.f32.mrb[4].mxu0  ;;  %v1069_v61 = vpop.f32.mrb[4].mxu1 }
 0x301   :  { %v5508_v1 = vadd.f32 %v998_v58, %v6386_v16  ;;  %v1000_v5 = vpop.f32.mrb[5].mxu0  ;;  %v1071_v8 = vpop.f32.mrb[5].mxu1  ;;  %v5524_v24 = vadd.f32 %v1069_v61, %v6397_v32  ;;  %v1389_v58 = vld [vmem:[%s7915_s4 + $0x118] sm:$0xff]  ;;  %v6661_v61 = vpack.c.bf16 %v1391_v13, %v1387_v7  ;;  %v1408_v7 = vld [vmem:[%s7915_s4 + $0x1b0] sm:$0xff]  ;;  %v1411_v13 = vld [vmem:[%s7915_s4 + $0x1c8] sm:$0xff] }
 0x302   :  { %v5509_v11 = vadd.f32 %v1000_v5, %v6390_v17  ;;  %v5525_v28 = vadd.f32 %v1071_v8, %v6403_v41  ;;  %v1386_v5 = vld [vmem:[%s7915_s4 + $0x100] sm:$0xff] }
 0x303   :  { %v4288_v15 = vmul.f32 -1.442695, %v5508_v1  ;;  %v4290_v33 = vmul.f32 -1.442695, %v5524_v24  ;;  %v1393_v1 = vld [vmem:[%s7915_s4 + $0x138] sm:$0xff]  ;;  %v1390_v8 = vld [vmem:[%s7915_s4 + $0x120] sm:$0xff] }
 0x304   :  { %v4289_v19 = vmul.f32 -1.442695, %v5509_v11  ;;  %v6672_v11 = vpack.c.bf16 %v1393_v1, %v1389_v58  ;;  %v1392_v24 = vld [vmem:[%s7915_s4 + $0x130] sm:$0xff]  ;;  %v1415_v58 = vld [vmem:[%s7915_s4 + $0x1e8] sm:$0xff]  ;;  %v6762_v1 = vpack.c.bf16 %v1408_v7, %v1404_v53 }
 0x305   :  { %5667 = vpow2.f32 %v4288_v15  ;;  %v6674_v15 = vpack.c.bf16 %v1390_v8, %v1386_v5  ;;  %v6764_v5 = vpack.c.bf16 %v1415_v58, %v1411_v13  ;;  %v1413_v8 = vld [vmem:[%s7915_s4 + $0x1d8] sm:$0xff] }
 0x306   :  { %5669 = vpow2.f32 %v4289_v19  ;;  %v1388_v19 = vld [vmem:[%s7915_s4 + $0x110] sm:$0xff] }
 0x307   :  { %5671 = vtanh.f32 %v5525_v28  ;;  %v6683_v28 = vpack.c.bf16 %v1392_v24, %v1388_v19  ;;  %v1417_v19 = vld [vmem:[%s7915_s4 + $0x1f8] sm:$0xff]  ;;  %v1410_v24 = vld [vmem:[%s7915_s4 + $0x1c0] sm:$0xff] }
 0x308   :  { %5673 = vpow2.f32 %v4290_v33  ;;  %v1395_v33 = vld [vmem:[%s7915_s4 + $0x148] sm:$0xff] }
 0x30f   :  { %v5668_v39 = vpop.eup %5667 }
 0x310   :  { %v1087_v43 = vadd.f32 1.0, %v5668_v39  ;;  %v5670_v46 = vpop.eup %5669  ;;  %v1399_v39 = vld [vmem:[%s7915_s4 + $0x168] sm:$0xff] }
 0x311   :  { %v1088_v52 = vadd.f32 1.0, %v5670_v46  ;;  %v5672_v56 = vpop.eup %5671  ;;  %v6697_v46 = vpack.c.bf16 %v1399_v39, %v1395_v33  ;;  %v6775_v33 = vpack.c.bf16 %v1417_v19, %v1413_v8  ;;  %v1414_v39 = vld [vmem:[%s7915_s4 + $0x1e0] sm:$0xff] }
 0x312   :  { %5675 = vrcp.f32 %v1087_v43  ;;  %v5674_v60 = vpop.eup %5673  ;;  %v1397_v43 = vld [vmem:[%s7915_s4 + $0x158] sm:$0xff] }
 0x313   :  { %5677 = vrcp.f32 %v1088_v52  ;;  %v1089_v20 = vadd.f32 1.0, %v5674_v60  ;;  %v1401_v52 = vld [vmem:[%s7915_s4 + $0x178] sm:$0xff]  ;;  %v1398_v60 = vld [vmem:[%s7915_s4 + $0x160] sm:$0xff] }
 0x315   :  { %5679 = vrcp.f32 %v1089_v20  ;;  %v1400_v20 = vld [vmem:[%s7915_s4 + $0x170] sm:$0xff] }
 0x31c   :  { %v5676_v0 = vpop.eup %5675 }
 0x31d   :  { %v1098_v4 = vmul.f32 %v5676_v0, %v5672_v56  ;;  %v5678_v6 = vpop.eup %5677  ;;  %v1394_v56 = vld [vmem:[%s7915_s4 + $0x140] sm:$0xff]  ;;  %v6708_v0 = vpack.c.bf16 %v1401_v52, %v1397_v43  ;;  %v1412_v43 = vld [vmem:[%s7915_s4 + $0x1d0] sm:$0xff] }
 0x31e   :  { %v1097_v29 = vmul.f32 %v5678_v6, %v6453_v55  ;;  %v1379_v55 = vld [vmem:[%s7915_s4 + $0xc8] sm:$0xff]  ;;  %v1396_v6 = vld [vmem:[%s7915_s4 + $0x150] sm:$0xff] }
 0x31f   :  { %v5680_v38 = vpop.eup %5679  ;;  %v6625_v27 = vpack.c.bf16 %v1383_v54, %v1379_v55  ;;  %v1405_v55 = vld [vmem:[%s7915_s4 + $0x198] sm:$0xff]  ;;  %v1416_v52 = vld [vmem:[%s7915_s4 + $0x1f0] sm:$0xff] }
 0x320   :  { %v6597_v34 = vadd.f32 %v1098_v4, %v1097_v29  ;;  %v6710_v4 = vpack.c.bf16 %v1398_v60, %v1394_v56  ;;  %v1403_v29 = vld [vmem:[%s7915_s4 + $0x188] sm:$0xff]  ;;  %v1409_v54 = vld [vmem:[%s7915_s4 + $0x1b8] sm:$0xff]  ;;  %v6787_v56 = vpack.c.bf16 %v1414_v39, %v1410_v24  ;;  %v6791_v60 = vpack.c.bf16 %v1416_v52, %v1412_v43 }
 0x321   :  { %v6737_v36 = vpack.c.bf16 %v1409_v54, %v1405_v55 }
 0x322   :  { %5681 = vtanh.f32 %v6597_v34 }
 0x32c   :  { %v5682_v42 = vpop.eup %5681 }
 0x32d   :  { %v6600_v47 = vmul.f32 %v5682_v42, %v5680_v38  ;;  %v6722_v38 = vpack.c.bf16 %v1400_v20, %v1396_v6  ;;  %v1407_v42 = vld [vmem:[%s7915_s4 + $0x1a8] sm:$0xff] }
 0x32e   :  { %v6735_v26 = vpack.c.bf16 %v1407_v42, %v1403_v29 }
 0x32f   :  { %1240 = vmatmul.mubr.f32.vlgmr.msra.gmra.mrb[6].mxu0 %v6600_v47  ;;  %1311 = vmatmul.mubr.f32.vlgmr.msra.gmra.mrb[6].mxu1 %v6600_v47 }
 0x330   :  { %4651 = vmatpush1.bf16.msra.mxu0 %v6484_v25  ;;  %4683 = vmatpush1.bf16.msra.mxu1 %v6493_v35 }
 0x331   :  { %4653 = vmatprep.subr.bf16.mxu0 %v6507_v50  ;;  %4685 = vmatprep.subr.bf16.mxu1 %v6518_v30 }
 0x332   :  { %1482 = vmatprep.mubr.f32.mxu0 %v5895_v3  ;;  %1553 = vmatprep.mubr.f32.mxu1 %v5895_v3 }
 0x334   :  { %4655 = vmatpush1.bf16.msra.mxu0 %v6520_v31  ;;  %4687 = vmatpush1.bf16.msra.mxu1 %v6529_v44 }
 0x335   :  { %4657 = vmatprep.subr.bf16.mxu0 %v6543_v51  ;;  %4689 = vmatprep.subr.bf16.mxu1 %v6554_v63 }
 0x338   :  { %4659 = vmatpush1.bf16.msra.mxu0 %v6556_v2  ;;  %4691 = vmatpush1.bf16.msra.mxu1 %v6565_v21 }
 0x339   :  { %4661 = vmatprep.subr.bf16.mxu0 %v6625_v27  ;;  %4693 = vmatprep.subr.bf16.mxu1 %v6636_v48 }
 0x33c   :  { %4663 = vmatpush1.bf16.msra.mxu0 %v6638_v49  ;;  %4695 = vmatpush1.bf16.msra.mxu1 %v6647_v59 }
 0x33d   :  { %4665 = vmatprep.subr.bf16.mxu0 %v6661_v61  ;;  %4697 = vmatprep.subr.bf16.mxu1 %v6672_v11 }
 0x340   :  { %4667 = vmatpush1.bf16.msra.mxu0 %v6674_v15  ;;  %4699 = vmatpush1.bf16.msra.mxu1 %v6683_v28 }
 0x341   :  { %4669 = vmatprep.subr.bf16.mxu0 %v6697_v46  ;;  %4701 = vmatprep.subr.bf16.mxu1 %v6708_v0 }
 0x344   :  { %4671 = vmatpush1.bf16.msra.mxu0 %v6710_v4  ;;  %4703 = vmatpush1.bf16.msra.mxu1 %v6722_v38 }
 0x345   :  { %4673 = vmatprep.subr.bf16.mxu0 %v6735_v26  ;;  %4705 = vmatprep.subr.bf16.mxu1 %v6737_v36 }
 0x348   :  { %4675 = vmatpush1.bf16.msra.mxu0 %v6749_v57  ;;  %4707 = vmatpush1.bf16.msra.mxu1 %v6762_v1 }
 0x349   :  { %4677 = vmatprep.subr.bf16.mxu0 %v6764_v5  ;;  %4709 = vmatprep.subr.bf16.mxu1 %v6775_v33 }
 0x34c   :  { %4679 = vmatpush1.bf16.msra.mxu0 %v6787_v56  ;;  %4711 = vmatpush1.bf16.msra.mxu1 %v6791_v60 }
 0x34d   :  { %4713 = vmatprep.subr.bf16.mxu0 %v6471_v9  ;;  %4745 = vmatprep.subr.bf16.mxu1 %v6482_v22 }
 0x402   :  { %v1241_v6 = vpop.f32.mrb[6].mxu0  ;;  %v1312_v20 = vpop.f32.mrb[6].mxu1 }
 0x403   :  { %v5510_v29 = vadd.f32 %v1241_v6, %v6386_v16  ;;  %v1243_v42 = vpop.f32.mrb[7].mxu0  ;;  %v1314_v55 = vpop.f32.mrb[7].mxu1  ;;  %v5526_v53 = vadd.f32 %v1312_v20, %v6397_v32 }
 0x404   :  { %v5511_v54 = vadd.f32 %v1243_v42, %v6390_v17  ;;  %v5527_v7 = vadd.f32 %v1314_v55, %v6403_v41 }
 0x405   :  { %v4291_v40 = vmul.f32 -1.442695, %v5510_v29  ;;  %v4293_v13 = vmul.f32 -1.442695, %v5526_v53 }
 0x406   :  { %v4292_v45 = vmul.f32 -1.442695, %v5511_v54 }
 0x407   :  { %5683 = vpow2.f32 %v4291_v40 }
 0x408   :  { %5685 = vpow2.f32 %v4292_v45 }
 0x409   :  { %5687 = vtanh.f32 %v5527_v7 }
 0x40a   :  { %5689 = vpow2.f32 %v4293_v13 }
 0x411   :  { %v5684_v58 = vpop.eup %5683 }
 0x412   :  { %v1330_v8 = vadd.f32 1.0, %v5684_v58  ;;  %v5686_v19 = vpop.eup %5685 }
 0x413   :  { %v1331_v24 = vadd.f32 1.0, %v5686_v19  ;;  %v5688_v39 = vpop.eup %5687 }
 0x414   :  { %5691 = vrcp.f32 %v1330_v8  ;;  %v5690_v43 = vpop.eup %5689 }
 0x415   :  { %5693 = vrcp.f32 %v1331_v24  ;;  %v1332_v42 = vadd.f32 1.0, %v5690_v43 }
 0x417   :  { %5695 = vrcp.f32 %v1332_v42 }
 0x41e   :  { %v5692_v52 = vpop.eup %5691 }
 0x41f   :  { %v1341_v6 = vmul.f32 %v5692_v52, %v5688_v39  ;;  %v5694_v29 = vpop.eup %5693 }
 0x420   :  { %v1340_v54 = vmul.f32 %v5694_v29, %v6597_v34 }
 0x421   :  { %v5696_v55 = vpop.eup %5695 }
 0x422   :  { %v6803_v20 = vadd.f32 %v1341_v6, %v1340_v54 }
 0x424   :  { %5697 = vtanh.f32 %v6803_v20 }
 0x42e   :  { %v5698_v40 = vpop.eup %5697 }
 0x42f   :  { %v6806_v45 = vmul.f32 %v5698_v40, %v5696_v55 }
 0x431   :  { %1483 = vmatmul.mubr.f32.vlgmr.msra.gmra.mrb[8].mxu0 %v6806_v45  ;;  %1554 = vmatmul.mubr.f32.vlgmr.msra.gmra.mrb[8].mxu1 %v6806_v45 }
 0x432   :  { %4715 = vmatpush1.bf16.msra.mxu0 %v6484_v25  ;;  %4747 = vmatpush1.bf16.msra.mxu1 %v6493_v35 }
 0x433   :  { %4717 = vmatprep.subr.bf16.mxu0 %v6507_v50  ;;  %4749 = vmatprep.subr.bf16.mxu1 %v6518_v30 }
 0x434   :  { %1725 = vmatprep.mubr.f32.mxu0 %v5895_v3  ;;  %1796 = vmatprep.mubr.f32.mxu1 %v5895_v3 }
 0x436   :  { %4719 = vmatpush1.bf16.msra.mxu0 %v6520_v31  ;;  %4751 = vmatpush1.bf16.msra.mxu1 %v6529_v44 }
 0x437   :  { %4721 = vmatprep.subr.bf16.mxu0 %v6543_v51  ;;  %4753 = vmatprep.subr.bf16.mxu1 %v6554_v63 }
 0x43a   :  { %4723 = vmatpush1.bf16.msra.mxu0 %v6556_v2  ;;  %4755 = vmatpush1.bf16.msra.mxu1 %v6565_v21 }
 0x43b   :  { %4725 = vmatprep.subr.bf16.mxu0 %v6625_v27  ;;  %4757 = vmatprep.subr.bf16.mxu1 %v6636_v48 }
 0x43e   :  { %4727 = vmatpush1.bf16.msra.mxu0 %v6638_v49  ;;  %4759 = vmatpush1.bf16.msra.mxu1 %v6647_v59 }
 0x43f   :  { %4729 = vmatprep.subr.bf16.mxu0 %v6661_v61  ;;  %4761 = vmatprep.subr.bf16.mxu1 %v6672_v11 }
 0x442   :  { %4731 = vmatpush1.bf16.msra.mxu0 %v6674_v15  ;;  %4763 = vmatpush1.bf16.msra.mxu1 %v6683_v28 }
 0x443   :  { %4733 = vmatprep.subr.bf16.mxu0 %v6697_v46  ;;  %4765 = vmatprep.subr.bf16.mxu1 %v6708_v0 }
 0x446   :  { %4735 = vmatpush1.bf16.msra.mxu0 %v6710_v4  ;;  %4767 = vmatpush1.bf16.msra.mxu1 %v6722_v38 }
 0x447   :  { %4737 = vmatprep.subr.bf16.mxu0 %v6735_v26  ;;  %4769 = vmatprep.subr.bf16.mxu1 %v6737_v36 }
 0x44a   :  { %4739 = vmatpush1.bf16.msra.mxu0 %v6749_v57  ;;  %4771 = vmatpush1.bf16.msra.mxu1 %v6762_v1 }
 0x44b   :  { %4741 = vmatprep.subr.bf16.mxu0 %v6764_v5  ;;  %4773 = vmatprep.subr.bf16.mxu1 %v6775_v33 }
 0x44e   :  { %4743 = vmatpush1.bf16.msra.mxu0 %v6787_v56  ;;  %4775 = vmatpush1.bf16.msra.mxu1 %v6791_v60 }
 0x44f   :  { %4777 = vmatprep.subr.bf16.mxu0 %v6471_v9  ;;  %4809 = vmatprep.subr.bf16.mxu1 %v6482_v22 }
 0x504   :  { %v1484_v34 = vpop.f32.mrb[8].mxu0  ;;  %v1555_v53 = vpop.f32.mrb[8].mxu1 }
 0x505   :  { %v5512_v7 = vadd.f32 %v1484_v34, %v6386_v16  ;;  %v1486_v13 = vpop.f32.mrb[9].mxu0  ;;  %v1557_v58 = vpop.f32.mrb[9].mxu1  ;;  %v5528_v39 = vadd.f32 %v1555_v53, %v6397_v32 }
 0x506   :  { %v5513_v8 = vadd.f32 %v1486_v13, %v6390_v17  ;;  %v5529_v43 = vadd.f32 %v1557_v58, %v6403_v41 }
 0x507   :  { %v4294_v19 = vmul.f32 -1.442695, %v5512_v7  ;;  %v4296_v52 = vmul.f32 -1.442695, %v5528_v39 }
 0x508   :  { %v4295_v24 = vmul.f32 -1.442695, %v5513_v8 }
 0x509   :  { %5699 = vpow2.f32 %v4294_v19 }
 0x50a   :  { %5701 = vpow2.f32 %v4295_v24 }
 0x50b   :  { %5703 = vtanh.f32 %v5529_v43 }
 0x50c   :  { %5705 = vpow2.f32 %v4296_v52 }
 0x513   :  { %v5700_v9 = vpop.eup %5699 }
 0x514   :  { %v1573_v6 = vadd.f32 1.0, %v5700_v9  ;;  %v5702_v22 = vpop.eup %5701 }
 0x515   :  { %v1574_v29 = vadd.f32 1.0, %v5702_v22  ;;  %v5704_v42 = vpop.eup %5703 }
 0x516   :  { %5707 = vrcp.f32 %v1573_v6  ;;  %v5706_v54 = vpop.eup %5705 }
 0x517   :  { %5709 = vrcp.f32 %v1574_v29  ;;  %v1575_v7 = vadd.f32 1.0, %v5706_v54 }
 0x519   :  { %5711 = vrcp.f32 %v1575_v7 }
 0x520   :  { %v5708_v55 = vpop.eup %5707 }
 0x521   :  { %v1584_v40 = vmul.f32 %v5708_v55, %v5704_v42  ;;  %v5710_v34 = vpop.eup %5709 }
 0x522   :  { %v1583_v13 = vmul.f32 %v5710_v34, %v6803_v20 }
 0x523   :  { %v5712_v58 = vpop.eup %5711 }
 0x524   :  { %v6849_v53 = vadd.f32 %v1584_v40, %v1583_v13 }
 0x526   :  { %5713 = vtanh.f32 %v6849_v53 }
 0x530   :  { %v5714_v8 = vpop.eup %5713 }
 0x531   :  { %v6852_v19 = vmul.f32 %v5714_v8, %v5712_v58  ;;  %v2088_v58 = vld [vmem:[%s7915_s4 + $0x28] sm:$0xff]  ;;  %v2086_v8 = vld [vmem:[%s7915_s4 + $0x18] sm:$0xff] }
 0x533   :  { %1726 = vmatmul.mubr.f32.vlgmr.msra.gmra.mrb[10].mxu0 %v6852_v19  ;;  %1797 = vmatmul.mubr.f32.vlgmr.msra.gmra.mrb[10].mxu1 %v6852_v19 }
 0x534   :  { %4779 = vmatpush1.bf16.msra.mxu0 %v6484_v25  ;;  %4811 = vmatpush1.bf16.msra.mxu1 %v6493_v35 }
 0x535   :  { %4781 = vmatprep.subr.bf16.mxu0 %v6507_v50  ;;  %4813 = vmatprep.subr.bf16.mxu1 %v6518_v30 }
 0x536   :  { %1968 = vmatprep.mubr.f32.mxu0 %v5895_v3  ;;  %2039 = vmatprep.mubr.f32.mxu1 %v5895_v3 }
 0x538   :  { %4783 = vmatpush1.bf16.msra.mxu0 %v6520_v31  ;;  %4815 = vmatpush1.bf16.msra.mxu1 %v6529_v44 }
 0x539   :  { %4785 = vmatprep.subr.bf16.mxu0 %v6543_v51  ;;  %4817 = vmatprep.subr.bf16.mxu1 %v6554_v63 }
 0x53c   :  { %4787 = vmatpush1.bf16.msra.mxu0 %v6556_v2  ;;  %4819 = vmatpush1.bf16.msra.mxu1 %v6565_v21 }
 0x53d   :  { %4789 = vmatprep.subr.bf16.mxu0 %v6625_v27  ;;  %4821 = vmatprep.subr.bf16.mxu1 %v6636_v48 }
 0x540   :  { %4791 = vmatpush1.bf16.msra.mxu0 %v6638_v49  ;;  %4823 = vmatpush1.bf16.msra.mxu1 %v6647_v59 }
 0x541   :  { %4793 = vmatprep.subr.bf16.mxu0 %v6661_v61  ;;  %4825 = vmatprep.subr.bf16.mxu1 %v6672_v11 }
 0x544   :  { %4795 = vmatpush1.bf16.msra.mxu0 %v6674_v15  ;;  %4827 = vmatpush1.bf16.msra.mxu1 %v6683_v28 }
 0x545   :  { %4797 = vmatprep.subr.bf16.mxu0 %v6697_v46  ;;  %4829 = vmatprep.subr.bf16.mxu1 %v6708_v0 }
 0x548   :  { %4799 = vmatpush1.bf16.msra.mxu0 %v6710_v4  ;;  %4831 = vmatpush1.bf16.msra.mxu1 %v6722_v38 }
 0x549   :  { %4801 = vmatprep.subr.bf16.mxu0 %v6735_v26  ;;  %4833 = vmatprep.subr.bf16.mxu1 %v6737_v36 }
 0x54c   :  { %4803 = vmatpush1.bf16.msra.mxu0 %v6749_v57  ;;  %4835 = vmatpush1.bf16.msra.mxu1 %v6762_v1 }
 0x54d   :  { %4805 = vmatprep.subr.bf16.mxu0 %v6764_v5  ;;  %4837 = vmatprep.subr.bf16.mxu1 %v6775_v33 }
 0x550   :  { %4807 = vmatpush1.bf16.msra.mxu0 %v6787_v56  ;;  %4839 = vmatpush1.bf16.msra.mxu1 %v6791_v60 }
 0x606   :  { %v1727_v25 = vpop.f32.mrb[10].mxu0  ;;  %v1798_v35 = vpop.f32.mrb[10].mxu1 }
 0x607   :  { %v5514_v50 = vadd.f32 %v1727_v25, %v6386_v16  ;;  %v1729_v30 = vpop.f32.mrb[11].mxu0  ;;  %v1800_v31 = vpop.f32.mrb[11].mxu1  ;;  %v5530_v2 = vadd.f32 %v1798_v35, %v6397_v32  ;;  %v2090_v35 = vld [vmem:[%s7915_s4 + $0x38] sm:$0xff] }
 0x608   :  { %v5515_v44 = vadd.f32 %v1729_v30, %v6390_v17  ;;  %v5531_v21 = vadd.f32 %v1800_v31, %v6403_v41  ;;  %v2087_v30 = vld [vmem:[%s7915_s4 + $0x20] sm:$0xff]  ;;  %v4872_v31 = vpack.c.bf16 %v2090_v35, %v2086_v8 }
 0x609   :  { %v4297_v51 = vmul.f32 -1.442695, %v5514_v50  ;;  %v4299_v20 = vmul.f32 -1.442695, %v5530_v2  ;;  %v2083_v50 = vld [vmem:[%s7915_s4] sm:$0xff] }
 0x60a   :  { %v4298_v63 = vmul.f32 -1.442695, %v5515_v44  ;;  %v4842_v44 = vpack.c.bf16 %v2087_v30, %v2083_v50  ;;  %4873 = vmatprep.subr.bf16.mxu1 %v4872_v31  ;;  %v2099_v8 = vld [vmem:[%s7915_s4 + $0x80] sm:$0xff]  ;;  %v2101_v30 = vld [vmem:[%s7915_s4 + $0x90] sm:$0xff] }
 0x60b   :  { %5715 = vpow2.f32 %v4297_v51  ;;  %v2085_v51 = vld [vmem:[%s7915_s4 + $0x10] sm:$0xff] }
 0x60c   :  { %5717 = vpow2.f32 %v4298_v63  ;;  %v2089_v63 = vld [vmem:[%s7915_s4 + $0x30] sm:$0xff] }
 0x60d   :  { %5719 = vtanh.f32 %v5531_v21  ;;  %v4874_v2 = vpack.c.bf16 %v2089_v63, %v2085_v51  ;;  %v2092_v21 = vld [vmem:[%s7915_s4 + $0x48] sm:$0xff]  ;;  %v2105_v31 = vld [vmem:[%s7915_s4 + $0xb0] sm:$0xff] }
 0x60e   :  { %5721 = vpow2.f32 %v4299_v20  ;;  %v2096_v20 = vld [vmem:[%s7915_s4 + $0x68] sm:$0xff] }
 0x615   :  { %v5716_v24 = vpop.eup %5715 }
 0x616   :  { %v1816_v39 = vadd.f32 1.0, %v5716_v24  ;;  %v5718_v43 = vpop.eup %5717  ;;  %v2094_v24 = vld [vmem:[%s7915_s4 + $0x58] sm:$0xff] }
 0x617   :  { %v1817_v52 = vadd.f32 1.0, %v5718_v43  ;;  %v5720_v9 = vpop.eup %5719  ;;  %v2098_v43 = vld [vmem:[%s7915_s4 + $0x78] sm:$0xff] }
 0x618   :  { %5723 = vrcp.f32 %v1816_v39  ;;  %v5722_v6 = vpop.eup %5721  ;;  %v4844_v39 = vpack.c.bf16 %v2096_v20, %v2092_v21 }
 0x619   :  { %5725 = vrcp.f32 %v1817_v52  ;;  %v1818_v54 = vadd.f32 1.0, %v5722_v6  ;;  %v2091_v52 = vld [vmem:[%s7915_s4 + $0x40] sm:$0xff]  ;;  %v4876_v6 = vpack.c.bf16 %v2098_v43, %v2094_v24 }
 0x61b   :  { %5727 = vrcp.f32 %v1818_v54 }
 0x622   :  { %v5724_v22 = vpop.eup %5723 }
 0x623   :  { %v1827_v29 = vmul.f32 %v5724_v22, %v5720_v9  ;;  %v5726_v42 = vpop.eup %5725  ;;  %v2095_v9 = vld [vmem:[%s7915_s4 + $0x60] sm:$0xff] }
 0x624   :  { %v1826_v55 = vmul.f32 %v5726_v42, %v6849_v53  ;;  %v2084_v53 = vld [vmem:[%s7915_s4 + $0x8] sm:$0xff]  ;;  %v4846_v22 = vpack.c.bf16 %v2095_v9, %v2091_v52  ;;  %v2097_v42 = vld [vmem:[%s7915_s4 + $0x70] sm:$0xff]  ;;  %v2329_v9 = vld [vmem:[%s7919_s6] sm:$0xff] }
 0x625   :  { %v5728_v34 = vpop.eup %5727  ;;  %v4840_v25 = vpack.c.bf16 %v2088_v58, %v2084_v53  ;;  %v2106_v58 = vld [vmem:[%s7915_s4 + $0xb8] sm:$0xff] }
 0x626   :  { %v6893_v40 = vadd.f32 %v1827_v29, %v1826_v55  ;;  %v2093_v29 = vld [vmem:[%s7915_s4 + $0x50] sm:$0xff]  ;;  %v2100_v55 = vld [vmem:[%s7915_s4 + $0x88] sm:$0xff] }
 0x627   :  { %4841 = vmatprep.subr.bf16.mxu0 %v4840_v25  ;;  %v4878_v54 = vpack.c.bf16 %v2097_v42, %v2093_v29  ;;  %v2103_v25 = vld [vmem:[%s7915_s4 + $0xa0] sm:$0xff]  ;;  %v2338_v29 = vld [vmem:[%s7919_s6 + $0x48] sm:$0xff] }
 0x628   :  { %5729 = vtanh.f32 %v6893_v40  ;;  %v4850_v50 = vpack.c.bf16 %v2103_v25, %v2099_v8  ;;  %v2342_v42 = vld [vmem:[%s7919_s6 + $0x68] sm:$0xff]  ;;  %v2337_v8 = vld [vmem:[%s7919_s6 + $0x40] sm:$0xff] }
 0x629   :  { %v2341_v25 = vld [vmem:[%s7919_s6 + $0x60] sm:$0xff] }
 0x632   :  { %v5730_v7 = vpop.eup %5729 }
 0x633   :  { %v6896_v13 = vmul.f32 %v5730_v7, %v5728_v34  ;;  %v2104_v34 = vld [vmem:[%s7915_s4 + $0xa8] sm:$0xff]  ;;  %v2102_v7 = vld [vmem:[%s7915_s4 + $0x98] sm:$0xff] }
 0x634   :  { %v4848_v53 = vpack.c.bf16 %v2104_v34, %v2100_v55  ;;  %v4880_v35 = vpack.c.bf16 %v2106_v58, %v2102_v7  ;;  %v2344_v55 = vld [vmem:[%s7919_s6 + $0x78] sm:$0xff] }
 0x635   :  { %1969 = vmatmul.mubr.f32.vlgmr.msra.gmra.mrb[12].mxu0 %v6896_v13  ;;  %2040 = vmatmul.mubr.f32.vlgmr.msra.gmra.mrb[12].mxu1 %v6896_v13 }
 0x636   :  { %2211 = vmatprep.mubr.f32.mxu0 %v5895_v3  ;;  %2282 = vmatprep.mubr.f32.mxu1 %v5895_v3 }
 0x637   :  { %4843 = vmatpush1.bf16.msra.mxu0 %v4842_v44  ;;  %4875 = vmatpush1.bf16.msra.mxu1 %v4874_v2  ;;  %v4882_v44 = vpack.c.bf16 %v2105_v31, %v2101_v30  ;;  %v2339_v31 = vld [vmem:[%s7919_s6 + $0x50] sm:$0xff] }
 0x638   :  { %4845 = vmatprep.subr.bf16.mxu0 %v4844_v39  ;;  %4877 = vmatprep.subr.bf16.mxu1 %v4876_v6  ;;  %v2333_v6 = vld [vmem:[%s7919_s6 + $0x20] sm:$0xff] }
 0x63b   :  { %4847 = vmatpush1.bf16.msra.mxu0 %v4846_v22  ;;  %4879 = vmatpush1.bf16.msra.mxu1 %v4878_v54  ;;  %v2331_v22 = vld [vmem:[%s7919_s6 + $0x10] sm:$0xff]  ;;  %v2340_v54 = vld [vmem:[%s7919_s6 + $0x58] sm:$0xff] }
 0x63c   :  { %4849 = vmatprep.subr.bf16.mxu0 %v4848_v53  ;;  %4881 = vmatprep.subr.bf16.mxu1 %v4880_v35  ;;  %v4906_v53 = vpack.c.bf16 %v2333_v6, %v2329_v9  ;;  %v4940_v30 = vpack.c.bf16 %v2344_v55, %v2340_v54  ;;  %v2363_v54 = vld [vmem:[%s7919_s6 + $0x110] sm:$0xff] }
 0x63d   :  { %v2367_v55 = vld [vmem:[%s7919_s6 + $0x130] sm:$0xff] }
 0x63f   :  { %4851 = vmatpush1.bf16.msra.mxu0 %v4850_v50  ;;  %4883 = vmatpush1.bf16.msra.mxu1 %v4882_v44  ;;  %v4908_v50 = vpack.c.bf16 %v2342_v42, %v2338_v29  ;;  %v2343_v44 = vld [vmem:[%s7919_s6 + $0x70] sm:$0xff] }
 0x640   :  { %4853 = vmatprep.subr.bf16.mxu0 %v6625_v27  ;;  %4885 = vmatprep.subr.bf16.mxu1 %v6636_v48  ;;  %v2330_v27 = vld [vmem:[%s7919_s6 + $0x8] sm:$0xff] }
 0x641   :  { %v2334_v48 = vld [vmem:[%s7919_s6 + $0x28] sm:$0xff] }
 0x643   :  { %4855 = vmatpush1.bf16.msra.mxu0 %v6638_v49  ;;  %4887 = vmatpush1.bf16.msra.mxu1 %v6647_v59  ;;  %v2332_v49 = vld [vmem:[%s7919_s6 + $0x18] sm:$0xff] }
 0x644   :  { %4857 = vmatprep.subr.bf16.mxu0 %v6661_v61  ;;  %4889 = vmatprep.subr.bf16.mxu1 %v6672_v11  ;;  %v2336_v59 = vld [vmem:[%s7919_s6 + $0x38] sm:$0xff]  ;;  %v4904_v61 = vpack.c.bf16 %v2334_v48, %v2330_v27  ;;  %v2346_v27 = vld [vmem:[%s7919_s6 + $0x88] sm:$0xff] }
 0x645   :  { %v4936_v11 = vpack.c.bf16 %v2336_v59, %v2332_v49  ;;  %v2350_v48 = vld [vmem:[%s7919_s6 + $0xa8] sm:$0xff]  ;;  %v2348_v49 = vld [vmem:[%s7919_s6 + $0x98] sm:$0xff] }
 0x646   :  { %v2352_v59 = vld [vmem:[%s7919_s6 + $0xb8] sm:$0xff] }
 0x647   :  { %4859 = vmatpush1.bf16.msra.mxu0 %v6674_v15  ;;  %4891 = vmatpush1.bf16.msra.mxu1 %v6683_v28 }
 0x648   :  { %4861 = vmatprep.subr.bf16.mxu0 %v6697_v46  ;;  %4893 = vmatprep.subr.bf16.mxu1 %v6708_v0 }
 0x64b   :  { %4863 = vmatpush1.bf16.msra.mxu0 %v6710_v4  ;;  %4895 = vmatpush1.bf16.msra.mxu1 %v6722_v38 }
 0x64c   :  { %4865 = vmatprep.subr.bf16.mxu0 %v6735_v26  ;;  %4897 = vmatprep.subr.bf16.mxu1 %v6737_v36 }
 0x64f   :  { %4867 = vmatpush1.bf16.msra.mxu0 %v6749_v57  ;;  %4899 = vmatpush1.bf16.msra.mxu1 %v6762_v1 }
 0x650   :  { %4869 = vmatprep.subr.bf16.mxu0 %v6764_v5  ;;  %4901 = vmatprep.subr.bf16.mxu1 %v6775_v33 }
 0x653   :  { %4871 = vmatpush1.bf16.msra.mxu0 %v6787_v56  ;;  %4903 = vmatpush1.bf16.msra.mxu1 %v6791_v60 }
 0x654   :  { %4905 = vmatprep.subr.bf16.mxu0 %v4904_v61  ;;  %4937 = vmatprep.subr.bf16.mxu1 %v4936_v11  ;;  %v4910_v61 = vpack.c.bf16 %v2341_v25, %v2337_v8  ;;  %v4942_v11 = vpack.c.bf16 %v2343_v44, %v2339_v31  ;;  %v4954_v25 = vpack.c.bf16 %v2367_v55, %v2363_v54  ;;  %v2694_v54 = vld [vmem:[%s7920_s7 + $0x68] sm:$0xff]  ;;  %v2692_v55 = vld [vmem:[%s7920_s7 + $0x58] sm:$0xff] }
 0x708   :  { %v1970_v15 = vpop.f32.mrb[12].mxu0  ;;  %v2041_v28 = vpop.f32.mrb[12].mxu1 }
 0x709   :  { %v5516_v46 = vadd.f32 %v1970_v15, %v6386_v16  ;;  %v1972_v0 = vpop.f32.mrb[13].mxu0  ;;  %v2043_v4 = vpop.f32.mrb[13].mxu1  ;;  %v5532_v57 = vadd.f32 %v2041_v28, %v6397_v32  ;;  %v2345_v15 = vld [vmem:[%s7919_s6 + $0x80] sm:$0xff] }
 0x70a   :  { %v5517_v38 = vadd.f32 %v1972_v0, %v6390_v17  ;;  %v5533_v1 = vadd.f32 %v2043_v4, %v6403_v41  ;;  %v2349_v28 = vld [vmem:[%s7919_s6 + $0xa0] sm:$0xff]  ;;  %v4944_v0 = vpack.c.bf16 %v2352_v59, %v2348_v49  ;;  %v2347_v4 = vld [vmem:[%s7919_s6 + $0x90] sm:$0xff]  ;;  %v2378_v49 = vld [vmem:[%s7919_s6 + $0x188] sm:$0xff] }
 0x70b   :  { %v4300_v26 = vmul.f32 -1.442695, %v5516_v46  ;;  %v4302_v5 = vmul.f32 -1.442695, %v5532_v57  ;;  %v4912_v46 = vpack.c.bf16 %v2350_v48, %v2346_v27  ;;  %v2356_v57 = vld [vmem:[%s7919_s6 + $0xd8] sm:$0xff]  ;;  %v2371_v27 = vld [vmem:[%s7919_s6 + $0x150] sm:$0xff] }
 0x70c   :  { %v4301_v36 = vmul.f32 -1.442695, %v5517_v38  ;;  %v2351_v38 = vld [vmem:[%s7919_s6 + $0xb0] sm:$0xff]  ;;  %v2382_v59 = vld [vmem:[%s7919_s6 + $0x1a8] sm:$0xff] }
 0x70d   :  { %5731 = vpow2.f32 %v4300_v26  ;;  %v2354_v26 = vld [vmem:[%s7919_s6 + $0xc8] sm:$0xff]  ;;  %v2375_v48 = vld [vmem:[%s7919_s6 + $0x170] sm:$0xff] }
 0x70e   :  { %5733 = vpow2.f32 %v4301_v36  ;;  %v2358_v36 = vld [vmem:[%s7919_s6 + $0xe8] sm:$0xff] }
 0x70f   :  { %5735 = vtanh.f32 %v5533_v1  ;;  %v2360_v1 = vld [vmem:[%s7919_s6 + $0xf8] sm:$0xff] }
 0x710   :  { %5737 = vpow2.f32 %v4302_v5  ;;  %v4914_v5 = vpack.c.bf16 %v2349_v28, %v2345_v15  ;;  %v4958_v28 = vpack.c.bf16 %v2375_v48, %v2371_v27  ;;  %v2702_v27 = vld [vmem:[%s7920_s7 + $0xa8] sm:$0xff]  ;;  %v2700_v48 = vld [vmem:[%s7920_s7 + $0x98] sm:$0xff] }
 0x717   :  { %v5732_v33 = vpop.eup %5731 }
 0x718   :  { %v2059_v56 = vadd.f32 1.0, %v5732_v33  ;;  %v5734_v60 = vpop.eup %5733  ;;  %v4946_v33 = vpack.c.bf16 %v2351_v38, %v2347_v4  ;;  %v4928_v4 = vpack.c.bf16 %v2382_v59, %v2378_v49  ;;  %v2704_v59 = vld [vmem:[%s7920_s7 + $0xb8] sm:$0xff] }
 0x719   :  { %v2060_v51 = vadd.f32 1.0, %v5734_v60  ;;  %v5736_v63 = vpop.eup %5735  ;;  %v2357_v60 = vld [vmem:[%s7919_s6 + $0xe0] sm:$0xff] }
 0x71a   :  { %5739 = vrcp.f32 %v2059_v56  ;;  %v5738_v2 = vpop.eup %5737  ;;  %v2353_v56 = vld [vmem:[%s7919_s6 + $0xc0] sm:$0xff] }
 0x71b   :  { %5741 = vrcp.f32 %v2060_v51  ;;  %v2061_v39 = vadd.f32 1.0, %v5738_v2  ;;  %v4916_v51 = vpack.c.bf16 %v2358_v36, %v2354_v26  ;;  %v2355_v2 = vld [vmem:[%s7919_s6 + $0xd0] sm:$0xff]  ;;  %v4918_v9 = vpack.c.bf16 %v2357_v60, %v2353_v56 }
 0x71c   :  { %v2379_v26 = vld [vmem:[%s7919_s6 + $0x190] sm:$0xff] }
 0x71d   :  { %5743 = vrcp.f32 %v2061_v39  ;;  %v2364_v39 = vld [vmem:[%s7919_s6 + $0x118] sm:$0xff]  ;;  %v2383_v36 = vld [vmem:[%s7919_s6 + $0x1b0] sm:$0xff] }
 0x71e   :  { %v4962_v60 = vpack.c.bf16 %v2383_v36, %v2379_v26  ;;  %v2710_v26 = vld [vmem:[%s7920_s7 + $0xe8] sm:$0xff]  ;;  %v2708_v36 = vld [vmem:[%s7920_s7 + $0xd8] sm:$0xff] }
 0x724   :  { %v5740_v21 = vpop.eup %5739 }
 0x725   :  { %v2070_v20 = vmul.f32 %v5740_v21, %v5736_v63  ;;  %v5742_v24 = vpop.eup %5741  ;;  %v4948_v63 = vpack.c.bf16 %v2360_v1, %v2356_v57  ;;  %v2359_v21 = vld [vmem:[%s7919_s6 + $0xf0] sm:$0xff]  ;;  %v2386_v57 = vld [vmem:[%s7919_s6 + $0x1c8] sm:$0xff] }
 0x726   :  { %v2069_v43 = vmul.f32 %v5742_v24, %v6893_v40  ;;  %v2335_v40 = vld [vmem:[%s7919_s6 + $0x30] sm:$0xff]  ;;  %v2366_v24 = vld [vmem:[%s7919_s6 + $0x128] sm:$0xff]  ;;  %v4950_v6 = vpack.c.bf16 %v2359_v21, %v2355_v2  ;;  %v2389_v21 = vld [vmem:[%s7919_s6 + $0x1e0] sm:$0xff] }
 0x727   :  { %v5744_v34 = vpop.eup %5743  ;;  %v4938_v58 = vpack.c.bf16 %v2335_v40, %v2331_v22  ;;  %v2361_v22 = vld [vmem:[%s7919_s6 + $0x100] sm:$0xff]  ;;  %v2390_v1 = vld [vmem:[%s7919_s6 + $0x1e8] sm:$0xff] }
 0x728   :  { %v7011_v52 = vadd.f32 %v2070_v20, %v2069_v43  ;;  %v2362_v20 = vld [vmem:[%s7919_s6 + $0x108] sm:$0xff]  ;;  %v2368_v43 = vld [vmem:[%s7919_s6 + $0x138] sm:$0xff]  ;;  %v2365_v40 = vld [vmem:[%s7919_s6 + $0x120] sm:$0xff] }
 0x729   :  { %v4920_v29 = vpack.c.bf16 %v2366_v24, %v2362_v20  ;;  %v4952_v42 = vpack.c.bf16 %v2368_v43, %v2364_v39  ;;  %v4922_v8 = vpack.c.bf16 %v2365_v40, %v2361_v22  ;;  %v2387_v20 = vld [vmem:[%s7919_s6 + $0x1d0] sm:$0xff] }
 0x72a   :  { %5745 = vtanh.f32 %v7011_v52  ;;  %v2391_v24 = vld [vmem:[%s7919_s6 + $0x1f0] sm:$0xff] }
 0x72b   :  { %v4966_v43 = vpack.c.bf16 %v2391_v24, %v2387_v20  ;;  %v2683_v22 = vld [vmem:[%s7920_s7 + $0x10] sm:$0xff]  ;;  %v2718_v20 = vld [vmem:[%s7920_s7 + $0x128] sm:$0xff]  ;;  %v2716_v24 = vld [vmem:[%s7920_s7 + $0x118] sm:$0xff] }
 0x72c   :  { %v2687_v40 = vld [vmem:[%s7920_s7 + $0x30] sm:$0xff] }
 0x734   :  { %v5746_v7 = vpop.eup %5745 }
 0x735   :  { %v7044_v35 = vmul.f32 %v5746_v7, %v5744_v34  ;;  %v2370_v34 = vld [vmem:[%s7919_s6 + $0x148] sm:$0xff] }
 0x736   :  { %v2374_v7 = vld [vmem:[%s7919_s6 + $0x168] sm:$0xff] }
 0x737   :  { %2212 = vmatmul.mubr.f32.vlgmr.msra.gmra.mrb[14].mxu0 %v7044_v35  ;;  %2283 = vmatmul.mubr.f32.vlgmr.msra.gmra.mrb[14].mxu1 %v7044_v35  ;;  %v4924_v31 = vpack.c.bf16 %v2374_v7, %v2370_v34  ;;  %v2696_v7 = vld [vmem:[%s7920_s7 + $0x78] sm:$0xff] }
 0x738   :  { %4907 = vmatpush1.bf16.msra.mxu0 %v4906_v53  ;;  %4939 = vmatpush1.bf16.msra.mxu1 %v4938_v58  ;;  %v2372_v53 = vld [vmem:[%s7919_s6 + $0x158] sm:$0xff] }
 0x739   :  { %4909 = vmatprep.subr.bf16.mxu0 %v4908_v50  ;;  %4941 = vmatprep.subr.bf16.mxu1 %v4940_v30  ;;  %v2376_v58 = vld [vmem:[%s7919_s6 + $0x178] sm:$0xff]  ;;  %v2369_v50 = vld [vmem:[%s7919_s6 + $0x140] sm:$0xff] }
 0x73a   :  { %2479 = vmatprep.mubr.f32.mxu0 %v5895_v3  ;;  %2592 = vmatprep.mubr.f32.mxu1 %v5895_v3  ;;  %v2373_v30 = vld [vmem:[%s7919_s6 + $0x160] sm:$0xff]  ;;  %v4956_v44 = vpack.c.bf16 %v2376_v58, %v2372_v53 }
 0x73b   :  { %v4926_v15 = vpack.c.bf16 %v2373_v30, %v2369_v50  ;;  %v2689_v53 = vld [vmem:[%s7920_s7 + $0x40] sm:$0xff]  ;;  %v2691_v50 = vld [vmem:[%s7920_s7 + $0x50] sm:$0xff] }
 0x73c   :  { %4911 = vmatpush1.bf16.msra.mxu0 %v4910_v61  ;;  %4943 = vmatpush1.bf16.msra.mxu1 %v4942_v11  ;;  %v2380_v61 = vld [vmem:[%s7919_s6 + $0x198] sm:$0xff]  ;;  %v2693_v58 = vld [vmem:[%s7920_s7 + $0x60] sm:$0xff]  ;;  %v2695_v30 = vld [vmem:[%s7920_s7 + $0x70] sm:$0xff] }
 0x73d   :  { %4913 = vmatprep.subr.bf16.mxu0 %v4912_v46  ;;  %4945 = vmatprep.subr.bf16.mxu1 %v4944_v0  ;;  %v2384_v11 = vld [vmem:[%s7919_s6 + $0x1b8] sm:$0xff]  ;;  %v2377_v46 = vld [vmem:[%s7919_s6 + $0x180] sm:$0xff] }
 0x73e   :  { %v2381_v0 = vld [vmem:[%s7919_s6 + $0x1a0] sm:$0xff]  ;;  %v4960_v38 = vpack.c.bf16 %v2384_v11, %v2380_v61 }
 0x73f   :  { %v4930_v56 = vpack.c.bf16 %v2381_v0, %v2377_v46  ;;  %v2697_v61 = vld [vmem:[%s7920_s7 + $0x80] sm:$0xff]  ;;  %v2699_v46 = vld [vmem:[%s7920_s7 + $0x90] sm:$0xff] }
 0x740   :  { %4915 = vmatpush1.bf16.msra.mxu0 %v4914_v5  ;;  %4947 = vmatpush1.bf16.msra.mxu1 %v4946_v33  ;;  %v2388_v5 = vld [vmem:[%s7919_s6 + $0x1d8] sm:$0xff]  ;;  %v2701_v11 = vld [vmem:[%s7920_s7 + $0xa0] sm:$0xff]  ;;  %v2703_v0 = vld [vmem:[%s7920_s7 + $0xb0] sm:$0xff] }
 0x741   :  { %4917 = vmatprep.subr.bf16.mxu0 %v4916_v51  ;;  %4949 = vmatprep.subr.bf16.mxu1 %v4948_v63  ;;  %v2392_v33 = vld [vmem:[%s7919_s6 + $0x1f8] sm:$0xff]  ;;  %v2385_v51 = vld [vmem:[%s7919_s6 + $0x1c0] sm:$0xff]  ;;  %v4932_v63 = vpack.c.bf16 %v2390_v1, %v2386_v57 }
 0x742   :  { %v4964_v2 = vpack.c.bf16 %v2392_v33, %v2388_v5  ;;  %v4934_v39 = vpack.c.bf16 %v2389_v21, %v2385_v51  ;;  %v2712_v1 = vld [vmem:[%s7920_s7 + $0xf8] sm:$0xff]  ;;  %v2705_v5 = vld [vmem:[%s7920_s7 + $0xc0] sm:$0xff]  ;;  %v2707_v51 = vld [vmem:[%s7920_s7 + $0xd0] sm:$0xff] }
 0x743   :  { %v2709_v33 = vld [vmem:[%s7920_s7 + $0xe0] sm:$0xff]  ;;  %v2714_v21 = vld [vmem:[%s7920_s7 + $0x108] sm:$0xff] }
 0x744   :  { %4919 = vmatpush1.bf16.msra.mxu0 %v4918_v9  ;;  %4951 = vmatpush1.bf16.msra.mxu1 %v4950_v6 }
 0x745   :  { %4921 = vmatprep.subr.bf16.mxu0 %v4920_v29  ;;  %4953 = vmatprep.subr.bf16.mxu1 %v4952_v42  ;;  %v7259_v29 = vpack.c.bf16 %v2687_v40, %v2683_v22  ;;  %v2690_v42 = vld [vmem:[%s7920_s7 + $0x48] sm:$0xff] }
 0x746   :  { %v7273_v34 = vpack.c.bf16 %v2694_v54, %v2690_v42  ;;  %v2722_v22 = vld [vmem:[%s7920_s7 + $0x148] sm:$0xff]  ;;  %v2724_v54 = vld [vmem:[%s7920_s7 + $0x158] sm:$0xff] }
 0x747   :  { %v2726_v42 = vld [vmem:[%s7920_s7 + $0x168] sm:$0xff] }
 0x748   :  { %4923 = vmatpush1.bf16.msra.mxu0 %v4922_v8  ;;  %4955 = vmatpush1.bf16.msra.mxu1 %v4954_v25  ;;  %v7284_v8 = vpack.c.bf16 %v2696_v7, %v2692_v55  ;;  %v7286_v25 = vpack.c.bf16 %v2693_v58, %v2689_v53  ;;  %v2728_v55 = vld [vmem:[%s7920_s7 + $0x178] sm:$0xff]  ;;  %v7419_v7 = vpack.c.bf16 %v2726_v42, %v2722_v22  ;;  %v2721_v58 = vld [vmem:[%s7920_s7 + $0x140] sm:$0xff]  ;;  %v2739_v22 = vld [vmem:[%s7920_s7 + $0x1d0] sm:$0xff] }
 0x749   :  { %4925 = vmatprep.subr.bf16.mxu0 %v4924_v31  ;;  %4957 = vmatprep.subr.bf16.mxu1 %v4956_v44  ;;  %v7295_v31 = vpack.c.bf16 %v2695_v30, %v2691_v50  ;;  %v2698_v44 = vld [vmem:[%s7920_s7 + $0x88] sm:$0xff]  ;;  %v7421_v53 = vpack.c.bf16 %v2728_v55, %v2724_v54  ;;  %v2725_v50 = vld [vmem:[%s7920_s7 + $0x160] sm:$0xff]  ;;  %v2723_v30 = vld [vmem:[%s7920_s7 + $0x150] sm:$0xff] }
 0x74a   :  { %v7309_v49 = vpack.c.bf16 %v2702_v27, %v2698_v44  ;;  %v7433_v44 = vpack.c.bf16 %v2725_v50, %v2721_v58  ;;  %v2727_v27 = vld [vmem:[%s7920_s7 + $0x170] sm:$0xff] }
 0x74b   :  { %v2743_v42 = vld [vmem:[%s7920_s7 + $0x1f0] sm:$0xff] }
 0x74c   :  { %4927 = vmatpush1.bf16.msra.mxu0 %v4926_v15  ;;  %4959 = vmatpush1.bf16.msra.mxu1 %v4958_v28  ;;  %v7320_v15 = vpack.c.bf16 %v2704_v59, %v2700_v48  ;;  %v7322_v28 = vpack.c.bf16 %v2701_v11, %v2697_v61  ;;  %v2730_v48 = vld [vmem:[%s7920_s7 + $0x188] sm:$0xff]  ;;  %v7446_v61 = vpack.c.bf16 %v2727_v27, %v2723_v30 }
 0x74d   :  { %4929 = vmatprep.subr.bf16.mxu0 %v4928_v4  ;;  %4961 = vmatprep.subr.bf16.mxu1 %v4960_v38  ;;  %v7331_v4 = vpack.c.bf16 %v2703_v0, %v2699_v46  ;;  %v2706_v38 = vld [vmem:[%s7920_s7 + $0xc8] sm:$0xff]  ;;  %v2732_v46 = vld [vmem:[%s7920_s7 + $0x198] sm:$0xff]  ;;  %v7511_v54 = vpack.c.bf16 %v2743_v42, %v2739_v22 }
 0x74e   :  { %v7345_v57 = vpack.c.bf16 %v2710_v26, %v2706_v38  ;;  %v2734_v59 = vld [vmem:[%s7920_s7 + $0x1a8] sm:$0xff]  ;;  %v2736_v0 = vld [vmem:[%s7920_s7 + $0x1b8] sm:$0xff]  ;;  %v2729_v38 = vld [vmem:[%s7920_s7 + $0x180] sm:$0xff] }
 0x74f   :  { %v7448_v11 = vpack.c.bf16 %v2734_v59, %v2730_v48  ;;  %v7459_v26 = vpack.c.bf16 %v2736_v0, %v2732_v46 }
 0x750   :  { %4931 = vmatpush1.bf16.msra.mxu0 %v4930_v56  ;;  %4963 = vmatpush1.bf16.msra.mxu1 %v4962_v60  ;;  %v7356_v56 = vpack.c.bf16 %v2712_v1, %v2708_v36  ;;  %v7358_v60 = vpack.c.bf16 %v2709_v33, %v2705_v5  ;;  %v2733_v36 = vld [vmem:[%s7920_s7 + $0x1a0] sm:$0xff]  ;;  %v2731_v1 = vld [vmem:[%s7920_s7 + $0x190] sm:$0xff] }
 0x751   :  { %4933 = vmatprep.subr.bf16.mxu0 %v4932_v63  ;;  %4965 = vmatprep.subr.bf16.mxu1 %v4964_v2  ;;  %v2711_v63 = vld [vmem:[%s7920_s7 + $0xf0] sm:$0xff]  ;;  %v7471_v33 = vpack.c.bf16 %v2733_v36, %v2729_v38 }
 0x752   :  { %v7367_v2 = vpack.c.bf16 %v2711_v63, %v2707_v51  ;;  %v2735_v5 = vld [vmem:[%s7920_s7 + $0x1b0] sm:$0xff]  ;;  %v2738_v63 = vld [vmem:[%s7920_s7 + $0x1c8] sm:$0xff] }
 0x753   :  { %v7475_v51 = vpack.c.bf16 %v2735_v5, %v2731_v1 }
 0x754   :  { %4935 = vmatpush1.bf16.msra.mxu0 %v4934_v39  ;;  %4967 = vmatpush1.bf16.msra.mxu1 %v4966_v43  ;;  %v7381_v39 = vpack.c.bf16 %v2718_v20, %v2714_v21  ;;  %v2720_v43 = vld [vmem:[%s7920_s7 + $0x138] sm:$0xff]  ;;  %v2742_v21 = vld [vmem:[%s7920_s7 + $0x1e8] sm:$0xff] }
 0x755   :  { %v2740_v20 = vld [vmem:[%s7920_s7 + $0x1d8] sm:$0xff] }
 0x757   :  { %2480 = vmatmul.mubr.f32.vlgmr.msra.gmra.mrb[16].mxu0 %v6412_v23  ;;  %2593 = vmatmul.mubr.f32.vlgmr.msra.gmra.mrb[16].mxu1 %v6412_v23  ;;  %v2682_v23 = vld [vmem:[%s7920_s7 + $0x8] sm:$0xff] }
 0x758   :  { %2485 = vmatprep.mubr.f32.mxu0 %v5895_v3  ;;  %2598 = vmatprep.mubr.f32.mxu1 %v5895_v3 }
 0x75b   :  { %2486 = vmatmul.mubr.f32.gmra.mrb[18].mxu0 %v6456_v62  ;;  %2599 = vmatmul.mubr.f32.gmra.mrb[18].mxu1 %v6456_v62  ;;  %v2686_v62 = vld [vmem:[%s7920_s7 + $0x28] sm:$0xff] }
 0x75c   :  { %2491 = vmatprep.mubr.f32.mxu0 %v5895_v3  ;;  %2604 = vmatprep.mubr.f32.mxu1 %v5895_v3 }
 0x75f   :  { %2492 = vmatmul.mubr.f32.gmra.mrb[20].mxu0 %v6600_v47  ;;  %2605 = vmatmul.mubr.f32.gmra.mrb[20].mxu1 %v6600_v47  ;;  %v2684_v47 = vld [vmem:[%s7920_s7 + $0x18] sm:$0xff] }
 0x760   :  { %2497 = vmatprep.mubr.f32.mxu0 %v5895_v3  ;;  %2610 = vmatprep.mubr.f32.mxu1 %v5895_v3 }
 0x763   :  { %2498 = vmatmul.mubr.f32.gmra.mrb[22].mxu0 %v6806_v45  ;;  %2611 = vmatmul.mubr.f32.gmra.mrb[22].mxu1 %v6806_v45  ;;  %v7237_v45 = vpack.c.bf16 %v2686_v62, %v2682_v23  ;;  %v2713_v23 = vld [vmem:[%s7920_s7 + $0x100] sm:$0xff] }
 0x764   :  { %2503 = vmatprep.mubr.f32.mxu0 %v5895_v3  ;;  %2616 = vmatprep.mubr.f32.mxu1 %v5895_v3  ;;  %v2717_v62 = vld [vmem:[%s7920_s7 + $0x120] sm:$0xff] }
 0x765   :  { %4969 = vmatprep.subr.bf16.mxu0 %v7237_v45 }
 0x767   :  { %2504 = vmatmul.mubr.f32.gmra.mrb[24].mxu0 %v6852_v19  ;;  %2617 = vmatmul.mubr.f32.gmra.mrb[24].mxu1 %v6852_v19  ;;  %v2688_v19 = vld [vmem:[%s7920_s7 + $0x38] sm:$0xff] }
 0x768   :  { %2509 = vmatprep.mubr.f32.mxu0 %v5895_v3  ;;  %2622 = vmatprep.mubr.f32.mxu1 %v5895_v3  ;;  %v7248_v9 = vpack.c.bf16 %v2688_v19, %v2684_v47  ;;  %v7392_v47 = vpack.c.bf16 %v2720_v43, %v2716_v24  ;;  %v7394_v19 = vpack.c.bf16 %v2717_v62, %v2713_v23  ;;  %v2744_v43 = vld [vmem:[%s7920_s7 + $0x1f8] sm:$0xff]  ;;  %v2737_v23 = vld [vmem:[%s7920_s7 + $0x1c0] sm:$0xff] }
 0x769   :  { %v7489_v24 = vpack.c.bf16 %v2742_v21, %v2738_v63  ;;  %v2741_v62 = vld [vmem:[%s7920_s7 + $0x1e0] sm:$0xff] }
 0x76a   :  { %5001 = vmatprep.subr.bf16.mxu1 %v7248_v9 }
 0x76b   :  { %2510 = vmatmul.mubr.f32.gmra.mrb[26].mxu0 %v6896_v13  ;;  %2623 = vmatmul.mubr.f32.gmra.mrb[26].mxu1 %v6896_v13  ;;  %v2681_v13 = vld [vmem:[%s7920_s7] sm:$0xff] }
 0x76c   :  { %2515 = vmatprep.mubr.f32.mxu0 %v5895_v3  ;;  %2628 = vmatprep.mubr.f32.mxu1 %v5895_v3 }
 0x76d   :  { %5003 = vmatpush1.bf16.msra.mxu1 %v7259_v29 }
 0x76e   :  { %5005 = vmatprep.subr.bf16.mxu1 %v7284_v8 }
 0x76f   :  { %2516 = vmatmul.mubr.f32.gmra.mrb[28].mxu0 %v7044_v35  ;;  %2629 = vmatmul.mubr.f32.gmra.mrb[28].mxu1 %v7044_v35  ;;  %v2685_v35 = vld [vmem:[%s7920_s7 + $0x20] sm:$0xff] }
 0x770   :  { %2521 = vmatprep.mubr.f32.mxu0 %v5895_v3  ;;  %2634 = vmatprep.mubr.f32.mxu1 %v5895_v3  ;;  %v7250_v6 = vpack.c.bf16 %v2685_v35, %v2681_v13  ;;  %v2715_v13 = vld [vmem:[%s7920_s7 + $0x110] sm:$0xff] }
 0x771   :  { %5007 = vmatpush1.bf16.msra.mxu1 %v7295_v31  ;;  %v2719_v35 = vld [vmem:[%s7920_s7 + $0x130] sm:$0xff] }
 0x772   :  { %4971 = vmatpush1.bf16.msra.mxu0 %v7250_v6  ;;  %5009 = vmatprep.subr.bf16.mxu1 %v7320_v15  ;;  %v7406_v40 = vpack.c.bf16 %v2719_v35, %v2715_v13  ;;  %v7500_v13 = vpack.c.bf16 %v2744_v43, %v2740_v20  ;;  %v7502_v35 = vpack.c.bf16 %v2741_v62, %v2737_v23 }
 0x773   :  { %4973 = vmatprep.subr.bf16.mxu0 %v7273_v34 }
 0x775   :  { %5011 = vmatpush1.bf16.msra.mxu1 %v7331_v4 }
 0x776   :  { %4975 = vmatpush1.bf16.msra.mxu0 %v7286_v25  ;;  %5013 = vmatprep.subr.bf16.mxu1 %v7356_v56 }
 0x777   :  { %4977 = vmatprep.subr.bf16.mxu0 %v7309_v49 }
 0x779   :  { %5015 = vmatpush1.bf16.msra.mxu1 %v7367_v2 }
 0x77a   :  { %4979 = vmatpush1.bf16.msra.mxu0 %v7322_v28  ;;  %5017 = vmatprep.subr.bf16.mxu1 %v7392_v47 }
 0x77b   :  { %4981 = vmatprep.subr.bf16.mxu0 %v7345_v57 }
 0x77d   :  { %5019 = vmatpush1.bf16.msra.mxu1 %v7406_v40 }
 0x77e   :  { %4983 = vmatpush1.bf16.msra.mxu0 %v7358_v60  ;;  %5021 = vmatprep.subr.bf16.mxu1 %v7421_v53 }
 0x77f   :  { %4985 = vmatprep.subr.bf16.mxu0 %v7381_v39 }
 0x781   :  { %5023 = vmatpush1.bf16.msra.mxu1 %v7446_v61 }
 0x782   :  { %4987 = vmatpush1.bf16.msra.mxu0 %v7394_v19  ;;  %5025 = vmatprep.subr.bf16.mxu1 %v7459_v26 }
 0x783   :  { %4989 = vmatprep.subr.bf16.mxu0 %v7419_v7 }
 0x785   :  { %5027 = vmatpush1.bf16.msra.mxu1 %v7475_v51 }
 0x786   :  { %4991 = vmatpush1.bf16.msra.mxu0 %v7433_v44  ;;  %5029 = vmatprep.subr.bf16.mxu1 %v7500_v13 }
 0x787   :  { %4993 = vmatprep.subr.bf16.mxu0 %v7448_v11 }
 0x789   :  { %5031 = vmatpush1.bf16.msra.mxu1 %v7511_v54 }
 0x78a   :  { %4995 = vmatpush1.bf16.msra.mxu0 %v7471_v33  ;;  %5065 = vmatprep.subr.bf16.mxu1 %v7248_v9 }
 0x78b   :  { %4997 = vmatprep.subr.bf16.mxu0 %v7489_v24 }
 0x78e   :  { %4999 = vmatpush1.bf16.msra.mxu0 %v7502_v35 }
 0x78f   :  { %5033 = vmatprep.subr.bf16.mxu0 %v7237_v45 }
 0x80a   :  { %v2213_v55 = vpop.f32.mrb[14].mxu0  ;;  %v2284_v58 = vpop.f32.mrb[14].mxu1 }
 0x80b   :  { %v5518_v50 = vadd.f32 %v2213_v55, %v6386_v16  ;;  %v2215_v30 = vpop.f32.mrb[15].mxu0  ;;  %v2286_v27 = vpop.f32.mrb[15].mxu1  ;;  %v5534_v0 = vadd.f32 %v2284_v58, %v6397_v32  ;;  %v2393_v58 = vld [vmem:[%s7923_s8] sm:$0xf] }
 0x80c   :  { %v5519_v48 = vadd.f32 %v2215_v30, %v6390_v17  ;;  %v5535_v38 = vadd.f32 %v2286_v27, %v6403_v41  ;;  %v7577_v30 = vrot.slane %v2393_v58, %v77_v14 }
 0x80d   :  { %v4303_v59 = vmul.f32 -1.442695, %v5518_v50  ;;  %v4305_v36 = vmul.f32 -1.442695, %v5534_v0  ;;  %v7573_v50 = vrot.slane %v2393_v58, %v73_v12  ;;  %v7587_v12 = vrot.slane %v2393_v58, %v85_v37 }
 0x80e   :  { %v4304_v46 = vmul.f32 -1.442695, %v5519_v48 }
 0x80f   :  { %5747 = vpow2.f32 %v4303_v59 }
 0x810   :  { %5749 = vpow2.f32 %v4304_v46 }
 0x811   :  { %5751 = vtanh.f32 %v5535_v38 }
 0x812   :  { %5753 = vpow2.f32 %v4305_v36 }
 0x819   :  { %v5748_v1 = vpop.eup %5747 }
 0x81a   :  { %v2302_v5 = vadd.f32 1.0, %v5748_v1  ;;  %v5750_v63 = vpop.eup %5749 }
 0x81b   :  { %v2303_v16 = vadd.f32 1.0, %v5750_v63  ;;  %v5752_v21 = vpop.eup %5751 }
 0x81c   :  { %5755 = vrcp.f32 %v2302_v5  ;;  %v5754_v20 = vpop.eup %5753  ;;  %v7583_v5 = vrot.slane %v2393_v58, %v81_v18 }
 0x81d   :  { %5757 = vrcp.f32 %v2303_v16  ;;  %v2304_v62 = vadd.f32 1.0, %v5754_v20 }
 0x81f   :  { %5759 = vrcp.f32 %v2304_v62 }
 0x826   :  { %v5756_v17 = vpop.eup %5755 }
 0x827   :  { %v2313_v43 = vmul.f32 %v5756_v17, %v5752_v21  ;;  %v5758_v23 = vpop.eup %5757 }
 0x828   :  { %v2312_v22 = vmul.f32 %v5758_v23, %v7011_v52  ;;  %v46_v52 = vld [vmem:[%s7916_s1 + $0x8] sm:$0xff] }
 0x829   :  { %v5760_v41 = vpop.eup %5759 }
 0x82a   :  { %v2314_v32 = vadd.f32 %v2313_v43, %v2312_v22 }
 0x82c   :  { %4144 = vst [vmem:[%s7921_s13] sm:$0xff] %v2314_v32  ;;  %5761 = vtanh.f32 %v2314_v32 }
 0x836   :  { %v5762_v42 = vpop.eup %5761 }
 0x837   :  { %v2316_v55 = vmul.f32 %v5762_v42, %v5760_v41 }
 0x839   :  { %2522 = vmatmul.mubr.f32.gmra.mrb[30].mxu0 %v2316_v55  ;;  %4140 = vst [vmem:[%s7922_s12] sm:$0xff] %v2316_v55  ;;  %2635 = vmatmul.mubr.f32.gmra.mrb[30].mxu1 %v2316_v55 }
 0x83a   :  { %2809 = vmatprep.mubr.f32.mxu0 %v5895_v3  ;;  %2880 = vmatprep.mubr.f32.mxu1 %v5895_v3 }
 0x83d   :  { %2810 = vmatmul.mubr.f32.vlgmr.msra.gmra.mrb[16].mxu0 %v46_v52  ;;  %2881 = vmatmul.mubr.f32.vlgmr.msra.gmra.mrb[16].mxu1 %v46_v52 }
 0x83e   :  { %5035 = vmatpush1.bf16.msra.mxu0 %v7250_v6  ;;  %5067 = vmatpush1.bf16.msra.mxu1 %v7259_v29 }
 0x83f   :  { %5037 = vmatprep.subr.bf16.mxu0 %v7273_v34  ;;  %5069 = vmatprep.subr.bf16.mxu1 %v7284_v8 }
 0x840   :  { %2983 = vmatprep.mubr.f32.mxu0 %v5895_v3  ;;  %3054 = vmatprep.mubr.f32.mxu1 %v5895_v3 }
 0x842   :  { %5039 = vmatpush1.bf16.msra.mxu0 %v7286_v25  ;;  %5071 = vmatpush1.bf16.msra.mxu1 %v7295_v31 }
 0x843   :  { %5041 = vmatprep.subr.bf16.mxu0 %v7309_v49  ;;  %5073 = vmatprep.subr.bf16.mxu1 %v7320_v15 }
 0x846   :  { %5043 = vmatpush1.bf16.msra.mxu0 %v7322_v28  ;;  %5075 = vmatpush1.bf16.msra.mxu1 %v7331_v4 }
 0x847   :  { %5045 = vmatprep.subr.bf16.mxu0 %v7345_v57  ;;  %5077 = vmatprep.subr.bf16.mxu1 %v7356_v56 }
 0x84a   :  { %5047 = vmatpush1.bf16.msra.mxu0 %v7358_v60  ;;  %5079 = vmatpush1.bf16.msra.mxu1 %v7367_v2 }
 0x84b   :  { %5049 = vmatprep.subr.bf16.mxu0 %v7381_v39  ;;  %5081 = vmatprep.subr.bf16.mxu1 %v7392_v47 }
 0x84e   :  { %5051 = vmatpush1.bf16.msra.mxu0 %v7394_v19  ;;  %5083 = vmatpush1.bf16.msra.mxu1 %v7406_v40 }
 0x84f   :  { %5053 = vmatprep.subr.bf16.mxu0 %v7419_v7  ;;  %5085 = vmatprep.subr.bf16.mxu1 %v7421_v53 }
 0x852   :  { %5055 = vmatpush1.bf16.msra.mxu0 %v7433_v44  ;;  %5087 = vmatpush1.bf16.msra.mxu1 %v7446_v61 }
 0x853   :  { %5057 = vmatprep.subr.bf16.mxu0 %v7448_v11  ;;  %5089 = vmatprep.subr.bf16.mxu1 %v7459_v26 }
 0x856   :  { %5059 = vmatpush1.bf16.msra.mxu0 %v7471_v33  ;;  %5091 = vmatpush1.bf16.msra.mxu1 %v7475_v51 }
 0x857   :  { %5061 = vmatprep.subr.bf16.mxu0 %v7489_v24  ;;  %5093 = vmatprep.subr.bf16.mxu1 %v7500_v13 }
 0x85a   :  { %5063 = vmatpush1.bf16.msra.mxu0 %v7502_v35  ;;  %5095 = vmatpush1.bf16.msra.mxu1 %v7511_v54 }
 0x85b   :  { %5097 = vmatprep.subr.bf16.mxu0 %v7237_v45  ;;  %5129 = vmatprep.subr.bf16.mxu1 %v7248_v9 }
 0x910   :  { %v2811_v27 = vpop.f32.mrb[16].mxu0  ;;  %v2882_v48 = vpop.f32.mrb[16].mxu1 }
 0x911   :  { %v5536_v59 = vadd.f32 %v2811_v27, %v7573_v50  ;;  %v2813_v46 = vpop.f32.mrb[17].mxu0  ;;  %v2884_v0 = vpop.f32.mrb[17].mxu1  ;;  %v5552_v14 = vadd.f32 %v2882_v48, %v7583_v5 }
 0x912   :  { %v5537_v38 = vadd.f32 %v2813_v46, %v7577_v30  ;;  %v5553_v63 = vadd.f32 %v2884_v0, %v7587_v12 }
 0x913   :  { %v4306_v36 = vmul.f32 -1.442695, %v5536_v59  ;;  %v4308_v16 = vmul.f32 -1.442695, %v5552_v14 }
 0x914   :  { %v4307_v1 = vmul.f32 -1.442695, %v5537_v38 }
 0x915   :  { %5763 = vpow2.f32 %v4306_v36 }
 0x916   :  { %5765 = vpow2.f32 %v4307_v1 }
 0x917   :  { %5767 = vtanh.f32 %v5553_v63 }
 0x918   :  { %5769 = vpow2.f32 %v4308_v16 }
 0x91f   :  { %v5764_v21 = vpop.eup %5763 }
 0x920   :  { %v2900_v20 = vadd.f32 1.0, %v5764_v21  ;;  %v5766_v17 = vpop.eup %5765 }
 0x921   :  { %v2901_v43 = vadd.f32 1.0, %v5766_v17  ;;  %v5768_v18 = vpop.eup %5767 }
 0x922   :  { %5771 = vrcp.f32 %v2900_v20  ;;  %v5770_v23 = vpop.eup %5769 }
 0x923   :  { %5773 = vrcp.f32 %v2901_v43  ;;  %v2902_v32 = vadd.f32 1.0, %v5770_v23 }
 0x925   :  { %5775 = vrcp.f32 %v2902_v32 }
 0x92c   :  { %v5772_v62 = vpop.eup %5771 }
 0x92d   :  { %v2911_v37 = vmul.f32 %v5772_v62, %v5768_v18  ;;  %v5774_v22 = vpop.eup %5773 }
 0x92e   :  { %v2910_v41 = vmul.f32 %v5774_v22, %v50_v10 }
 0x92f   :  { %v5776_v55 = vpop.eup %5775 }
 0x930   :  { %v7594_v42 = vadd.f32 %v2911_v37, %v2910_v41 }
 0x932   :  { %5777 = vtanh.f32 %v7594_v42 }
 0x93c   :  { %v5778_v52 = vpop.eup %5777 }
 0x93d   :  { %v2914_v58 = vmul.f32 %v5778_v52, %v5776_v55 }
 0x93f   :  { %2984 = vmatmul.mubr.f32.vlgmr.msra.gmra.mrb[18].mxu0 %v2914_v58  ;;  %3055 = vmatmul.mubr.f32.vlgmr.msra.gmra.mrb[18].mxu1 %v2914_v58 }
 0x940   :  { %5099 = vmatpush1.bf16.msra.mxu0 %v7250_v6  ;;  %5131 = vmatpush1.bf16.msra.mxu1 %v7259_v29 }
 0x941   :  { %5101 = vmatprep.subr.bf16.mxu0 %v7273_v34  ;;  %5133 = vmatprep.subr.bf16.mxu1 %v7284_v8 }
 0x942   :  { %3157 = vmatprep.mubr.f32.mxu0 %v5895_v3  ;;  %3228 = vmatprep.mubr.f32.mxu1 %v5895_v3 }
 0x944   :  { %5103 = vmatpush1.bf16.msra.mxu0 %v7286_v25  ;;  %5135 = vmatpush1.bf16.msra.mxu1 %v7295_v31 }
 0x945   :  { %5105 = vmatprep.subr.bf16.mxu0 %v7309_v49  ;;  %5137 = vmatprep.subr.bf16.mxu1 %v7320_v15 }
 0x948   :  { %5107 = vmatpush1.bf16.msra.mxu0 %v7322_v28  ;;  %5139 = vmatpush1.bf16.msra.mxu1 %v7331_v4 }
 0x949   :  { %5109 = vmatprep.subr.bf16.mxu0 %v7345_v57  ;;  %5141 = vmatprep.subr.bf16.mxu1 %v7356_v56 }
 0x94c   :  { %5111 = vmatpush1.bf16.msra.mxu0 %v7358_v60  ;;  %5143 = vmatpush1.bf16.msra.mxu1 %v7367_v2 }
 0x94d   :  { %5113 = vmatprep.subr.bf16.mxu0 %v7381_v39  ;;  %5145 = vmatprep.subr.bf16.mxu1 %v7392_v47 }
 0x950   :  { %5115 = vmatpush1.bf16.msra.mxu0 %v7394_v19  ;;  %5147 = vmatpush1.bf16.msra.mxu1 %v7406_v40 }
 0x951   :  { %5117 = vmatprep.subr.bf16.mxu0 %v7419_v7  ;;  %5149 = vmatprep.subr.bf16.mxu1 %v7421_v53 }
 0x954   :  { %5119 = vmatpush1.bf16.msra.mxu0 %v7433_v44  ;;  %5151 = vmatpush1.bf16.msra.mxu1 %v7446_v61 }
 0x955   :  { %5121 = vmatprep.subr.bf16.mxu0 %v7448_v11  ;;  %5153 = vmatprep.subr.bf16.mxu1 %v7459_v26 }
 0x958   :  { %5123 = vmatpush1.bf16.msra.mxu0 %v7471_v33  ;;  %5155 = vmatpush1.bf16.msra.mxu1 %v7475_v51 }
 0x959   :  { %5125 = vmatprep.subr.bf16.mxu0 %v7489_v24  ;;  %5157 = vmatprep.subr.bf16.mxu1 %v7500_v13 }
 0x95c   :  { %5127 = vmatpush1.bf16.msra.mxu0 %v7502_v35  ;;  %5159 = vmatpush1.bf16.msra.mxu1 %v7511_v54 }
 0x95d   :  { %5161 = vmatprep.subr.bf16.mxu0 %v7237_v45  ;;  %5193 = vmatprep.subr.bf16.mxu1 %v7248_v9 }
 0xa12   :  { %v2985_v27 = vpop.f32.mrb[18].mxu0  ;;  %v3056_v48 = vpop.f32.mrb[18].mxu1 }
 0xa13   :  { %v5538_v59 = vadd.f32 %v2985_v27, %v7573_v50  ;;  %v2987_v46 = vpop.f32.mrb[19].mxu0  ;;  %v3058_v0 = vpop.f32.mrb[19].mxu1  ;;  %v5554_v14 = vadd.f32 %v3056_v48, %v7583_v5 }
 0xa14   :  { %v5539_v38 = vadd.f32 %v2987_v46, %v7577_v30  ;;  %v5555_v63 = vadd.f32 %v3058_v0, %v7587_v12 }
 0xa15   :  { %v4309_v36 = vmul.f32 -1.442695, %v5538_v59  ;;  %v4311_v16 = vmul.f32 -1.442695, %v5554_v14 }
 0xa16   :  { %v4310_v1 = vmul.f32 -1.442695, %v5539_v38 }
 0xa17   :  { %5779 = vpow2.f32 %v4309_v36 }
 0xa18   :  { %5781 = vpow2.f32 %v4310_v1 }
 0xa19   :  { %5783 = vtanh.f32 %v5555_v63 }
 0xa1a   :  { %5785 = vpow2.f32 %v4311_v16 }
 0xa21   :  { %v5780_v21 = vpop.eup %5779 }
 0xa22   :  { %v3074_v20 = vadd.f32 1.0, %v5780_v21  ;;  %v5782_v17 = vpop.eup %5781 }
 0xa23   :  { %v3075_v43 = vadd.f32 1.0, %v5782_v17  ;;  %v5784_v18 = vpop.eup %5783 }
 0xa24   :  { %5787 = vrcp.f32 %v3074_v20  ;;  %v5786_v23 = vpop.eup %5785 }
 0xa25   :  { %5789 = vrcp.f32 %v3075_v43  ;;  %v3076_v22 = vadd.f32 1.0, %v5786_v23 }
 0xa27   :  { %5791 = vrcp.f32 %v3076_v22 }
 0xa2e   :  { %v5788_v62 = vpop.eup %5787 }
 0xa2f   :  { %v3085_v10 = vmul.f32 %v5788_v62, %v5784_v18  ;;  %v5790_v37 = vpop.eup %5789 }
 0xa30   :  { %v3084_v32 = vmul.f32 %v5790_v37, %v7594_v42 }
 0xa31   :  { %v5792_v55 = vpop.eup %5791 }
 0xa32   :  { %v7636_v41 = vadd.f32 %v3085_v10, %v3084_v32 }
 0xa34   :  { %5793 = vtanh.f32 %v7636_v41 }
 0xa3e   :  { %v5794_v52 = vpop.eup %5793 }
 0xa3f   :  { %v3088_v58 = vmul.f32 %v5794_v52, %v5792_v55 }
 0xa41   :  { %3158 = vmatmul.mubr.f32.vlgmr.msra.gmra.mrb[20].mxu0 %v3088_v58  ;;  %3229 = vmatmul.mubr.f32.vlgmr.msra.gmra.mrb[20].mxu1 %v3088_v58 }
 0xa42   :  { %5163 = vmatpush1.bf16.msra.mxu0 %v7250_v6  ;;  %5195 = vmatpush1.bf16.msra.mxu1 %v7259_v29 }
 0xa43   :  { %5165 = vmatprep.subr.bf16.mxu0 %v7273_v34  ;;  %5197 = vmatprep.subr.bf16.mxu1 %v7284_v8 }
 0xa44   :  { %3331 = vmatprep.mubr.f32.mxu0 %v5895_v3  ;;  %3402 = vmatprep.mubr.f32.mxu1 %v5895_v3 }
 0xa46   :  { %5167 = vmatpush1.bf16.msra.mxu0 %v7286_v25  ;;  %5199 = vmatpush1.bf16.msra.mxu1 %v7295_v31 }
 0xa47   :  { %5169 = vmatprep.subr.bf16.mxu0 %v7309_v49  ;;  %5201 = vmatprep.subr.bf16.mxu1 %v7320_v15 }
 0xa4a   :  { %5171 = vmatpush1.bf16.msra.mxu0 %v7322_v28  ;;  %5203 = vmatpush1.bf16.msra.mxu1 %v7331_v4 }
 0xa4b   :  { %5173 = vmatprep.subr.bf16.mxu0 %v7345_v57  ;;  %5205 = vmatprep.subr.bf16.mxu1 %v7356_v56 }
 0xa4e   :  { %5175 = vmatpush1.bf16.msra.mxu0 %v7358_v60  ;;  %5207 = vmatpush1.bf16.msra.mxu1 %v7367_v2 }
 0xa4f   :  { %5177 = vmatprep.subr.bf16.mxu0 %v7381_v39  ;;  %5209 = vmatprep.subr.bf16.mxu1 %v7392_v47 }
 0xa52   :  { %5179 = vmatpush1.bf16.msra.mxu0 %v7394_v19  ;;  %5211 = vmatpush1.bf16.msra.mxu1 %v7406_v40 }
 0xa53   :  { %5181 = vmatprep.subr.bf16.mxu0 %v7419_v7  ;;  %5213 = vmatprep.subr.bf16.mxu1 %v7421_v53 }
 0xa56   :  { %5183 = vmatpush1.bf16.msra.mxu0 %v7433_v44  ;;  %5215 = vmatpush1.bf16.msra.mxu1 %v7446_v61 }
 0xa57   :  { %5185 = vmatprep.subr.bf16.mxu0 %v7448_v11  ;;  %5217 = vmatprep.subr.bf16.mxu1 %v7459_v26 }
 0xa5a   :  { %5187 = vmatpush1.bf16.msra.mxu0 %v7471_v33  ;;  %5219 = vmatpush1.bf16.msra.mxu1 %v7475_v51 }
 0xa5b   :  { %5189 = vmatprep.subr.bf16.mxu0 %v7489_v24  ;;  %5221 = vmatprep.subr.bf16.mxu1 %v7500_v13 }
 0xa5e   :  { %5191 = vmatpush1.bf16.msra.mxu0 %v7502_v35  ;;  %5223 = vmatpush1.bf16.msra.mxu1 %v7511_v54 }
 0xa5f   :  { %5225 = vmatprep.subr.bf16.mxu0 %v7237_v45  ;;  %5257 = vmatprep.subr.bf16.mxu1 %v7248_v9 }
 0xb14   :  { %v3159_v42 = vpop.f32.mrb[20].mxu0  ;;  %v3230_v27 = vpop.f32.mrb[20].mxu1 }
 0xb15   :  { %v5540_v48 = vadd.f32 %v3159_v42, %v7573_v50  ;;  %v3161_v59 = vpop.f32.mrb[21].mxu0  ;;  %v3232_v46 = vpop.f32.mrb[21].mxu1  ;;  %v5556_v1 = vadd.f32 %v3230_v27, %v7583_v5 }
 0xb16   :  { %v5541_v0 = vadd.f32 %v3161_v59, %v7577_v30  ;;  %v5557_v14 = vadd.f32 %v3232_v46, %v7587_v12 }
 0xb17   :  { %v4312_v38 = vmul.f32 -1.442695, %v5540_v48  ;;  %v4314_v63 = vmul.f32 -1.442695, %v5556_v1 }
 0xb18   :  { %v4313_v36 = vmul.f32 -1.442695, %v5541_v0 }
 0xb19   :  { %5795 = vpow2.f32 %v4312_v38 }
 0xb1a   :  { %5797 = vpow2.f32 %v4313_v36 }
 0xb1b   :  { %5799 = vtanh.f32 %v5557_v14 }
 0xb1c   :  { %5801 = vpow2.f32 %v4314_v63 }
 0xb23   :  { %v5796_v16 = vpop.eup %5795 }
 0xb24   :  { %v3248_v21 = vadd.f32 1.0, %v5796_v16  ;;  %v5798_v20 = vpop.eup %5797 }
 0xb25   :  { %v3249_v17 = vadd.f32 1.0, %v5798_v20  ;;  %v5800_v43 = vpop.eup %5799 }
 0xb26   :  { %5803 = vrcp.f32 %v3248_v21  ;;  %v5802_v18 = vpop.eup %5801 }
 0xb27   :  { %5805 = vrcp.f32 %v3249_v17  ;;  %v3250_v37 = vadd.f32 1.0, %v5802_v18 }
 0xb29   :  { %5807 = vrcp.f32 %v3250_v37 }
 0xb30   :  { %v5804_v23 = vpop.eup %5803 }
 0xb31   :  { %v3259_v62 = vmul.f32 %v5804_v23, %v5800_v43  ;;  %v5806_v10 = vpop.eup %5805 }
 0xb32   :  { %v3258_v22 = vmul.f32 %v5806_v10, %v7636_v41 }
 0xb33   :  { %v5808_v55 = vpop.eup %5807 }
 0xb34   :  { %v7678_v32 = vadd.f32 %v3259_v62, %v3258_v22 }
 0xb36   :  { %5809 = vtanh.f32 %v7678_v32 }
 0xb40   :  { %v5810_v52 = vpop.eup %5809 }
 0xb41   :  { %v3262_v58 = vmul.f32 %v5810_v52, %v5808_v55 }
 0xb43   :  { %3332 = vmatmul.mubr.f32.vlgmr.msra.gmra.mrb[22].mxu0 %v3262_v58  ;;  %3403 = vmatmul.mubr.f32.vlgmr.msra.gmra.mrb[22].mxu1 %v3262_v58 }
 0xb44   :  { %5227 = vmatpush1.bf16.msra.mxu0 %v7250_v6  ;;  %5259 = vmatpush1.bf16.msra.mxu1 %v7259_v29 }
 0xb45   :  { %5229 = vmatprep.subr.bf16.mxu0 %v7273_v34  ;;  %5261 = vmatprep.subr.bf16.mxu1 %v7284_v8 }
 0xb46   :  { %3505 = vmatprep.mubr.f32.mxu0 %v5895_v3  ;;  %3576 = vmatprep.mubr.f32.mxu1 %v5895_v3 }
 0xb48   :  { %5231 = vmatpush1.bf16.msra.mxu0 %v7286_v25  ;;  %5263 = vmatpush1.bf16.msra.mxu1 %v7295_v31 }
 0xb49   :  { %5233 = vmatprep.subr.bf16.mxu0 %v7309_v49  ;;  %5265 = vmatprep.subr.bf16.mxu1 %v7320_v15 }
 0xb4c   :  { %5235 = vmatpush1.bf16.msra.mxu0 %v7322_v28  ;;  %5267 = vmatpush1.bf16.msra.mxu1 %v7331_v4 }
 0xb4d   :  { %5237 = vmatprep.subr.bf16.mxu0 %v7345_v57  ;;  %5269 = vmatprep.subr.bf16.mxu1 %v7356_v56 }
 0xb50   :  { %5239 = vmatpush1.bf16.msra.mxu0 %v7358_v60  ;;  %5271 = vmatpush1.bf16.msra.mxu1 %v7367_v2 }
 0xb51   :  { %5241 = vmatprep.subr.bf16.mxu0 %v7381_v39  ;;  %5273 = vmatprep.subr.bf16.mxu1 %v7392_v47 }
 0xb54   :  { %5243 = vmatpush1.bf16.msra.mxu0 %v7394_v19  ;;  %5275 = vmatpush1.bf16.msra.mxu1 %v7406_v40 }
 0xb55   :  { %5245 = vmatprep.subr.bf16.mxu0 %v7419_v7  ;;  %5277 = vmatprep.subr.bf16.mxu1 %v7421_v53 }
 0xb58   :  { %5247 = vmatpush1.bf16.msra.mxu0 %v7433_v44  ;;  %5279 = vmatpush1.bf16.msra.mxu1 %v7446_v61 }
 0xb59   :  { %5249 = vmatprep.subr.bf16.mxu0 %v7448_v11  ;;  %5281 = vmatprep.subr.bf16.mxu1 %v7459_v26 }
 0xb5c   :  { %5251 = vmatpush1.bf16.msra.mxu0 %v7471_v33  ;;  %5283 = vmatpush1.bf16.msra.mxu1 %v7475_v51 }
 0xb5d   :  { %5253 = vmatprep.subr.bf16.mxu0 %v7489_v24  ;;  %5285 = vmatprep.subr.bf16.mxu1 %v7500_v13 }
 0xb60   :  { %5255 = vmatpush1.bf16.msra.mxu0 %v7502_v35  ;;  %5287 = vmatpush1.bf16.msra.mxu1 %v7511_v54 }
 0xb61   :  { %5289 = vmatprep.subr.bf16.mxu0 %v7237_v45  ;;  %5321 = vmatprep.subr.bf16.mxu1 %v7248_v9 }
 0xc16   :  { %v3333_v41 = vpop.f32.mrb[22].mxu0  ;;  %v3404_v42 = vpop.f32.mrb[22].mxu1 }
 0xc17   :  { %v5542_v27 = vadd.f32 %v3333_v41, %v7573_v50  ;;  %v3335_v48 = vpop.f32.mrb[23].mxu0  ;;  %v3406_v59 = vpop.f32.mrb[23].mxu1  ;;  %v5558_v36 = vadd.f32 %v3404_v42, %v7583_v5 }
 0xc18   :  { %v5543_v46 = vadd.f32 %v3335_v48, %v7577_v30  ;;  %v5559_v1 = vadd.f32 %v3406_v59, %v7587_v12 }
 0xc19   :  { %v4315_v0 = vmul.f32 -1.442695, %v5542_v27  ;;  %v4317_v14 = vmul.f32 -1.442695, %v5558_v36 }
 0xc1a   :  { %v4316_v38 = vmul.f32 -1.442695, %v5543_v46 }
 0xc1b   :  { %5811 = vpow2.f32 %v4315_v0 }
 0xc1c   :  { %5813 = vpow2.f32 %v4316_v38 }
 0xc1d   :  { %5815 = vtanh.f32 %v5559_v1 }
 0xc1e   :  { %5817 = vpow2.f32 %v4317_v14 }
 0xc25   :  { %v5812_v63 = vpop.eup %5811 }
 0xc26   :  { %v3422_v16 = vadd.f32 1.0, %v5812_v63  ;;  %v5814_v21 = vpop.eup %5813 }
 0xc27   :  { %v3423_v20 = vadd.f32 1.0, %v5814_v21  ;;  %v5816_v17 = vpop.eup %5815 }
 0xc28   :  { %5819 = vrcp.f32 %v3422_v16  ;;  %v5818_v43 = vpop.eup %5817 }
 0xc29   :  { %5821 = vrcp.f32 %v3423_v20  ;;  %v3424_v10 = vadd.f32 1.0, %v5818_v43 }
 0xc2b   :  { %5823 = vrcp.f32 %v3424_v10 }
 0xc32   :  { %v5820_v18 = vpop.eup %5819 }
 0xc33   :  { %v3433_v23 = vmul.f32 %v5820_v18, %v5816_v17  ;;  %v5822_v62 = vpop.eup %5821 }
 0xc34   :  { %v3432_v37 = vmul.f32 %v5822_v62, %v7678_v32 }
 0xc35   :  { %v5824_v55 = vpop.eup %5823 }
 0xc36   :  { %v7720_v22 = vadd.f32 %v3433_v23, %v3432_v37 }
 0xc38   :  { %5825 = vtanh.f32 %v7720_v22 }
 0xc42   :  { %v5826_v52 = vpop.eup %5825 }
 0xc43   :  { %v3436_v58 = vmul.f32 %v5826_v52, %v5824_v55 }
 0xc45   :  { %3506 = vmatmul.mubr.f32.vlgmr.msra.gmra.mrb[24].mxu0 %v3436_v58  ;;  %3577 = vmatmul.mubr.f32.vlgmr.msra.gmra.mrb[24].mxu1 %v3436_v58 }
 0xc46   :  { %5291 = vmatpush1.bf16.msra.mxu0 %v7250_v6  ;;  %5323 = vmatpush1.bf16.msra.mxu1 %v7259_v29 }
 0xc47   :  { %5293 = vmatprep.subr.bf16.mxu0 %v7273_v34  ;;  %5325 = vmatprep.subr.bf16.mxu1 %v7284_v8 }
 0xc48   :  { %3679 = vmatprep.mubr.f32.mxu0 %v5895_v3  ;;  %3750 = vmatprep.mubr.f32.mxu1 %v5895_v3 }
 0xc4a   :  { %5295 = vmatpush1.bf16.msra.mxu0 %v7286_v25  ;;  %5327 = vmatpush1.bf16.msra.mxu1 %v7295_v31 }
 0xc4b   :  { %5297 = vmatprep.subr.bf16.mxu0 %v7309_v49  ;;  %5329 = vmatprep.subr.bf16.mxu1 %v7320_v15 }
 0xc4e   :  { %5299 = vmatpush1.bf16.msra.mxu0 %v7322_v28  ;;  %5331 = vmatpush1.bf16.msra.mxu1 %v7331_v4 }
 0xc4f   :  { %5301 = vmatprep.subr.bf16.mxu0 %v7345_v57  ;;  %5333 = vmatprep.subr.bf16.mxu1 %v7356_v56 }
 0xc52   :  { %5303 = vmatpush1.bf16.msra.mxu0 %v7358_v60  ;;  %5335 = vmatpush1.bf16.msra.mxu1 %v7367_v2 }
 0xc53   :  { %5305 = vmatprep.subr.bf16.mxu0 %v7381_v39  ;;  %5337 = vmatprep.subr.bf16.mxu1 %v7392_v47 }
 0xc56   :  { %5307 = vmatpush1.bf16.msra.mxu0 %v7394_v19  ;;  %5339 = vmatpush1.bf16.msra.mxu1 %v7406_v40 }
 0xc57   :  { %5309 = vmatprep.subr.bf16.mxu0 %v7419_v7  ;;  %5341 = vmatprep.subr.bf16.mxu1 %v7421_v53 }
 0xc5a   :  { %5311 = vmatpush1.bf16.msra.mxu0 %v7433_v44  ;;  %5343 = vmatpush1.bf16.msra.mxu1 %v7446_v61 }
 0xc5b   :  { %5313 = vmatprep.subr.bf16.mxu0 %v7448_v11  ;;  %5345 = vmatprep.subr.bf16.mxu1 %v7459_v26 }
 0xc5e   :  { %5315 = vmatpush1.bf16.msra.mxu0 %v7471_v33  ;;  %5347 = vmatpush1.bf16.msra.mxu1 %v7475_v51 }
 0xc5f   :  { %5317 = vmatprep.subr.bf16.mxu0 %v7489_v24  ;;  %5349 = vmatprep.subr.bf16.mxu1 %v7500_v13 }
 0xc62   :  { %5319 = vmatpush1.bf16.msra.mxu0 %v7502_v35  ;;  %5351 = vmatpush1.bf16.msra.mxu1 %v7511_v54 }
 0xc63   :  { %5353 = vmatprep.subr.bf16.mxu0 %v7237_v45  ;;  %5385 = vmatprep.subr.bf16.mxu1 %v7248_v9 }
 0xd18   :  { %v3507_v32 = vpop.f32.mrb[24].mxu0  ;;  %v3578_v41 = vpop.f32.mrb[24].mxu1 }
 0xd19   :  { %v5544_v42 = vadd.f32 %v3507_v32, %v7573_v50  ;;  %v3509_v27 = vpop.f32.mrb[25].mxu0  ;;  %v3580_v48 = vpop.f32.mrb[25].mxu1  ;;  %v5560_v38 = vadd.f32 %v3578_v41, %v7583_v5 }
 0xd1a   :  { %v5545_v59 = vadd.f32 %v3509_v27, %v7577_v30  ;;  %v5561_v36 = vadd.f32 %v3580_v48, %v7587_v12 }
 0xd1b   :  { %v4318_v46 = vmul.f32 -1.442695, %v5544_v42  ;;  %v4320_v1 = vmul.f32 -1.442695, %v5560_v38 }
 0xd1c   :  { %v4319_v0 = vmul.f32 -1.442695, %v5545_v59 }
 0xd1d   :  { %5827 = vpow2.f32 %v4318_v46 }
 0xd1e   :  { %5829 = vpow2.f32 %v4319_v0 }
 0xd1f   :  { %5831 = vtanh.f32 %v5561_v36 }
 0xd20   :  { %5833 = vpow2.f32 %v4320_v1 }
 0xd27   :  { %v5828_v14 = vpop.eup %5827 }
 0xd28   :  { %v3596_v63 = vadd.f32 1.0, %v5828_v14  ;;  %v5830_v16 = vpop.eup %5829 }
 0xd29   :  { %v3597_v21 = vadd.f32 1.0, %v5830_v16  ;;  %v5832_v20 = vpop.eup %5831 }
 0xd2a   :  { %5835 = vrcp.f32 %v3596_v63  ;;  %v5834_v17 = vpop.eup %5833 }
 0xd2b   :  { %5837 = vrcp.f32 %v3597_v21  ;;  %v3598_v62 = vadd.f32 1.0, %v5834_v17 }
 0xd2d   :  { %5839 = vrcp.f32 %v3598_v62 }
 0xd34   :  { %v5836_v43 = vpop.eup %5835 }
 0xd35   :  { %v3607_v18 = vmul.f32 %v5836_v43, %v5832_v20  ;;  %v5838_v23 = vpop.eup %5837 }
 0xd36   :  { %v3606_v10 = vmul.f32 %v5838_v23, %v7720_v22 }
 0xd37   :  { %v5840_v55 = vpop.eup %5839 }
 0xd38   :  { %v7762_v37 = vadd.f32 %v3607_v18, %v3606_v10 }
 0xd3a   :  { %5841 = vtanh.f32 %v7762_v37 }
 0xd44   :  { %v5842_v52 = vpop.eup %5841 }
 0xd45   :  { %v3610_v58 = vmul.f32 %v5842_v52, %v5840_v55  ;;  %v4150_v52 = vld [vmem:[%s7924_s9 + $0x18] sm:$0xff] }
 0xd47   :  { %3680 = vmatmul.mubr.f32.vlgmr.msra.gmra.mrb[26].mxu0 %v3610_v58  ;;  %3751 = vmatmul.mubr.f32.vlgmr.msra.gmra.mrb[26].mxu1 %v3610_v58 }
 0xd48   :  { %5355 = vmatpush1.bf16.msra.mxu0 %v7250_v6  ;;  %5387 = vmatpush1.bf16.msra.mxu1 %v7259_v29 }
 0xd49   :  { %5357 = vmatprep.subr.bf16.mxu0 %v7273_v34  ;;  %5389 = vmatprep.subr.bf16.mxu1 %v7284_v8 }
 0xd4a   :  { %3853 = vmatprep.mubr.f32.mxu0 %v5895_v3  ;;  %3924 = vmatprep.mubr.f32.mxu1 %v5895_v3 }
 0xd4c   :  { %5359 = vmatpush1.bf16.msra.mxu0 %v7286_v25  ;;  %5391 = vmatpush1.bf16.msra.mxu1 %v7295_v31 }
 0xd4d   :  { %5361 = vmatprep.subr.bf16.mxu0 %v7309_v49  ;;  %5393 = vmatprep.subr.bf16.mxu1 %v7320_v15 }
 0xd50   :  { %5363 = vmatpush1.bf16.msra.mxu0 %v7322_v28  ;;  %5395 = vmatpush1.bf16.msra.mxu1 %v7331_v4 }
 0xd51   :  { %5365 = vmatprep.subr.bf16.mxu0 %v7345_v57  ;;  %5397 = vmatprep.subr.bf16.mxu1 %v7356_v56 }
 0xd54   :  { %5367 = vmatpush1.bf16.msra.mxu0 %v7358_v60  ;;  %5399 = vmatpush1.bf16.msra.mxu1 %v7367_v2 }
 0xd55   :  { %5369 = vmatprep.subr.bf16.mxu0 %v7381_v39  ;;  %5401 = vmatprep.subr.bf16.mxu1 %v7392_v47 }
 0xd58   :  { %5371 = vmatpush1.bf16.msra.mxu0 %v7394_v19  ;;  %5403 = vmatpush1.bf16.msra.mxu1 %v7406_v40 }
 0xd59   :  { %5373 = vmatprep.subr.bf16.mxu0 %v7419_v7  ;;  %5405 = vmatprep.subr.bf16.mxu1 %v7421_v53 }
 0xd5c   :  { %5375 = vmatpush1.bf16.msra.mxu0 %v7433_v44  ;;  %5407 = vmatpush1.bf16.msra.mxu1 %v7446_v61 }
 0xd5d   :  { %5377 = vmatprep.subr.bf16.mxu0 %v7448_v11  ;;  %5409 = vmatprep.subr.bf16.mxu1 %v7459_v26 }
 0xd60   :  { %5379 = vmatpush1.bf16.msra.mxu0 %v7471_v33  ;;  %5411 = vmatpush1.bf16.msra.mxu1 %v7475_v51 }
 0xd61   :  { %5381 = vmatprep.subr.bf16.mxu0 %v7489_v24  ;;  %5413 = vmatprep.subr.bf16.mxu1 %v7500_v13 }
 0xd64   :  { %5383 = vmatpush1.bf16.msra.mxu0 %v7502_v35  ;;  %5415 = vmatpush1.bf16.msra.mxu1 %v7511_v54 }
 0xd65   :  { %5417 = vmatprep.subr.bf16.mxu0 %v7237_v45  ;;  %5449 = vmatprep.subr.bf16.mxu1 %v7248_v9 }
 0xe1a   :  { %v3681_v22 = vpop.f32.mrb[26].mxu0  ;;  %v3752_v32 = vpop.f32.mrb[26].mxu1 }
 0xe1b   :  { %v5546_v41 = vadd.f32 %v3681_v22, %v7573_v50  ;;  %v3683_v42 = vpop.f32.mrb[27].mxu0  ;;  %v3754_v27 = vpop.f32.mrb[27].mxu1  ;;  %v5562_v0 = vadd.f32 %v3752_v32, %v7583_v5  ;;  %v4151_v22 = vld [vmem:[%s7924_s9 + $0x20] sm:$0xff]  ;;  %v4152_v32 = vld [vmem:[%s7924_s9 + $0x28] sm:$0xff] }
 0xe1c   :  { %v5547_v48 = vadd.f32 %v3683_v42, %v7577_v30  ;;  %v5563_v38 = vadd.f32 %v3754_v27, %v7587_v12  ;;  %v4153_v42 = vld [vmem:[%s7924_s9 + $0x30] sm:$0xff]  ;;  %v4154_v27 = vld [vmem:[%s7924_s9 + $0x38] sm:$0xff] }
 0xe1d   :  { %v4321_v59 = vmul.f32 -1.442695, %v5546_v41  ;;  %v4323_v36 = vmul.f32 -1.442695, %v5562_v0  ;;  %v5487_v41 = vpack.c.bf16 %v4152_v32, %v4151_v22 }
 0xe1e   :  { %v4322_v46 = vmul.f32 -1.442695, %v5547_v48  ;;  %v5490_v48 = vpack.c.bf16 %v4154_v27, %v4153_v42 }
 0xe1f   :  { %5843 = vpow2.f32 %v4321_v59  ;;  %v4155_v59 = vld [vmem:[%s7924_s9 + $0x40] sm:$0xff] }
 0xe20   :  { %5845 = vpow2.f32 %v4322_v46  ;;  %v4156_v46 = vld [vmem:[%s7924_s9 + $0x48] sm:$0xff] }
 0xe21   :  { %5847 = vtanh.f32 %v5563_v38  ;;  %v5493_v0 = vpack.c.bf16 %v4156_v46, %v4155_v59  ;;  %v4157_v38 = vld [vmem:[%s7924_s9 + $0x50] sm:$0xff] }
 0xe22   :  { %5849 = vpow2.f32 %v4323_v36  ;;  %v4158_v36 = vld [vmem:[%s7924_s9 + $0x58] sm:$0xff] }
 0xe29   :  { %v5844_v45 = vpop.eup %5843 }
 0xe2a   :  { %v3770_v1 = vadd.f32 1.0, %v5844_v45  ;;  %v5846_v9 = vpop.eup %5845  ;;  %v5496_v45 = vpack.c.bf16 %v4158_v36, %v4157_v38 }
 0xe2b   :  { %v3771_v14 = vadd.f32 1.0, %v5846_v9  ;;  %v5848_v63 = vpop.eup %5847  ;;  %v4160_v9 = vld [vmem:[%s7924_s9 + $0x68] sm:$0xff] }
 0xe2c   :  { %5851 = vrcp.f32 %v3770_v1  ;;  %v5850_v16 = vpop.eup %5849  ;;  %v4159_v1 = vld [vmem:[%s7924_s9 + $0x60] sm:$0xff] }
 0xe2d   :  { %5853 = vrcp.f32 %v3771_v14  ;;  %v3772_v43 = vadd.f32 1.0, %v5850_v16  ;;  %v5499_v14 = vpack.c.bf16 %v4160_v9, %v4159_v1  ;;  %v4162_v16 = vld [vmem:[%s7924_s9 + $0x78] sm:$0xff] }
 0xe2f   :  { %5855 = vrcp.f32 %v3772_v43 }
 0xe36   :  { %v5852_v21 = vpop.eup %5851 }
 0xe37   :  { %v3781_v20 = vmul.f32 %v5852_v21, %v5848_v63  ;;  %v5854_v17 = vpop.eup %5853  ;;  %v4161_v63 = vld [vmem:[%s7924_s9 + $0x70] sm:$0xff] }
 0xe38   :  { %v3780_v18 = vmul.f32 %v5854_v17, %v7762_v37  ;;  %v4149_v37 = vld [vmem:[%s7924_s9 + $0x10] sm:$0xff]  ;;  %v5502_v21 = vpack.c.bf16 %v4162_v16, %v4161_v63 }
 0xe39   :  { %v5856_v62 = vpop.eup %5855  ;;  %v5484_v58 = vpack.c.bf16 %v4150_v52, %v4149_v37 }
 0xe3a   :  { %v7804_v23 = vadd.f32 %v3781_v20, %v3780_v18 }
 0xe3c   :  { %5857 = vtanh.f32 %v7804_v23 }
 0xe46   :  { %v5858_v10 = vpop.eup %5857 }
 0xe47   :  { %v3784_v55 = vmul.f32 %v5858_v10, %v5856_v62 }
 0xe49   :  { %3854 = vmatmul.mubr.f32.vlgmr.msra.gmra.mrb[28].mxu0 %v3784_v55  ;;  %3925 = vmatmul.mubr.f32.vlgmr.msra.gmra.mrb[28].mxu1 %v3784_v55 }
 0xe4a   :  { %5419 = vmatpush1.bf16.msra.mxu0 %v7250_v6  ;;  %5451 = vmatpush1.bf16.msra.mxu1 %v7259_v29 }
 0xe4b   :  { %5421 = vmatprep.subr.bf16.mxu0 %v7273_v34  ;;  %5453 = vmatprep.subr.bf16.mxu1 %v7284_v8 }
 0xe4c   :  { %4027 = vmatprep.mubr.f32.mxu0 %v5895_v3  ;;  %4098 = vmatprep.mubr.f32.mxu1 %v5895_v3 }
 0xe4e   :  { %5423 = vmatpush1.bf16.msra.mxu0 %v7286_v25  ;;  %5455 = vmatpush1.bf16.msra.mxu1 %v7295_v31 }
 0xe4f   :  { %5425 = vmatprep.subr.bf16.mxu0 %v7309_v49  ;;  %5457 = vmatprep.subr.bf16.mxu1 %v7320_v15 }
 0xe52   :  { %5427 = vmatpush1.bf16.msra.mxu0 %v7322_v28  ;;  %5459 = vmatpush1.bf16.msra.mxu1 %v7331_v4 }
 0xe53   :  { %5429 = vmatprep.subr.bf16.mxu0 %v7345_v57  ;;  %5461 = vmatprep.subr.bf16.mxu1 %v7356_v56 }
 0xe56   :  { %5431 = vmatpush1.bf16.msra.mxu0 %v7358_v60  ;;  %5463 = vmatpush1.bf16.msra.mxu1 %v7367_v2 }
 0xe57   :  { %5433 = vmatprep.subr.bf16.mxu0 %v7381_v39  ;;  %5465 = vmatprep.subr.bf16.mxu1 %v7392_v47 }
 0xe5a   :  { %5435 = vmatpush1.bf16.msra.mxu0 %v7394_v19  ;;  %5467 = vmatpush1.bf16.msra.mxu1 %v7406_v40 }
 0xe5b   :  { %5437 = vmatprep.subr.bf16.mxu0 %v7419_v7  ;;  %5469 = vmatprep.subr.bf16.mxu1 %v7421_v53 }
 0xe5e   :  { %5439 = vmatpush1.bf16.msra.mxu0 %v7433_v44  ;;  %5471 = vmatpush1.bf16.msra.mxu1 %v7446_v61 }
 0xe5f   :  { %5441 = vmatprep.subr.bf16.mxu0 %v7448_v11  ;;  %5473 = vmatprep.subr.bf16.mxu1 %v7459_v26 }
 0xe62   :  { %5443 = vmatpush1.bf16.msra.mxu0 %v7471_v33  ;;  %5475 = vmatpush1.bf16.msra.mxu1 %v7475_v51 }
 0xe63   :  { %5445 = vmatprep.subr.bf16.mxu0 %v7489_v24  ;;  %5477 = vmatprep.subr.bf16.mxu1 %v7500_v13  ;;  %v4147_v24 = vld [vmem:[%s7924_s9] sm:$0xff]  ;;  %v4148_v13 = vld [vmem:[%s7924_s9 + $0x8] sm:$0xff] }
 0xe66   :  { %5447 = vmatpush1.bf16.msra.mxu0 %v7502_v35  ;;  %5479 = vmatpush1.bf16.msra.mxu1 %v7511_v54  ;;  %v5481_v35 = vpack.c.bf16 %v4148_v13, %v4147_v24  ;;  %v5896_v54 = vmov 0.0|0.0  }
 0xe67   :  { %5480 = vmatprep.subr.bf16.mxu0 %v5896_v54 }
 0xf1c   :  { %v3855_v6 = vpop.f32.mrb[28].mxu0  ;;  %v3926_v29 = vpop.f32.mrb[28].mxu1 }
 0xf1d   :  { %v5548_v34 = vadd.f32 %v3855_v6, %v7573_v50  ;;  %v3857_v8 = vpop.f32.mrb[29].mxu0  ;;  %v3928_v25 = vpop.f32.mrb[29].mxu1  ;;  %v5564_v28 = vadd.f32 %v3926_v29, %v7583_v5 }
 0xf1e   :  { %v5549_v31 = vadd.f32 %v3857_v8, %v7577_v30  ;;  %v5565_v4 = vadd.f32 %v3928_v25, %v7587_v12 }
 0xf1f   :  { %v4324_v49 = vmul.f32 -1.442695, %v5548_v34  ;;  %v4326_v57 = vmul.f32 -1.442695, %v5564_v28 }
 0xf20   :  { %v4325_v15 = vmul.f32 -1.442695, %v5549_v31 }
 0xf21   :  { %5859 = vpow2.f32 %v4324_v49 }
 0xf22   :  { %5861 = vpow2.f32 %v4325_v15 }
 0xf23   :  { %5863 = vtanh.f32 %v5565_v4 }
 0xf24   :  { %5865 = vpow2.f32 %v4326_v57 }
 0xf2b   :  { %v5860_v56 = vpop.eup %5859 }
 0xf2c   :  { %v3944_v60 = vadd.f32 1.0, %v5860_v56  ;;  %v5862_v2 = vpop.eup %5861 }
 0xf2d   :  { %v3945_v39 = vadd.f32 1.0, %v5862_v2  ;;  %v5864_v47 = vpop.eup %5863  ;;  %v4330_v2 = vld [vmem:[%s7925_s10] ss:$0 sm:$0xff] }
 0xf2e   :  { %5867 = vrcp.f32 %v3944_v60  ;;  %v5866_v19 = vpop.eup %5865 }
 0xf2f   :  { %5869 = vrcp.f32 %v3945_v39  ;;  %v3946_v44 = vadd.f32 1.0, %v5866_v19 }
 0xf31   :  { %5871 = vrcp.f32 %v3946_v44 }
 0xf38   :  { %v5868_v40 = vpop.eup %5867 }
 0xf39   :  { %v3955_v7 = vmul.f32 %v5868_v40, %v5864_v47  ;;  %v5870_v53 = vpop.eup %5869 }
 0xf3a   :  { %v3954_v61 = vmul.f32 %v5870_v53, %v7804_v23 }
 0xf3b   :  { %v5872_v26 = vpop.eup %5871 }
 0xf3c   :  { %v7844_v11 = vadd.f32 %v3955_v7, %v3954_v61 }
 0xf3e   :  { %5873 = vtanh.f32 %v7844_v11 }
 0xf48   :  { %v5874_v33 = vpop.eup %5873 }
 0xf49   :  { %v3958_v51 = vmul.f32 %v5874_v33, %v5872_v26 }
 0xf4b   :  { %4028 = vmatmul.mubr.f32.vlgmr.msra.gmra.mrb[30].mxu0 %v3958_v51  ;;  %4099 = vmatmul.mubr.f32.vlgmr.msra.gmra.mrb[30].mxu1 %v3958_v51 }
 0xf4c   :  { %5482 = vmatpush3.bf16.msra.mxu0 %v5481_v35  ;;  %4381 = vmatprep.mubr.msk.f32.mxu0 %vm5897_vm1, %v5895_v3 }
 0xf4d   :  { %5483 = vmatprep.subr.bf16.mxu0 %v5896_v54 }
 0xf50   :  { %5485 = vmatpush3.bf16.msra.mxu0 %v5484_v58 }
 0xf51   :  { %5486 = vmatprep.subr.bf16.mxu0 %v5896_v54 }
 0xf54   :  { %5488 = vmatpush3.bf16.msra.mxu0 %v5487_v41 }
 0xf55   :  { %5489 = vmatprep.subr.bf16.mxu0 %v5896_v54 }
 0xf58   :  { %5491 = vmatpush3.bf16.msra.mxu0 %v5490_v48 }
 0xf59   :  { %5492 = vmatprep.subr.bf16.mxu0 %v5896_v54 }
 0xf5c   :  { %5494 = vmatpush3.bf16.msra.mxu0 %v5493_v0 }
 0xf5d   :  { %5495 = vmatprep.subr.bf16.mxu0 %v5896_v54 }
 0xf60   :  { %5497 = vmatpush3.bf16.msra.mxu0 %v5496_v45 }
 0xf61   :  { %5498 = vmatprep.subr.bf16.mxu0 %v5896_v54 }
 0xf64   :  { %5500 = vmatpush3.bf16.msra.mxu0 %v5499_v14 }
 0xf65   :  { %5501 = vmatprep.subr.bf16.mxu0 %v5896_v54 }
 0xf68   :  { %5503 = vmatpush3.bf16.msra.mxu0 %v5502_v21 }
0x101e   :  { %v4029_v20 = vpop.f32.mrb[30].mxu0  ;;  %v4100_v17 = vpop.f32.mrb[30].mxu1 }
0x101f   :  { %v5550_v43 = vadd.f32 %v4029_v20, %v7573_v50  ;;  %v4031_v3 = vpop.f32.mrb[31].mxu0  ;;  %v4102_v18 = vpop.f32.mrb[31].mxu1  ;;  %v5566_v55 = vadd.f32 %v4100_v17, %v7583_v5 }
0x1020   :  { %v5551_v23 = vadd.f32 %v4031_v3, %v7577_v30  ;;  %v5567_v6 = vadd.f32 %v4102_v18, %v7587_v12 }
0x1021   :  { %v4327_v62 = vmul.f32 -1.442695, %v5550_v43  ;;  %v4329_v29 = vmul.f32 -1.442695, %v5566_v55 }
0x1022   :  { %v4328_v10 = vmul.f32 -1.442695, %v5551_v23 }
0x1023   :  { %5875 = vpow2.f32 %v4327_v62 }
0x1024   :  { %5877 = vpow2.f32 %v4328_v10 }
0x1025   :  { %5879 = vtanh.f32 %v5567_v6 }
0x1026   :  { %5881 = vpow2.f32 %v4329_v29 }
0x102d   :  { %v5876_v34 = vpop.eup %5875 }
0x102e   :  { %v4118_v8 = vadd.f32 1.0, %v5876_v34  ;;  %v5878_v25 = vpop.eup %5877 }
0x102f   :  { %v4119_v50 = vadd.f32 1.0, %v5878_v25  ;;  %v5880_v31 = vpop.eup %5879 }
0x1030   :  { %5883 = vrcp.f32 %v4118_v8  ;;  %v5882_v49 = vpop.eup %5881 }
0x1031   :  { %5885 = vrcp.f32 %v4119_v50  ;;  %v4120_v4 = vadd.f32 1.0, %v5882_v49 }
0x1033   :  { %5887 = vrcp.f32 %v4120_v4 }
0x103a   :  { %v5884_v30 = vpop.eup %5883 }
0x103b   :  { %v4129_v15 = vmul.f32 %v5884_v30, %v5880_v31  ;;  %v5886_v28 = vpop.eup %5885 }
0x103c   :  { %v4128_v57 = vmul.f32 %v5886_v28, %v7844_v11 }
0x103d   :  { %v5888_v12 = vpop.eup %5887 }
0x103e   :  { %v4130_v5 = vadd.f32 %v4129_v15, %v4128_v57 }
0x1040   :  { %5889 = vtanh.f32 %v4130_v5  ;;  %4145 = vst [vmem:[%s7921_s13 + $0x8] sm:$0xff] %v4130_v5 }
0x104a   :  { %v5890_v56 = vpop.eup %5889 }
0x104b   :  { %v4132_v60 = vmul.f32 %v5890_v56, %v5888_v12 }
0x104d   :  { %4141 = vst [vmem:[%s7922_s12 + $0x8] sm:$0xff] %v4132_v60  ;;  %4382 = vmatmul.mubr.f32.vlgmr.msra.gmra.mrb[32].mxu0 %v4132_v60 }
0x1120   :  { %v4236_v39 = vpop.f32.mrb[32].mxu0 }
0x1121   :  { %v4237_v47 = vadd.f32 %v4330_v2, %v4236_v39  ;;  %v4383_v19 = vpop.f32.mrb[33].mxu0 }
0x1123   :  { %v4331_v40 = vmul.f32 -1.442695, %v4237_v47 }
0x1125   :  { %5891 = vpow2.f32 %v4331_v40 }
0x112f   :  { %v5892_v7 = vpop.eup %5891 }
0x1130   :  { %v4243_v53 = vadd.f32 1.0, %v5892_v7 }
0x1132   :  { %5893 = vrcp.f32 %v4243_v53 }
0x113c   :  { %v5894_v44 = vpop.eup %5893 }
0x113d   :  { %4246 = vst [vmem:[%s7926_s11] sm:$0xff] %v5894_v44 }

</bundles_post_ra>
